<compile_context>
chip_gen: v7x
topology: tpu7x:2x2x1
jax: 0.10.0
libtpu: 0.0.40
codegen_flags: <defaults>
</compile_context>

<pallas_src>
import functools

import numpy as np

import jax
import jax.numpy as jnp
from jax.experimental import pallas as pl
from jax.experimental.pallas import tpu as pltpu

D = 300          # rel_dict embedding size (fixed by MoCo's nn.Linear(300, 512))
DP = 384         # D padded to a lane multiple
FEAT = 2 * D     # AE feature_size = 600
FEATP = 640      # FEAT padded to a lane multiple
LATENT = 128     # AE latent_size
OUT = 512        # AE output_size == MoCo hidden size
HID = 512        # MoCo hidden size
TOPK = 2
DISK = 20
KV = DISK + 1    # [positive | 20 negatives]
T_MOCO = 0.07


def reason_kernel(pos_cat_ref, kv_ref,
                  we1, be1, we2, be2, wd1, bd1, wd2, bd2,    # AE (bf16 W, f32 b)
                  wz1, bz1, wz2, bz2,                        # MoCo encoder_z
                  wi1, bi1, wi2, bi2,                        # MoCo encoder_inp (== encoder_k)
                  loss_vae_ref, loss_csl_ref, zrel_ref,
                  *, batch, tile_b):
    g = pl.program_id(0)
    tb = tile_b

    def lin(a_bf16, w_ref, b_ref):
        # bf16 MXU matmul with f32 accumulation + f32 bias.
        return jnp.dot(a_bf16, w_ref[...], preferred_element_type=jnp.float32) + b_ref[...]

    x = pos_cat_ref[...]                       # [TB, FEATP] f32 (MSE target; cols >= 600 are 0)
    x_bf = x.astype(jnp.bfloat16)              # hoisted once, reused below

    # ---------------- AE: encoder -> decoder -> MSE ----------------
    h = jnp.tanh(lin(x_bf, we1, be1))                              # [TB, LATENT]
    z = jnp.tanh(lin(h.astype(jnp.bfloat16), we2, be2))            # [TB, OUT]
    dl = jnp.tanh(lin(z.astype(jnp.bfloat16), wd1, bd1))           # [TB, LATENT]
    xr = jax.nn.sigmoid(lin(dl.astype(jnp.bfloat16), wd2, bd2))    # [TB, FEATP]
    # Padded bd2 columns hold -30 -> sigmoid ~ 1e-13, so no per-tile column mask is needed.
    diff = x - xr
    mse_rows = jnp.sum(diff * diff, axis=-1, keepdims=True) * (1.0 / FEAT)   # [TB, 1]

    # ---------------- MoCo: encoder_z + fused key/negative encoder + CE ----------------
    zp = lin(jnp.maximum(lin(z.astype(jnp.bfloat16), wz1, bz1), 0.0).astype(jnp.bfloat16),
             wz2, bz2)                                             # [TB, HID] f32

    # One fused encoder_inp/encoder_k pass over [positive | 20 negatives] for the whole tile.
    kvh = jnp.maximum(lin(kv_ref[...], wi1, bi1), 0.0)             # [KV*TB, HID]
    kve = lin(kvh.astype(jnp.bfloat16), wi2, bi2)                  # [KV*TB, HID]

    # Per-query scores: only the 21 needed dot products (no dense TBxTB*20 matmul).
    cols = []
    for k in range(KV):                                            # static unroll, KV = 21
        ek = kve[k * tb:(k + 1) * tb, :]                           # [TB, HID] (row-aligned slice)
        cols.append(jnp.sum(zp * ek, axis=-1, keepdims=True))      # [TB, 1]
    scores = jnp.concatenate(cols, axis=1) * (1.0 / T_MOCO)        # [TB, KV], col 0 = positive

    # CrossEntropyLoss with target 0: logsumexp(scores) - scores[:, 0]
    m = jnp.max(scores, axis=-1, keepdims=True)
    lse = m + jnp.log(jnp.sum(jnp.exp(scores - m), axis=-1, keepdims=True))
    ce_rows = lse - scores[:, 0:1]                                 # [TB, 1]

    rows = g * tb + jax.lax.broadcasted_iota(jnp.int32, (tb, 1), 0)
    valid = rows < batch                                           # mask padded batch rows

    lv = jnp.sum(jnp.where(valid, mse_rows, 0.0))
    lc = jnp.sum(jnp.where(valid, ce_rows, 0.0))

    loss_vae_ref[...] = jnp.zeros((8, 128), jnp.float32) + lv
    loss_csl_ref[...] = jnp.zeros((8, 128), jnp.float32) + lc
    zrel_ref[...] = zp


def init_params(key):
    """Deterministic synthetic parameters (layout: W[in, out], b[1, out]).

    encoder_k is an exact copy of encoder_inp (MoCo.__init__) and the momentum update is
    the identity inside forward, so encoder_k weights are not materialized separately.
    """
    def lin(k, n_in, n_out):
        kw, kb = jax.random.split(k)
        w = jax.random.normal(kw, (n_in, n_out), jnp.float32) * (1.0 / jnp.sqrt(n_in))
        b = jax.random.normal(kb, (1, n_out), jnp.float32) * 0.01
        return w, b

    keys = jax.random.split(key, 8)
    p = {}
    p["we1"], p["be1"] = lin(keys[0], FEAT, LATENT)
    p["we2"], p["be2"] = lin(keys[1], LATENT, OUT)
    p["wd1"], p["bd1"] = lin(keys[2], OUT, LATENT)
    p["wd2"], p["bd2"] = lin(keys[3], LATENT, FEAT)
    p["wz1"], p["bz1"] = lin(keys[4], HID, HID)
    p["wz2"], p["bz2"] = lin(keys[5], HID, HID)
    p["wi1"], p["bi1"] = lin(keys[6], D, HID)
    p["wi2"], p["bi2"] = lin(keys[7], HID, HID)
    return p


def _pad_to(a, shape):
    out = jnp.zeros(shape, a.dtype)
    return out.at[tuple(slice(0, s) for s in a.shape)].set(a)


def _choose_tile(b):
    """TB: multiple of 16 (bf16 sublane packing); <=128 rows; >=2 tiles when possible (v7x)."""
    r16 = lambda n: ((n + 15) // 16) * 16
    if b <= 16:
        return 16
    return min(128, r16(-(-b // 2)))


@jax.jit
def reason_forward(logits, rels, rel_dict, params):
    B = logits.shape[0]
    TB = _choose_tile(B)
    G = -(-B // TB)
    Bp = G * TB

    # ---- glue: sorts + data-dependent gathers (torch .sort / rel_dict indexing) ----
    desc = jnp.argsort(-logits, axis=1)                 # descending
    asc = jnp.argsort(logits, axis=1)                   # ascending
    key_top = rels[desc[:, :TOPK], 1]                   # [B, 2]
    key_dis = rels[asc[:, :DISK], 1]                    # [B, 20]
    pos_d1 = rel_dict[key_top[:, 0]]                    # [B, D]
    pos_d2 = rel_dict[key_top[:, 1]]                    # [B, D]
    neg = rel_dict[key_dis]                             # [B, DISK, D]

    # AE input stays f32 (it is also the MSE target).
    pos_cat = jnp.concatenate([pos_d1, pos_d2], axis=1)                        # [B, FEAT]
    pos_cat_p = jnp.zeros((Bp, FEATP), jnp.float32).at[:B, :FEAT].set(pos_cat)

    # MoCo key/negative stack, tile-major so each grid step reads one contiguous
    # [KV*TB, DP] bf16 slab: row (g, k, r) = vector k of query g*TB + r (k == 0 is the positive).
    kvq = jnp.concatenate([pos_d1[:, None, :], neg], axis=1)                   # [B, KV, D]
    kvq = jnp.zeros((Bp, KV, D), jnp.float32).at[:B].set(kvq)
    kv_flat = kvq.reshape(G, TB, KV, D).transpose(0, 2, 1, 3).reshape(G * KV * TB, D)
    kv_p = jnp.zeros((G * KV * TB, DP), jnp.bfloat16).at[:, :D].set(kv_flat.astype(jnp.bfloat16))

    # ---- weights: pad to lane multiples, matmul weights in bf16, biases in f32 ----
    bf = jnp.bfloat16
    # Padded decoder-bias columns get -30 so sigmoid(pad) ~ 0 and the MSE needs no column mask.
    bd2_p = jnp.full((1, FEATP), -30.0, jnp.float32).at[:, :FEAT].set(params["bd2"])
    weights = [
        _pad_to(params["we1"], (FEATP, LATENT)).astype(bf), params["be1"],
        params["we2"].astype(bf),                           params["be2"],
        params["wd1"].astype(bf),                           params["bd1"],
        _pad_to(params["wd2"], (LATENT, FEATP)).astype(bf), bd2_p,
        params["wz1"].astype(bf),                           params["bz1"],
        params["wz2"].astype(bf),                           params["bz2"],
        _pad_to(params["wi1"], (DP, HID)).astype(bf),       params["bi1"],
        params["wi2"].astype(bf),                           params["bi2"],
    ]

    in_specs = [
        pl.BlockSpec((TB, FEATP), lambda g: (g, 0)),
        pl.BlockSpec((KV * TB, DP), lambda g: (g, 0)),
    ] + [pl.BlockSpec(w.shape, lambda g: (0, 0)) for w in weights]

    out_shapes = (
        jax.ShapeDtypeStruct((G * 8, 128), jnp.float32),   # per-tile loss_vae partials
        jax.ShapeDtypeStruct((G * 8, 128), jnp.float32),   # per-tile loss_csl partials
        jax.ShapeDtypeStruct((Bp, HID), jnp.float32),      # per-query z_p
    )
    out_specs = [
        pl.BlockSpec((8, 128), lambda g: (g, 0)),
        pl.BlockSpec((8, 128), lambda g: (g, 0)),
        pl.BlockSpec((TB, HID), lambda g: (g, 0)),
    ]

    flops = 2 * Bp * (FEATP * LATENT + LATENT * OUT + OUT * LATENT + LATENT * FEATP
                      + 2 * HID * HID + KV * (DP * HID + HID * HID) + KV * HID)
    transcendentals = Bp * (2 * LATENT + OUT + FEATP + KV + 1)
    bytes_accessed = (pos_cat_p.size * 4 + kv_p.size * 2
                      + sum(int(w.size) * int(w.dtype.itemsize) for w in weights)
                      + Bp * HID * 4 + 2 * G * 8 * 128 * 4)

    kern = functools.partial(reason_kernel, batch=B, tile_b=TB)
    loss_vae_p, loss_csl_p, zrel_p = pl.pallas_call(
        kern,
        out_shape=out_shapes,
        grid_spec=pltpu.PrefetchScalarGridSpec(
            num_scalar_prefetch=0,
            grid=(G,),
            in_specs=in_specs,
            out_specs=out_specs),
        compiler_params=pltpu.CompilerParams(
            dimension_semantics=("parallel",),
            vmem_limit_bytes=48 << 20),
        cost_estimate=pl.CostEstimate(
            flops=int(flops),
            transcendentals=int(transcendentals),
            bytes_accessed=int(bytes_accessed)),
    )(pos_cat_p, kv_p, *weights)

    # Per-tile partials -> total losses (each (8,128) block holds the same scalar).
    loss_vae = loss_vae_p.reshape(G, 8, 128)[:, 0, 0].sum().reshape(1)
    loss_csl = loss_csl_p.reshape(G, 8, 128)[:, 0, 0].sum().reshape(1)

    # z_rel starts as a zero row and grows by one row per query (torch.cat loop).
    z_rel = jnp.concatenate([jnp.zeros((1, HID), jnp.float32), zrel_p[:B]], axis=0)
    return loss_vae, loss_csl, z_rel


def reason_reference(logits, rels, rel_dict, params):
    """Pure-JAX f32 reference mirroring the PyTorch per-query loop (vectorized)."""
    desc = jnp.argsort(-logits, axis=1)
    asc = jnp.argsort(logits, axis=1)
    key_top = rels[desc[:, :TOPK], 1]
    key_dis = rels[asc[:, :DISK], 1]
    p1 = rel_dict[key_top[:, 0]]
    p2 = rel_dict[key_top[:, 1]]
    neg = rel_dict[key_dis]

    def lin(a, w, b):
        return a @ w + b

    x = jnp.concatenate([p1, p2], axis=1)
    h = jnp.tanh(lin(x, params["we1"], params["be1"]))
    z = jnp.tanh(lin(h, params["we2"], params["be2"]))
    dl = jnp.tanh(lin(z, params["wd1"], params["bd1"]))
    xr = jax.nn.sigmoid(lin(dl, params["wd2"], params["bd2"]))
    loss_vae = jnp.sum(jnp.mean((x - xr) ** 2, axis=1))

    zp = lin(jnp.maximum(lin(z, params["wz1"], params["bz1"]), 0.0), params["wz2"], params["bz2"])
    enc = lambda a: lin(jnp.maximum(lin(a, params["wi1"], params["bi1"]), 0.0),
                        params["wi2"], params["bi2"])
    pv = enc(p1)                                        # [B, HID]
    nv = enc(neg)                                       # [B, DISK, HID]
    pos = jnp.sum(zp * pv, axis=1, keepdims=True)
    negs = jnp.einsum('bh,bkh->bk', zp, nv)
    lg = jnp.concatenate([pos, negs], axis=1) / T_MOCO
    loss_csl = jnp.sum(jax.nn.logsumexp(lg, axis=1) - lg[:, 0])
    z_rel = jnp.concatenate([jnp.zeros((1, HID), jnp.float32), zp], axis=0)
    return loss_vae.reshape(1), loss_csl.reshape(1), z_rel


if __name__ == "__main__":
    key = jax.random.PRNGKey(0)
    k_par, k_log, k_rel, k_dic = jax.random.split(key, 4)

    B = 2            # number of queries (rows of `logits`)
    R = 32           # number of candidate relations (>= DISK)
    K = 16           # rel_dict size

    params = init_params(k_par)
    logits = jax.random.normal(k_log, (B, R), jnp.float32)
    rels = jnp.stack(
        [jnp.arange(R, dtype=jnp.int32),
         jax.random.randint(k_rel, (R,), 0, K, dtype=jnp.int32)], axis=1)     # [R, 2]
    rel_dict = jax.random.normal(k_dic, (K, D), jnp.float32)

    loss_vae, loss_csl, z_rel = reason_forward(logits, rels, rel_dict, params)
    jax.block_until_ready((loss_vae, loss_csl, z_rel))

    assert loss_vae.shape == (1,)
    assert loss_csl.shape == (1,)
    assert z_rel.shape == (B + 1, HID)
    assert bool(jnp.isfinite(loss_vae).all() and jnp.isfinite(loss_csl).all())

    # f32 reference check (loose tolerances: kernel matmuls are bf16 with f32 accumulation).
    ref_lv, ref_lc, ref_zr = reason_reference(logits, rels, rel_dict, params)
    np.testing.assert_allclose(np.asarray(loss_vae), np.asarray(ref_lv), rtol=0.08, atol=2e-2)
    np.testing.assert_allclose(np.asarray(loss_csl), np.asarray(ref_lc), rtol=0.15, atol=3.0)
    np.testing.assert_allclose(np.asarray(z_rel), np.asarray(ref_zr), rtol=0.10, atol=0.08)

    print("KERNEL_OK")
</pallas_src>

<mosaic_0001>
module attributes {stable_mosaic.version = 11 : i64} {
  func.func @reason_kernel(%arg0: i32, %arg1: memref<16x640xf32, #tpu.memory_space<vmem>>, %arg2: memref<336x384xbf16, #tpu.memory_space<vmem>>, %arg3: memref<640x128xbf16, #tpu.memory_space<vmem>>, %arg4: memref<1x128xf32, #tpu.memory_space<vmem>>, %arg5: memref<128x512xbf16, #tpu.memory_space<vmem>>, %arg6: memref<1x512xf32, #tpu.memory_space<vmem>>, %arg7: memref<512x128xbf16, #tpu.memory_space<vmem>>, %arg8: memref<1x128xf32, #tpu.memory_space<vmem>>, %arg9: memref<128x640xbf16, #tpu.memory_space<vmem>>, %arg10: memref<1x640xf32, #tpu.memory_space<vmem>>, %arg11: memref<512x512xbf16, #tpu.memory_space<vmem>>, %arg12: memref<1x512xf32, #tpu.memory_space<vmem>>, %arg13: memref<512x512xbf16, #tpu.memory_space<vmem>>, %arg14: memref<1x512xf32, #tpu.memory_space<vmem>>, %arg15: memref<384x512xbf16, #tpu.memory_space<vmem>>, %arg16: memref<1x512xf32, #tpu.memory_space<vmem>>, %arg17: memref<512x512xbf16, #tpu.memory_space<vmem>>, %arg18: memref<1x512xf32, #tpu.memory_space<vmem>>, %arg19: memref<8x128xf32, #tpu.memory_space<vmem>>, %arg20: memref<8x128xf32, #tpu.memory_space<vmem>>, %arg21: memref<16x512xf32, #tpu.memory_space<vmem>>) attributes {dimension_semantics = [#tpu.dimension_semantics<parallel>], iteration_bounds = array<i64: 1>, scalar_prefetch = 0 : i64, scratch_operands = 0 : i64, tpu.core_type = #tpu.core_type<tc>, window_params = [{transform_indices = @transform_0, window_bounds = array<i64: 16, 640>}, {transform_indices = @transform_1, window_bounds = array<i64: 336, 384>}, {pipeline_mode = #tpu.pipeline_mode<synchronous>, transform_indices = @transform_2, window_bounds = array<i64: 640, 128>}, {pipeline_mode = #tpu.pipeline_mode<synchronous>, transform_indices = @transform_3, window_bounds = array<i64: 1, 128>}, {pipeline_mode = #tpu.pipeline_mode<synchronous>, transform_indices = @transform_4, window_bounds = array<i64: 128, 512>}, {pipeline_mode = #tpu.pipeline_mode<synchronous>, transform_indices = @transform_5, window_bounds = array<i64: 1, 512>}, {pipeline_mode = #tpu.pipeline_mode<synchronous>, transform_indices = @transform_6, window_bounds = array<i64: 512, 128>}, {pipeline_mode = #tpu.pipeline_mode<synchronous>, transform_indices = @transform_7, window_bounds = array<i64: 1, 128>}, {pipeline_mode = #tpu.pipeline_mode<synchronous>, transform_indices = @transform_8, window_bounds = array<i64: 128, 640>}, {pipeline_mode = #tpu.pipeline_mode<synchronous>, transform_indices = @transform_9, window_bounds = array<i64: 1, 640>}, {pipeline_mode = #tpu.pipeline_mode<synchronous>, transform_indices = @transform_10, window_bounds = array<i64: 512, 512>}, {pipeline_mode = #tpu.pipeline_mode<synchronous>, transform_indices = @transform_11, window_bounds = array<i64: 1, 512>}, {pipeline_mode = #tpu.pipeline_mode<synchronous>, transform_indices = @transform_12, window_bounds = array<i64: 512, 512>}, {pipeline_mode = #tpu.pipeline_mode<synchronous>, transform_indices = @transform_13, window_bounds = array<i64: 1, 512>}, {pipeline_mode = #tpu.pipeline_mode<synchronous>, transform_indices = @transform_14, window_bounds = array<i64: 384, 512>}, {pipeline_mode = #tpu.pipeline_mode<synchronous>, transform_indices = @transform_15, window_bounds = array<i64: 1, 512>}, {pipeline_mode = #tpu.pipeline_mode<synchronous>, transform_indices = @transform_16, window_bounds = array<i64: 512, 512>}, {pipeline_mode = #tpu.pipeline_mode<synchronous>, transform_indices = @transform_17, window_bounds = array<i64: 1, 512>}, {transform_indices = @transform_18, window_bounds = array<i64: 8, 128>}, {transform_indices = @transform_19, window_bounds = array<i64: 8, 128>}, {transform_indices = @transform_20, window_bounds = array<i64: 16, 512>}]} {
    %c0 = arith.constant 0 : index
    %c0_0 = arith.constant 0 : index
    %0 = vector.load %arg1[%c0, %c0_0] : memref<16x640xf32, #tpu.memory_space<vmem>>, vector<16x640xf32>
    %1 = arith.truncf %0 : vector<16x640xf32> to vector<16x640xbf16>
    %c0_1 = arith.constant 0 : index
    %c0_2 = arith.constant 0 : index
    %2 = vector.load %arg3[%c0_1, %c0_2] : memref<640x128xbf16, #tpu.memory_space<vmem>>, vector<640x128xbf16>
    %cst = arith.constant dense<0.000000e+00> : vector<16x128xf32>
    %3 = tpu.matmul %1, %2, %cst {dimension_numbers = #tpu.dot_dimension_numbers<[1], [0], [0], [1], [0, 0, 1, 1], [], []>} : vector<16x640xbf16>, vector<640x128xbf16>, vector<16x128xf32> -> vector<16x128xf32>
    %c0_3 = arith.constant 0 : index
    %c0_4 = arith.constant 0 : index
    %4 = vector.load %arg4[%c0_3, %c0_4] : memref<1x128xf32, #tpu.memory_space<vmem>>, vector<1x128xf32>
    %5 = vector.broadcast %4 : vector<1x128xf32> to vector<16x128xf32>
    %6 = arith.addf %3, %5 : vector<16x128xf32>
    %7 = math.tanh %6 : vector<16x128xf32>
    %8 = arith.truncf %7 : vector<16x128xf32> to vector<16x128xbf16>
    %c0_5 = arith.constant 0 : index
    %c0_6 = arith.constant 0 : index
    %9 = vector.load %arg5[%c0_5, %c0_6] : memref<128x512xbf16, #tpu.memory_space<vmem>>, vector<128x512xbf16>
    %cst_7 = arith.constant dense<0.000000e+00> : vector<16x512xf32>
    %10 = tpu.matmul %8, %9, %cst_7 {dimension_numbers = #tpu.dot_dimension_numbers<[1], [0], [0], [1], [0, 0, 1, 1], [], []>} : vector<16x128xbf16>, vector<128x512xbf16>, vector<16x512xf32> -> vector<16x512xf32>
    %c0_8 = arith.constant 0 : index
    %c0_9 = arith.constant 0 : index
    %11 = vector.load %arg6[%c0_8, %c0_9] : memref<1x512xf32, #tpu.memory_space<vmem>>, vector<1x512xf32>
    %12 = vector.broadcast %11 : vector<1x512xf32> to vector<16x512xf32>
    %13 = arith.addf %10, %12 : vector<16x512xf32>
    %14 = math.tanh %13 : vector<16x512xf32>
    %15 = arith.truncf %14 : vector<16x512xf32> to vector<16x512xbf16>
    %c0_10 = arith.constant 0 : index
    %c0_11 = arith.constant 0 : index
    %16 = vector.load %arg7[%c0_10, %c0_11] : memref<512x128xbf16, #tpu.memory_space<vmem>>, vector<512x128xbf16>
    %cst_12 = arith.constant dense<0.000000e+00> : vector<16x128xf32>
    %17 = tpu.matmul %15, %16, %cst_12 {dimension_numbers = #tpu.dot_dimension_numbers<[1], [0], [0], [1], [0, 0, 1, 1], [], []>} : vector<16x512xbf16>, vector<512x128xbf16>, vector<16x128xf32> -> vector<16x128xf32>
    %c0_13 = arith.constant 0 : index
    %c0_14 = arith.constant 0 : index
    %18 = vector.load %arg8[%c0_13, %c0_14] : memref<1x128xf32, #tpu.memory_space<vmem>>, vector<1x128xf32>
    %19 = vector.broadcast %18 : vector<1x128xf32> to vector<16x128xf32>
    %20 = arith.addf %17, %19 : vector<16x128xf32>
    %21 = math.tanh %20 : vector<16x128xf32>
    %22 = arith.truncf %21 : vector<16x128xf32> to vector<16x128xbf16>
    %c0_15 = arith.constant 0 : index
    %c0_16 = arith.constant 0 : index
    %23 = vector.load %arg9[%c0_15, %c0_16] : memref<128x640xbf16, #tpu.memory_space<vmem>>, vector<128x640xbf16>
    %cst_17 = arith.constant dense<0.000000e+00> : vector<16x640xf32>
    %24 = tpu.matmul %22, %23, %cst_17 {dimension_numbers = #tpu.dot_dimension_numbers<[1], [0], [0], [1], [0, 0, 1, 1], [], []>} : vector<16x128xbf16>, vector<128x640xbf16>, vector<16x640xf32> -> vector<16x640xf32>
    %c0_18 = arith.constant 0 : index
    %c0_19 = arith.constant 0 : index
    %25 = vector.load %arg10[%c0_18, %c0_19] : memref<1x640xf32, #tpu.memory_space<vmem>>, vector<1x640xf32>
    %26 = vector.broadcast %25 : vector<1x640xf32> to vector<16x640xf32>
    %27 = arith.addf %24, %26 : vector<16x640xf32>
    %28 = arith.negf %27 : vector<16x640xf32>
    %29 = math.exp %28 : vector<16x640xf32>
    %cst_20 = arith.constant 1.000000e+00 : f32
    %30 = vector.broadcast %cst_20 : f32 to vector<16x640xf32>
    %31 = arith.addf %30, %29 : vector<16x640xf32>
    %32 = arith.divf %30, %31 : vector<16x640xf32>
    %33 = arith.subf %0, %32 : vector<16x640xf32>
    %34 = arith.mulf %33, %33 : vector<16x640xf32>
    %cst_21 = arith.constant dense<0.000000e+00> : vector<16xf32>
    %35 = vector.multi_reduction <add>, %34, %cst_21 [1] : vector<16x640xf32> to vector<16xf32>
    %36 = vector.shape_cast %35 : vector<16xf32> to vector<16x1xf32>
    %cst_22 = arith.constant 0.00166666671 : f32
    %37 = vector.broadcast %cst_22 : f32 to vector<16x1xf32>
    %38 = arith.mulf %36, %37 : vector<16x1xf32>
    %39 = arith.truncf %14 : vector<16x512xf32> to vector<16x512xbf16>
    %c0_23 = arith.constant 0 : index
    %c0_24 = arith.constant 0 : index
    %40 = vector.load %arg11[%c0_23, %c0_24] : memref<512x512xbf16, #tpu.memory_space<vmem>>, vector<512x512xbf16>
    %cst_25 = arith.constant dense<0.000000e+00> : vector<16x512xf32>
    %41 = tpu.matmul %39, %40, %cst_25 {dimension_numbers = #tpu.dot_dimension_numbers<[1], [0], [0], [1], [0, 0, 1, 1], [], []>} : vector<16x512xbf16>, vector<512x512xbf16>, vector<16x512xf32> -> vector<16x512xf32>
    %c0_26 = arith.constant 0 : index
    %c0_27 = arith.constant 0 : index
    %42 = vector.load %arg12[%c0_26, %c0_27] : memref<1x512xf32, #tpu.memory_space<vmem>>, vector<1x512xf32>
    %43 = vector.broadcast %42 : vector<1x512xf32> to vector<16x512xf32>
    %44 = arith.addf %41, %43 : vector<16x512xf32>
    %cst_28 = arith.constant 0.000000e+00 : f32
    %45 = vector.broadcast %cst_28 : f32 to vector<16x512xf32>
    %46 = arith.maximumf %44, %45 : vector<16x512xf32>
    %47 = arith.truncf %46 : vector<16x512xf32> to vector<16x512xbf16>
    %c0_29 = arith.constant 0 : index
    %c0_30 = arith.constant 0 : index
    %48 = vector.load %arg13[%c0_29, %c0_30] : memref<512x512xbf16, #tpu.memory_space<vmem>>, vector<512x512xbf16>
    %cst_31 = arith.constant dense<0.000000e+00> : vector<16x512xf32>
    %49 = tpu.matmul %47, %48, %cst_31 {dimension_numbers = #tpu.dot_dimension_numbers<[1], [0], [0], [1], [0, 0, 1, 1], [], []>} : vector<16x512xbf16>, vector<512x512xbf16>, vector<16x512xf32> -> vector<16x512xf32>
    %c0_32 = arith.constant 0 : index
    %c0_33 = arith.constant 0 : index
    %50 = vector.load %arg14[%c0_32, %c0_33] : memref<1x512xf32, #tpu.memory_space<vmem>>, vector<1x512xf32>
    %51 = vector.broadcast %50 : vector<1x512xf32> to vector<16x512xf32>
    %52 = arith.addf %49, %51 : vector<16x512xf32>
    %c0_34 = arith.constant 0 : index
    %c0_35 = arith.constant 0 : index
    %53 = vector.load %arg2[%c0_34, %c0_35] : memref<336x384xbf16, #tpu.memory_space<vmem>>, vector<336x384xbf16>
    %c0_36 = arith.constant 0 : index
    %c0_37 = arith.constant 0 : index
    %54 = vector.load %arg15[%c0_36, %c0_37] : memref<384x512xbf16, #tpu.memory_space<vmem>>, vector<384x512xbf16>
    %cst_38 = arith.constant dense<0.000000e+00> : vector<336x512xf32>
    %55 = tpu.matmul %53, %54, %cst_38 {dimension_numbers = #tpu.dot_dimension_numbers<[1], [0], [0], [1], [0, 0, 1, 1], [], []>} : vector<336x384xbf16>, vector<384x512xbf16>, vector<336x512xf32> -> vector<336x512xf32>
    %c0_39 = arith.constant 0 : index
    %c0_40 = arith.constant 0 : index
    %56 = vector.load %arg16[%c0_39, %c0_40] : memref<1x512xf32, #tpu.memory_space<vmem>>, vector<1x512xf32>
    %57 = vector.broadcast %56 : vector<1x512xf32> to vector<336x512xf32>
    %58 = arith.addf %55, %57 : vector<336x512xf32>
    %cst_41 = arith.constant 0.000000e+00 : f32
    %59 = vector.broadcast %cst_41 : f32 to vector<336x512xf32>
    %60 = arith.maximumf %58, %59 : vector<336x512xf32>
    %61 = arith.truncf %60 : vector<336x512xf32> to vector<336x512xbf16>
    %c0_42 = arith.constant 0 : index
    %c0_43 = arith.constant 0 : index
    %62 = vector.load %arg17[%c0_42, %c0_43] : memref<512x512xbf16, #tpu.memory_space<vmem>>, vector<512x512xbf16>
    %cst_44 = arith.constant dense<0.000000e+00> : vector<336x512xf32>
    %63 = tpu.matmul %61, %62, %cst_44 {dimension_numbers = #tpu.dot_dimension_numbers<[1], [0], [0], [1], [0, 0, 1, 1], [], []>} : vector<336x512xbf16>, vector<512x512xbf16>, vector<336x512xf32> -> vector<336x512xf32>
    %c0_45 = arith.constant 0 : index
    %c0_46 = arith.constant 0 : index
    %64 = vector.load %arg18[%c0_45, %c0_46] : memref<1x512xf32, #tpu.memory_space<vmem>>, vector<1x512xf32>
    %65 = vector.broadcast %64 : vector<1x512xf32> to vector<336x512xf32>
    %66 = arith.addf %63, %65 : vector<336x512xf32>
    %67 = vector.extract_strided_slice %66 {offsets = [0, 0], sizes = [16, 512], strides = [1, 1]} : vector<336x512xf32> to vector<16x512xf32>
    %68 = arith.mulf %52, %67 : vector<16x512xf32>
    %cst_47 = arith.constant dense<0.000000e+00> : vector<16xf32>
    %69 = vector.multi_reduction <add>, %68, %cst_47 [1] : vector<16x512xf32> to vector<16xf32>
    %70 = vector.shape_cast %69 : vector<16xf32> to vector<16x1xf32>
    %71 = vector.extract_strided_slice %66 {offsets = [16, 0], sizes = [16, 512], strides = [1, 1]} : vector<336x512xf32> to vector<16x512xf32>
    %72 = arith.mulf %52, %71 : vector<16x512xf32>
    %cst_48 = arith.constant dense<0.000000e+00> : vector<16xf32>
    %73 = vector.multi_reduction <add>, %72, %cst_48 [1] : vector<16x512xf32> to vector<16xf32>
    %74 = vector.shape_cast %73 : vector<16xf32> to vector<16x1xf32>
    %75 = vector.extract_strided_slice %66 {offsets = [32, 0], sizes = [16, 512], strides = [1, 1]} : vector<336x512xf32> to vector<16x512xf32>
    %76 = arith.mulf %52, %75 : vector<16x512xf32>
    %cst_49 = arith.constant dense<0.000000e+00> : vector<16xf32>
    %77 = vector.multi_reduction <add>, %76, %cst_49 [1] : vector<16x512xf32> to vector<16xf32>
    %78 = vector.shape_cast %77 : vector<16xf32> to vector<16x1xf32>
    %79 = vector.extract_strided_slice %66 {offsets = [48, 0], sizes = [16, 512], strides = [1, 1]} : vector<336x512xf32> to vector<16x512xf32>
    %80 = arith.mulf %52, %79 : vector<16x512xf32>
    %cst_50 = arith.constant dense<0.000000e+00> : vector<16xf32>
    %81 = vector.multi_reduction <add>, %80, %cst_50 [1] : vector<16x512xf32> to vector<16xf32>
    %82 = vector.shape_cast %81 : vector<16xf32> to vector<16x1xf32>
    %83 = vector.extract_strided_slice %66 {offsets = [64, 0], sizes = [16, 512], strides = [1, 1]} : vector<336x512xf32> to vector<16x512xf32>
    %84 = arith.mulf %52, %83 : vector<16x512xf32>
    %cst_51 = arith.constant dense<0.000000e+00> : vector<16xf32>
    %85 = vector.multi_reduction <add>, %84, %cst_51 [1] : vector<16x512xf32> to vector<16xf32>
    %86 = vector.shape_cast %85 : vector<16xf32> to vector<16x1xf32>
    %87 = vector.extract_strided_slice %66 {offsets = [80, 0], sizes = [16, 512], strides = [1, 1]} : vector<336x512xf32> to vector<16x512xf32>
    %88 = arith.mulf %52, %87 : vector<16x512xf32>
    %cst_52 = arith.constant dense<0.000000e+00> : vector<16xf32>
    %89 = vector.multi_reduction <add>, %88, %cst_52 [1] : vector<16x512xf32> to vector<16xf32>
    %90 = vector.shape_cast %89 : vector<16xf32> to vector<16x1xf32>
    %91 = vector.extract_strided_slice %66 {offsets = [96, 0], sizes = [16, 512], strides = [1, 1]} : vector<336x512xf32> to vector<16x512xf32>
    %92 = arith.mulf %52, %91 : vector<16x512xf32>
    %cst_53 = arith.constant dense<0.000000e+00> : vector<16xf32>
    %93 = vector.multi_reduction <add>, %92, %cst_53 [1] : vector<16x512xf32> to vector<16xf32>
    %94 = vector.shape_cast %93 : vector<16xf32> to vector<16x1xf32>
    %95 = vector.extract_strided_slice %66 {offsets = [112, 0], sizes = [16, 512], strides = [1, 1]} : vector<336x512xf32> to vector<16x512xf32>
    %96 = arith.mulf %52, %95 : vector<16x512xf32>
    %cst_54 = arith.constant dense<0.000000e+00> : vector<16xf32>
    %97 = vector.multi_reduction <add>, %96, %cst_54 [1] : vector<16x512xf32> to vector<16xf32>
    %98 = vector.shape_cast %97 : vector<16xf32> to vector<16x1xf32>
    %99 = vector.extract_strided_slice %66 {offsets = [128, 0], sizes = [16, 512], strides = [1, 1]} : vector<336x512xf32> to vector<16x512xf32>
    %100 = arith.mulf %52, %99 : vector<16x512xf32>
    %cst_55 = arith.constant dense<0.000000e+00> : vector<16xf32>
    %101 = vector.multi_reduction <add>, %100, %cst_55 [1] : vector<16x512xf32> to vector<16xf32>
    %102 = vector.shape_cast %101 : vector<16xf32> to vector<16x1xf32>
    %103 = vector.extract_strided_slice %66 {offsets = [144, 0], sizes = [16, 512], strides = [1, 1]} : vector<336x512xf32> to vector<16x512xf32>
    %104 = arith.mulf %52, %103 : vector<16x512xf32>
    %cst_56 = arith.constant dense<0.000000e+00> : vector<16xf32>
    %105 = vector.multi_reduction <add>, %104, %cst_56 [1] : vector<16x512xf32> to vector<16xf32>
    %106 = vector.shape_cast %105 : vector<16xf32> to vector<16x1xf32>
    %107 = vector.extract_strided_slice %66 {offsets = [160, 0], sizes = [16, 512], strides = [1, 1]} : vector<336x512xf32> to vector<16x512xf32>
    %108 = arith.mulf %52, %107 : vector<16x512xf32>
    %cst_57 = arith.constant dense<0.000000e+00> : vector<16xf32>
    %109 = vector.multi_reduction <add>, %108, %cst_57 [1] : vector<16x512xf32> to vector<16xf32>
    %110 = vector.shape_cast %109 : vector<16xf32> to vector<16x1xf32>
    %111 = vector.extract_strided_slice %66 {offsets = [176, 0], sizes = [16, 512], strides = [1, 1]} : vector<336x512xf32> to vector<16x512xf32>
    %112 = arith.mulf %52, %111 : vector<16x512xf32>
    %cst_58 = arith.constant dense<0.000000e+00> : vector<16xf32>
    %113 = vector.multi_reduction <add>, %112, %cst_58 [1] : vector<16x512xf32> to vector<16xf32>
    %114 = vector.shape_cast %113 : vector<16xf32> to vector<16x1xf32>
    %115 = vector.extract_strided_slice %66 {offsets = [192, 0], sizes = [16, 512], strides = [1, 1]} : vector<336x512xf32> to vector<16x512xf32>
    %116 = arith.mulf %52, %115 : vector<16x512xf32>
    %cst_59 = arith.constant dense<0.000000e+00> : vector<16xf32>
    %117 = vector.multi_reduction <add>, %116, %cst_59 [1] : vector<16x512xf32> to vector<16xf32>
    %118 = vector.shape_cast %117 : vector<16xf32> to vector<16x1xf32>
    %119 = vector.extract_strided_slice %66 {offsets = [208, 0], sizes = [16, 512], strides = [1, 1]} : vector<336x512xf32> to vector<16x512xf32>
    %120 = arith.mulf %52, %119 : vector<16x512xf32>
    %cst_60 = arith.constant dense<0.000000e+00> : vector<16xf32>
    %121 = vector.multi_reduction <add>, %120, %cst_60 [1] : vector<16x512xf32> to vector<16xf32>
    %122 = vector.shape_cast %121 : vector<16xf32> to vector<16x1xf32>
    %123 = vector.extract_strided_slice %66 {offsets = [224, 0], sizes = [16, 512], strides = [1, 1]} : vector<336x512xf32> to vector<16x512xf32>
    %124 = arith.mulf %52, %123 : vector<16x512xf32>
    %cst_61 = arith.constant dense<0.000000e+00> : vector<16xf32>
    %125 = vector.multi_reduction <add>, %124, %cst_61 [1] : vector<16x512xf32> to vector<16xf32>
    %126 = vector.shape_cast %125 : vector<16xf32> to vector<16x1xf32>
    %127 = vector.extract_strided_slice %66 {offsets = [240, 0], sizes = [16, 512], strides = [1, 1]} : vector<336x512xf32> to vector<16x512xf32>
    %128 = arith.mulf %52, %127 : vector<16x512xf32>
    %cst_62 = arith.constant dense<0.000000e+00> : vector<16xf32>
    %129 = vector.multi_reduction <add>, %128, %cst_62 [1] : vector<16x512xf32> to vector<16xf32>
    %130 = vector.shape_cast %129 : vector<16xf32> to vector<16x1xf32>
    %131 = vector.extract_strided_slice %66 {offsets = [256, 0], sizes = [16, 512], strides = [1, 1]} : vector<336x512xf32> to vector<16x512xf32>
    %132 = arith.mulf %52, %131 : vector<16x512xf32>
    %cst_63 = arith.constant dense<0.000000e+00> : vector<16xf32>
    %133 = vector.multi_reduction <add>, %132, %cst_63 [1] : vector<16x512xf32> to vector<16xf32>
    %134 = vector.shape_cast %133 : vector<16xf32> to vector<16x1xf32>
    %135 = vector.extract_strided_slice %66 {offsets = [272, 0], sizes = [16, 512], strides = [1, 1]} : vector<336x512xf32> to vector<16x512xf32>
    %136 = arith.mulf %52, %135 : vector<16x512xf32>
    %cst_64 = arith.constant dense<0.000000e+00> : vector<16xf32>
    %137 = vector.multi_reduction <add>, %136, %cst_64 [1] : vector<16x512xf32> to vector<16xf32>
    %138 = vector.shape_cast %137 : vector<16xf32> to vector<16x1xf32>
    %139 = vector.extract_strided_slice %66 {offsets = [288, 0], sizes = [16, 512], strides = [1, 1]} : vector<336x512xf32> to vector<16x512xf32>
    %140 = arith.mulf %52, %139 : vector<16x512xf32>
    %cst_65 = arith.constant dense<0.000000e+00> : vector<16xf32>
    %141 = vector.multi_reduction <add>, %140, %cst_65 [1] : vector<16x512xf32> to vector<16xf32>
    %142 = vector.shape_cast %141 : vector<16xf32> to vector<16x1xf32>
    %143 = vector.extract_strided_slice %66 {offsets = [304, 0], sizes = [16, 512], strides = [1, 1]} : vector<336x512xf32> to vector<16x512xf32>
    %144 = arith.mulf %52, %143 : vector<16x512xf32>
    %cst_66 = arith.constant dense<0.000000e+00> : vector<16xf32>
    %145 = vector.multi_reduction <add>, %144, %cst_66 [1] : vector<16x512xf32> to vector<16xf32>
    %146 = vector.shape_cast %145 : vector<16xf32> to vector<16x1xf32>
    %147 = vector.extract_strided_slice %66 {offsets = [320, 0], sizes = [16, 512], strides = [1, 1]} : vector<336x512xf32> to vector<16x512xf32>
    %148 = arith.mulf %52, %147 : vector<16x512xf32>
    %cst_67 = arith.constant dense<0.000000e+00> : vector<16xf32>
    %149 = vector.multi_reduction <add>, %148, %cst_67 [1] : vector<16x512xf32> to vector<16xf32>
    %150 = vector.shape_cast %149 : vector<16xf32> to vector<16x1xf32>
    %151 = tpu.concatenate %70, %74, %78, %82, %86, %90, %94, %98, %102, %106, %110, %114, %118, %122, %126, %130 in 1 : vector<16x1xf32>, vector<16x1xf32>, vector<16x1xf32>, vector<16x1xf32>, vector<16x1xf32>, vector<16x1xf32>, vector<16x1xf32>, vector<16x1xf32>, vector<16x1xf32>, vector<16x1xf32>, vector<16x1xf32>, vector<16x1xf32>, vector<16x1xf32>, vector<16x1xf32>, vector<16x1xf32>, vector<16x1xf32> -> vector<16x16xf32>
    %152 = tpu.concatenate %134, %138, %142, %146, %150 in 1 : vector<16x1xf32>, vector<16x1xf32>, vector<16x1xf32>, vector<16x1xf32>, vector<16x1xf32> -> vector<16x5xf32>
    %153 = tpu.concatenate %151, %152 in 1 : vector<16x16xf32>, vector<16x5xf32> -> vector<16x21xf32>
    %cst_68 = arith.constant 14.2857141 : f32
    %154 = vector.broadcast %cst_68 : f32 to vector<16x21xf32>
    %155 = arith.mulf %153, %154 : vector<16x21xf32>
    %cst_69 = arith.constant dense<0xFF800000> : vector<16xf32>
    %156 = vector.multi_reduction <maximumf>, %155, %cst_69 [1] : vector<16x21xf32> to vector<16xf32>
    %157 = vector.shape_cast %156 : vector<16xf32> to vector<16x1xf32>
    %158 = vector.broadcast %157 : vector<16x1xf32> to vector<16x21xf32>
    %159 = arith.subf %155, %158 : vector<16x21xf32>
    %160 = math.exp %159 : vector<16x21xf32>
    %cst_70 = arith.constant dense<0.000000e+00> : vector<16xf32>
    %161 = vector.multi_reduction <add>, %160, %cst_70 [1] : vector<16x21xf32> to vector<16xf32>
    %162 = vector.shape_cast %161 : vector<16xf32> to vector<16x1xf32>
    %163 = math.log %162 : vector<16x1xf32>
    %164 = arith.addf %157, %163 : vector<16x1xf32>
    %165 = vector.extract_strided_slice %155 {offsets = [0, 0], sizes = [16, 1], strides = [1, 1]} : vector<16x21xf32> to vector<16x1xf32>
    %166 = arith.subf %164, %165 : vector<16x1xf32>
    %c16_i32 = arith.constant 16 : i32
    %167 = arith.muli %arg0, %c16_i32 : i32
    %168 = tpu.iota {dimensions = array<i32: 0>} : vector<16x1xi32>
    %169 = vector.broadcast %167 : i32 to vector<16x1xi32>
    %170 = arith.addi %169, %168 : vector<16x1xi32>
    %c2_i32 = arith.constant 2 : i32
    %171 = vector.broadcast %c2_i32 : i32 to vector<16x1xi32>
    %172 = arith.cmpi slt, %170, %171 : vector<16x1xi32>
    %cst_71 = arith.constant 0.000000e+00 : f32
    %173 = vector.broadcast %cst_71 : f32 to vector<16x1xf32>
    %174 = arith.select %172, %38, %173 : vector<16x1xi1>, vector<16x1xf32>
    %175 = vector.shape_cast %174 : vector<16x1xf32> to vector<1x16x1xf32>
    %cst_72 = arith.constant dense<0.000000e+00> : vector<1xf32>
    %176 = vector.multi_reduction <add>, %175, %cst_72 [1, 2] : vector<1x16x1xf32> to vector<1xf32>
    %177 = vector.shape_cast %176 : vector<1xf32> to vector<1x1x1xf32>
    %178 = vector.extract %177[0, 0, 0] : f32 from vector<1x1x1xf32>
    %cst_73 = arith.constant 0.000000e+00 : f32
    %179 = vector.broadcast %cst_73 : f32 to vector<16x1xf32>
    %180 = arith.select %172, %166, %179 : vector<16x1xi1>, vector<16x1xf32>
    %181 = vector.shape_cast %180 : vector<16x1xf32> to vector<1x16x1xf32>
    %cst_74 = arith.constant dense<0.000000e+00> : vector<1xf32>
    %182 = vector.multi_reduction <add>, %181, %cst_74 [1, 2] : vector<1x16x1xf32> to vector<1xf32>
    %183 = vector.shape_cast %182 : vector<1xf32> to vector<1x1x1xf32>
    %184 = vector.extract %183[0, 0, 0] : f32 from vector<1x1x1xf32>
    %cst_75 = arith.constant 0.000000e+00 : f32
    %185 = vector.broadcast %cst_75 : f32 to vector<8x128xf32>
    %186 = vector.broadcast %178 : f32 to vector<8x128xf32>
    %187 = arith.addf %185, %186 : vector<8x128xf32>
    %c0_76 = arith.constant 0 : index
    %c0_77 = arith.constant 0 : index
    %188 = vector.load %arg19[%c0_76, %c0_77] : memref<8x128xf32, #tpu.memory_space<vmem>>, vector<8x128xf32>
    tpu.vector_store %arg19[%c0_76, %c0_77], %187 {strides = array<i32>} : memref<8x128xf32, #tpu.memory_space<vmem>>, vector<8x128xf32>,
    %cst_78 = arith.constant 0.000000e+00 : f32
    %189 = vector.broadcast %cst_78 : f32 to vector<8x128xf32>
    %190 = vector.broadcast %184 : f32 to vector<8x128xf32>
    %191 = arith.addf %189, %190 : vector<8x128xf32>
    %c0_79 = arith.constant 0 : index
    %c0_80 = arith.constant 0 : index
    %192 = vector.load %arg20[%c0_79, %c0_80] : memref<8x128xf32, #tpu.memory_space<vmem>>, vector<8x128xf32>
    tpu.vector_store %arg20[%c0_79, %c0_80], %191 {strides = array<i32>} : memref<8x128xf32, #tpu.memory_space<vmem>>, vector<8x128xf32>,
    %c0_81 = arith.constant 0 : index
    %c0_82 = arith.constant 0 : index
    %193 = vector.load %arg21[%c0_81, %c0_82] : memref<16x512xf32, #tpu.memory_space<vmem>>, vector<16x512xf32>
    tpu.vector_store %arg21[%c0_81, %c0_82], %52 {strides = array<i32>} : memref<16x512xf32, #tpu.memory_space<vmem>>, vector<16x512xf32>,
    return
  }
  func.func @transform_0(%arg0: i32) -> (i32, i32) {
    %c0_i32 = arith.constant 0 : i32
    %c0_i32_0 = arith.constant 0 : i32
    return %arg0, %c0_i32 : i32, i32
  }
  func.func @transform_1(%arg0: i32) -> (i32, i32) {
    %c0_i32 = arith.constant 0 : i32
    %c0_i32_0 = arith.constant 0 : i32
    return %arg0, %c0_i32 : i32, i32
  }
  func.func @transform_2(%arg0: i32) -> (i32, i32) {
    %c0_i32 = arith.constant 0 : i32
    %c0_i32_0 = arith.constant 0 : i32
    %c0_i32_1 = arith.constant 0 : i32
    return %c0_i32, %c0_i32_0 : i32, i32
  }
  func.func @transform_3(%arg0: i32) -> (i32, i32) {
    %c0_i32 = arith.constant 0 : i32
    %c0_i32_0 = arith.constant 0 : i32
    %c0_i32_1 = arith.constant 0 : i32
    return %c0_i32, %c0_i32_0 : i32, i32
  }
  func.func @transform_4(%arg0: i32) -> (i32, i32) {
    %c0_i32 = arith.constant 0 : i32
    %c0_i32_0 = arith.constant 0 : i32
    %c0_i32_1 = arith.constant 0 : i32
    return %c0_i32, %c0_i32_0 : i32, i32
  }
  func.func @transform_5(%arg0: i32) -> (i32, i32) {
    %c0_i32 = arith.constant 0 : i32
    %c0_i32_0 = arith.constant 0 : i32
    %c0_i32_1 = arith.constant 0 : i32
    return %c0_i32, %c0_i32_0 : i32, i32
  }
  func.func @transform_6(%arg0: i32) -> (i32, i32) {
    %c0_i32 = arith.constant 0 : i32
    %c0_i32_0 = arith.constant 0 : i32
    %c0_i32_1 = arith.constant 0 : i32
    return %c0_i32, %c0_i32_0 : i32, i32
  }
  func.func @transform_7(%arg0: i32) -> (i32, i32) {
    %c0_i32 = arith.constant 0 : i32
    %c0_i32_0 = arith.constant 0 : i32
    %c0_i32_1 = arith.constant 0 : i32
    return %c0_i32, %c0_i32_0 : i32, i32
  }
  func.func @transform_8(%arg0: i32) -> (i32, i32) {
    %c0_i32 = arith.constant 0 : i32
    %c0_i32_0 = arith.constant 0 : i32
    %c0_i32_1 = arith.constant 0 : i32
    return %c0_i32, %c0_i32_0 : i32, i32
  }
  func.func @transform_9(%arg0: i32) -> (i32, i32) {
    %c0_i32 = arith.constant 0 : i32
    %c0_i32_0 = arith.constant 0 : i32
    %c0_i32_1 = arith.constant 0 : i32
    return %c0_i32, %c0_i32_0 : i32, i32
  }
  func.func @transform_10(%arg0: i32) -> (i32, i32) {
    %c0_i32 = arith.constant 0 : i32
    %c0_i32_0 = arith.constant 0 : i32
    %c0_i32_1 = arith.constant 0 : i32
    return %c0_i32, %c0_i32_0 : i32, i32
  }
  func.func @transform_11(%arg0: i32) -> (i32, i32) {
    %c0_i32 = arith.constant 0 : i32
    %c0_i32_0 = arith.constant 0 : i32
    %c0_i32_1 = arith.constant 0 : i32
    return %c0_i32, %c0_i32_0 : i32, i32
  }
  func.func @transform_12(%arg0: i32) -> (i32, i32) {
    %c0_i32 = arith.constant 0 : i32
    %c0_i32_0 = arith.constant 0 : i32
    %c0_i32_1 = arith.constant 0 : i32
    return %c0_i32, %c0_i32_0 : i32, i32
  }
  func.func @transform_13(%arg0: i32) -> (i32, i32) {
    %c0_i32 = arith.constant 0 : i32
    %c0_i32_0 = arith.constant 0 : i32
    %c0_i32_1 = arith.constant 0 : i32
    return %c0_i32, %c0_i32_0 : i32, i32
  }
  func.func @transform_14(%arg0: i32) -> (i32, i32) {
    %c0_i32 = arith.constant 0 : i32
    %c0_i32_0 = arith.constant 0 : i32
    %c0_i32_1 = arith.constant 0 : i32
    return %c0_i32, %c0_i32_0 : i32, i32
  }
  func.func @transform_15(%arg0: i32) -> (i32, i32) {
    %c0_i32 = arith.constant 0 : i32
    %c0_i32_0 = arith.constant 0 : i32
    %c0_i32_1 = arith.constant 0 : i32
    return %c0_i32, %c0_i32_0 : i32, i32
  }
  func.func @transform_16(%arg0: i32) -> (i32, i32) {
    %c0_i32 = arith.constant 0 : i32
    %c0_i32_0 = arith.constant 0 : i32
    %c0_i32_1 = arith.constant 0 : i32
    return %c0_i32, %c0_i32_0 : i32, i32
  }
  func.func @transform_17(%arg0: i32) -> (i32, i32) {
    %c0_i32 = arith.constant 0 : i32
    %c0_i32_0 = arith.constant 0 : i32
    %c0_i32_1 = arith.constant 0 : i32
    return %c0_i32, %c0_i32_0 : i32, i32
  }
  func.func @transform_18(%arg0: i32) -> (i32, i32) {
    %c0_i32 = arith.constant 0 : i32
    %c0_i32_0 = arith.constant 0 : i32
    return %arg0, %c0_i32 : i32, i32
  }
  func.func @transform_19(%arg0: i32) -> (i32, i32) {
    %c0_i32 = arith.constant 0 : i32
    %c0_i32_0 = arith.constant 0 : i32
    return %arg0, %c0_i32 : i32, i32
  }
  func.func @transform_20(%arg0: i32) -> (i32, i32) {
    %c0_i32 = arith.constant 0 : i32
    %c0_i32_0 = arith.constant 0 : i32
    return %arg0, %c0_i32 : i32, i32
  }
}

</mosaic_0001>

<bundles_post_ra>
// kernel: neg.1
= control target key start
LH: loop header
LB: loop body
LE: loop exit
PB: predicated region body
PF: predicated region fallthrough
CT: control target
= control target key end

     0   :  { %s24_s0 = inlined_call_operand.vmem [shape: f32[2,32], index: 0, kind: input, shape index: {}]   ;;  %s25_s1 = inlined_call_operand.vmem [shape: f32[2,32], index: 1, kind: output, shape index: {}]  }
   0x1   :  { %v2_v0 = vld [vmem:[%s24_s0] sm:$0x3] }
   0x2   :  { %v5_v1 = vxor.u32 2147483648, %v2_v0 }
   0x4   :  { %7 = vst [vmem:[%s25_s1] sm:$0x3] %v5_v1 }

// kernel: reason_forward.1
= control target key start
LH: loop header
LB: loop body
LE: loop exit
PB: predicated region body
PF: predicated region fallthrough
CT: control target
= control target key end

     0   :  { %v10679_v36 = vmov 0.0   ;;  %vm10680_vm0 = vmmov 0   ;;  %vm8013_vm1 = vcmask 7168   ;;  %vm8016_vm2 = vcmask 15360   ;;  %s13693_s2 = inlined_call_operand.vmem [shape: bf16[640,128], index: 2, kind: input, shape index: {}]   ;;  %s13694_s0 = inlined_call_operand.vmem [shape: f32[16,640], index: 0, kind: input, shape index: {}]   ;;  %s13695_s4 = inlined_call_operand.vmem [shape: bf16[128,512], index: 4, kind: input, shape index: {}]   ;;  %s13696_s6 = inlined_call_operand.vmem [shape: bf16[512,128], index: 6, kind: input, shape index: {}]   ;;  %s13697_s3 = inlined_call_operand.vmem [shape: f32[1,128], index: 3, kind: input, shape index: {}]   ;;  %s13698_s8 = inlined_call_operand.vmem [shape: bf16[128,640], index: 8, kind: input, shape index: {}]   ;;  %s13699_s5 = inlined_call_operand.vmem [shape: f32[1,512], index: 5, kind: input, shape index: {}]   ;;  %s13700_s10 = inlined_call_operand.vmem [shape: bf16[512,512], index: 10, kind: input, shape index: {}]   ;;  %s13701_s7 = inlined_call_operand.vmem [shape: f32[1,128], index: 7, kind: input, shape index: {}]   ;;  %s13702_s12 = inlined_call_operand.vmem [shape: bf16[512,512], index: 12, kind: input, shape index: {}]   ;;  %s13703_s9 = inlined_call_operand.vmem [shape: f32[1,640], index: 9, kind: input, shape index: {}]   ;;  %s13704_s14 = inlined_call_operand.vmem [shape: bf16[384,512], index: 14, kind: input, shape index: {}]   ;;  %s13705_s11 = inlined_call_operand.vmem [shape: f32[1,512], index: 11, kind: input, shape index: {}]   ;;  %s13706_s1 = inlined_call_operand.vmem [shape: bf16[336,384], index: 1, kind: input, shape index: {}]   ;;  %s13707_s16 = inlined_call_operand.vmem [shape: bf16[512,512], index: 16, kind: input, shape index: {}]   ;;  %s13708_s13 = inlined_call_operand.vmem [shape: f32[1,512], index: 13, kind: input, shape index: {}]   ;;  %s13709_s20 = inlined_call_operand.vmem [shape: f32[16,512], index: 20, kind: output, shape index: {2}]   ;;  %s13710_s15 = inlined_call_operand.vmem [shape: f32[1,512], index: 15, kind: input, shape index: {}]   ;;  %s13711_s17 = inlined_call_operand.vmem [shape: f32[1,512], index: 17, kind: input, shape index: {}]   ;;  %s13712_s18 = inlined_call_operand.vmem [shape: f32[8,128], index: 18, kind: output, shape index: {0}]   ;;  %s13713_s19 = inlined_call_operand.vmem [shape: f32[8,128], index: 19, kind: output, shape index: {1}]  }
   0x1   :  { %13725 = sst [smem:[#allocation10_spill]] %s13693_s2  ;;  %vm8019_vm3 = vcmask 23552   ;;  %vm8022_vm4 = vcmask 31744   ;;  %vm8025_vm5 = vcmask 39936   ;;  %vm8028_vm6 = vcmask 48128  }
   0x2   :  { %13726 = sst [smem:[#allocation11_spill]] %s13694_s0  ;;  %s13730_s23 = sld [smem:[#allocation10_spill]]  ;;  %vm8031_vm7 = vcmask 56320   ;;  %vm8034_vm8 = vcmask 64512   ;;  %vm8037_vm9 = vcmask 72704   ;;  %vm8040_vm10 = vcmask 80896  }
   0x3   :  { %13727 = sst [smem:[#allocation12_spill]] %s13695_s4  ;;  %s13731_s28 = sld [smem:[#allocation11_spill]]  ;;  %vm8043_vm11 = vcmask 89088   ;;  %vm8046_vm12 = vcmask 97280   ;;  %vm8049_vm13 = vcmask 105472   ;;  %vm8052_vm14 = vcmask 113664  }
   0x4   :  { %13728 = sst [smem:[#allocation13_spill]] %s13696_s6  ;;  %s13732_s27 = sld [smem:[#allocation12_spill]]  ;;  %vm8055_vm15 = vcmask 121856  }
   0x5   :  { %13729 = sst [smem:[#allocation14_spill]] %s13697_s3  ;;  %s13733_s26 = sld [smem:[#allocation13_spill]] }
   0x6   :  { %s13734_s2 = sld [smem:[#allocation14_spill]] }
   0x8   :  { %v9642_v0 = vld [vmem:[%s13730_s23 + $0x40] sm:$0xff]   ;;  %v9646_v4 = vld [vmem:[%s13730_s23 + $0x48] sm:$0xff]   ;;  %v9650_v8 = vld [vmem:[%s13730_s23 + $0x50] sm:$0xff]  }
   0x9   :  { %v9643_v1 = vld [vmem:[%s13730_s23] sm:$0xff]   ;;  %8868 = vmatprep.subr.bf16.mxu0 %v9642_v0  ;;  %v9647_v5 = vld [vmem:[%s13730_s23 + $0x8] sm:$0xff]   ;;  %v9651_v9 = vld [vmem:[%s13730_s23 + $0x10] sm:$0xff]  }
   0xa   :  { %v9644_v2 = vld [vmem:[%s13730_s23 + $0xc0] sm:$0xff]   ;;  %8869 = vmatpush3.bf16.msra.mxu0 %v9643_v1  ;;  %v9648_v6 = vld [vmem:[%s13730_s23 + $0xc8] sm:$0xff]   ;;  %v9652_v10 = vld [vmem:[%s13730_s23 + $0xd0] sm:$0xff]  }
   0xb   :  { %v9645_v3 = vld [vmem:[%s13730_s23 + $0x80] sm:$0xff]   ;;  %8890 = vmatprep.subr.bf16.mxu1 %v9644_v2  ;;  %8870 = vmatprep.subr.bf16.mxu0 %v9646_v4  ;;  %v9649_v7 = vld [vmem:[%s13730_s23 + $0x88] sm:$0xff]   ;;  %v9653_v11 = vld [vmem:[%s13730_s23 + $0x90] sm:$0xff]  }
   0xc   :  { %8891 = vmatpush3.bf16.msra.mxu1 %v9645_v3  ;;  %v9654_v12 = vld [vmem:[%s13730_s23 + $0x58] sm:$0xff]   ;;  %v9658_v16 = vld [vmem:[%s13730_s23 + $0x60] sm:$0xff]   ;;  %v9662_v20 = vld [vmem:[%s13730_s23 + $0x68] sm:$0xff]  }
   0xd   :  { %8892 = vmatprep.subr.bf16.mxu1 %v9648_v6  ;;  %v9655_v13 = vld [vmem:[%s13730_s23 + $0x18] sm:$0xff]   ;;  %v9659_v17 = vld [vmem:[%s13730_s23 + $0x20] sm:$0xff]   ;;  %v9663_v21 = vld [vmem:[%s13730_s23 + $0x28] sm:$0xff]  }
   0xe   :  { %8871 = vmatpush3.bf16.msra.mxu0 %v9647_v5  ;;  %v9656_v14 = vld [vmem:[%s13730_s23 + $0xd8] sm:$0xff]   ;;  %v9660_v18 = vld [vmem:[%s13730_s23 + $0xe0] sm:$0xff]   ;;  %v9664_v22 = vld [vmem:[%s13730_s23 + $0xe8] sm:$0xff]  }
   0xf   :  { %8872 = vmatprep.subr.bf16.mxu0 %v9650_v8  ;;  %v9657_v15 = vld [vmem:[%s13730_s23 + $0x98] sm:$0xff]   ;;  %v9661_v19 = vld [vmem:[%s13730_s23 + $0xa0] sm:$0xff]   ;;  %v9665_v23 = vld [vmem:[%s13730_s23 + $0xa8] sm:$0xff]  }
  0x10   :  { %8893 = vmatpush3.bf16.msra.mxu1 %v9649_v7  ;;  %v9666_v24 = vld [vmem:[%s13730_s23 + $0x70] sm:$0xff]   ;;  %v9670_v28 = vld [vmem:[%s13730_s23 + $0x78] sm:$0xff]   ;;  %v64_v31 = vld [vmem:[%s13731_s28 + $0x8] sm:$0xff] }
  0x11   :  { %8894 = vmatprep.subr.bf16.mxu1 %v9652_v10  ;;  %v9667_v25 = vld [vmem:[%s13730_s23 + $0x30] sm:$0xff]   ;;  %v9671_v29 = vld [vmem:[%s13730_s23 + $0x38] sm:$0xff]   ;;  %v63_v35 = vld [vmem:[%s13731_s28] sm:$0xff] }
  0x12   :  { %8873 = vmatpush3.bf16.msra.mxu0 %v9651_v9  ;;  %v9668_v26 = vld [vmem:[%s13730_s23 + $0xf0] sm:$0xff]   ;;  %v9672_v30 = vld [vmem:[%s13730_s23 + $0xf8] sm:$0xff]   ;;  %v68_v37 = vld [vmem:[%s13731_s28 + $0x28] sm:$0xff] }
  0x13   :  { %8874 = vmatprep.subr.bf16.mxu0 %v9654_v12  ;;  %v9669_v27 = vld [vmem:[%s13730_s23 + $0xb0] sm:$0xff]   ;;  %v9673_v34 = vld [vmem:[%s13730_s23 + $0xb8] sm:$0xff]   ;;  %v71_v39 = vld [vmem:[%s13731_s28 + $0x40] sm:$0xff]  ;;  %v73_v40 = vpack.c.bf16 %v68_v37, %v63_v35 }
  0x14   :  { %8895 = vmatpush3.bf16.msra.mxu1 %v9653_v11  ;;  %v69_v32 = vld [vmem:[%s13731_s28 + $0x30] sm:$0xff]  ;;  %v66_v38 = vld [vmem:[%s13731_s28 + $0x18] sm:$0xff]  ;;  %v9674_v42 = vld [vmem:[%s13730_s23 + $0x100] sm:$0xff]  }
  0x15   :  { %8896 = vmatprep.subr.bf16.mxu1 %v9656_v14  ;;  %v74_v33 = vpack.c.bf16 %v69_v32, %v64_v31  ;;  %v76_v41 = vpack.c.bf16 %v71_v39, %v66_v38  ;;  %v65_v43 = vld [vmem:[%s13731_s28 + $0x10] sm:$0xff]  ;;  %v70_v44 = vld [vmem:[%s13731_s28 + $0x38] sm:$0xff]  ;;  %v9675_v46 = vld [vmem:[%s13730_s23 + $0x108] sm:$0xff]  }
  0x16   :  { %8875 = vmatpush3.bf16.msra.mxu0 %v9655_v13  ;;  %v75_v45 = vpack.c.bf16 %v70_v44, %v65_v43  ;;  %v9676_v47 = vld [vmem:[%s13730_s23 + $0x110] sm:$0xff]   ;;  %v9677_v48 = vld [vmem:[%s13730_s23 + $0x118] sm:$0xff]   ;;  %v9678_v49 = vld [vmem:[%s13730_s23 + $0x120] sm:$0xff]  }
  0x17   :  { %8876 = vmatprep.subr.bf16.mxu0 %v9658_v16  ;;  %437 = vmatprep.mubr.bf16.mxu0 %v74_v33  ;;  %v9679_v50 = vld [vmem:[%s13730_s23 + $0x128] sm:$0xff]   ;;  %v9680_v51 = vld [vmem:[%s13730_s23 + $0x130] sm:$0xff]   ;;  %v9681_v52 = vld [vmem:[%s13730_s23 + $0x138] sm:$0xff]  }
  0x18   :  { %8897 = vmatpush3.bf16.msra.mxu1 %v9657_v15  ;;  %478 = vmatprep.mubr.bf16.mxu1 %v76_v41  ;;  %v67_v53 = vld [vmem:[%s13731_s28 + $0x20] sm:$0xff]  ;;  %v72_v54 = vld [vmem:[%s13731_s28 + $0x48] sm:$0xff] }
  0x19   :  { %8898 = vmatprep.subr.bf16.mxu1 %v9660_v18  ;;  %v77_v55 = vpack.c.bf16 %v72_v54, %v67_v53  ;;  %v9682_v56 = vld [vmem:[%s13732_s27] ss:$16 sps:$4 sm:$0xff]   ;;  %v9684_v57 = vld [vmem:[%s13732_s27 + $0x4] ss:$16 sps:$4 sm:$0xff]   ;;  %v9685_v58 = vld [vmem:[%s13732_s27 + $0x8] ss:$16 sps:$4 sm:$0xff]  }
  0x1a   :  { %8877 = vmatpush3.bf16.msra.mxu0 %v9659_v17  ;;  %v9687_v59 = vld [vmem:[%s13732_s27 + $0xc] ss:$16 sps:$4 sm:$0xff]   ;;  %v9688_v60 = vld [vmem:[%s13732_s27 + $0x20] ss:$16 sps:$4 sm:$0xff]   ;;  %v9690_v61 = vld [vmem:[%s13732_s27 + $0x24] ss:$16 sps:$4 sm:$0xff]  }
  0x1b   :  { %8878 = vmatprep.subr.bf16.mxu0 %v9662_v20  ;;  %v9691_v62 = vld [vmem:[%s13732_s27 + $0x28] ss:$16 sps:$4 sm:$0xff]   ;;  %v9693_v63 = vld [vmem:[%s13732_s27 + $0x2c] ss:$16 sps:$4 sm:$0xff]   ;;  %v9696_v0 = vld [vmem:[%s13732_s27 + $0x44] ss:$16 sps:$4 sm:$0xff]  }
  0x1c   :  { %8899 = vmatpush3.bf16.msra.mxu1 %v9661_v19  ;;  %v9694_v1 = vld [vmem:[%s13732_s27 + $0x40] ss:$16 sps:$4 sm:$0xff]   ;;  %v9699_v2 = vld [vmem:[%s13732_s27 + $0x4c] ss:$16 sps:$4 sm:$0xff]   ;;  %v9697_v3 = vld [vmem:[%s13732_s27 + $0x48] ss:$16 sps:$4 sm:$0xff]  }
  0x1d   :  { %8900 = vmatprep.subr.bf16.mxu1 %v9664_v22  ;;  %v9702_v4 = vld [vmem:[%s13732_s27 + $0x64] ss:$16 sps:$4 sm:$0xff]   ;;  %v9700_v5 = vld [vmem:[%s13732_s27 + $0x60] ss:$16 sps:$4 sm:$0xff]   ;;  %v9705_v6 = vld [vmem:[%s13732_s27 + $0x6c] ss:$16 sps:$4 sm:$0xff]  }
  0x1e   :  { %8879 = vmatpush3.bf16.msra.mxu0 %v9663_v21  ;;  %v9703_v7 = vld [vmem:[%s13732_s27 + $0x68] ss:$16 sps:$4 sm:$0xff]   ;;  %v9708_v8 = vld [vmem:[%s13732_s27 + $0x84] ss:$16 sps:$4 sm:$0xff]   ;;  %v9711_v9 = vld [vmem:[%s13732_s27 + $0x8c] ss:$16 sps:$4 sm:$0xff]  }
  0x1f   :  { %8880 = vmatprep.subr.bf16.mxu0 %v9666_v24  ;;  %v9706_v10 = vld [vmem:[%s13732_s27 + $0x80] ss:$16 sps:$4 sm:$0xff]   ;;  %v9709_v11 = vld [vmem:[%s13732_s27 + $0x88] ss:$16 sps:$4 sm:$0xff]   ;;  %v9714_v12 = vld [vmem:[%s13732_s27 + $0xa4] ss:$16 sps:$4 sm:$0xff]  }
  0x20   :  { %8901 = vmatpush3.bf16.msra.mxu1 %v9665_v23  ;;  %v9717_v13 = vld [vmem:[%s13732_s27 + $0xac] ss:$16 sps:$4 sm:$0xff]   ;;  %v9712_v14 = vld [vmem:[%s13732_s27 + $0xa0] ss:$16 sps:$4 sm:$0xff]   ;;  %v9715_v15 = vld [vmem:[%s13732_s27 + $0xa8] ss:$16 sps:$4 sm:$0xff]  }
  0x21   :  { %8902 = vmatprep.subr.bf16.mxu1 %v9668_v26  ;;  %v9720_v16 = vld [vmem:[%s13732_s27 + $0xc4] ss:$16 sps:$4 sm:$0xff]   ;;  %v9723_v17 = vld [vmem:[%s13732_s27 + $0xcc] ss:$16 sps:$4 sm:$0xff]   ;;  %v9718_v18 = vld [vmem:[%s13732_s27 + $0xc0] ss:$16 sps:$4 sm:$0xff]  }
  0x22   :  { %8881 = vmatpush3.bf16.msra.mxu0 %v9667_v25  ;;  %v9721_v19 = vld [vmem:[%s13732_s27 + $0xc8] ss:$16 sps:$4 sm:$0xff]   ;;  %v9726_v20 = vld [vmem:[%s13732_s27 + $0xe4] ss:$16 sps:$4 sm:$0xff]   ;;  %v9729_v21 = vld [vmem:[%s13732_s27 + $0xec] ss:$16 sps:$4 sm:$0xff]  }
  0x23   :  { %8882 = vmatprep.subr.bf16.mxu0 %v9670_v28  ;;  %v10681_v22 = vmov 0   ;;  %v9724_v23 = vld [vmem:[%s13732_s27 + $0xe0] ss:$16 sps:$4 sm:$0xff]   ;;  %v9727_v24 = vld [vmem:[%s13732_s27 + $0xe8] ss:$16 sps:$4 sm:$0xff]  }
  0x24   :  { %8903 = vmatpush3.bf16.msra.mxu1 %v9669_v27  ;;  %v9730_v25 = vld [vmem:[%s13733_s26 + $0x40] sm:$0xff]  }
  0x25   :  { %8904 = vmatprep.subr.bf16.mxu1 %v9672_v30  ;;  %v9731_v26 = vld [vmem:[%s13733_s26 + $0xc0] sm:$0xff]  }
  0x26   :  { %8883 = vmatpush3.bf16.msra.mxu0 %v9671_v29  ;;  %v8169_v28 = vld [vmem:[%s13734_s2] ss:$0 sm:$0xff] }
  0x27   :  { %8974 = vmatprep.subr.bf16.mxu0 %v10679_v36  ;;  %v9732_v53 = vld [vmem:[%s13733_s26] sm:$0xff]  }
  0x28   :  { %8905 = vmatpush3.bf16.msra.mxu1 %v9673_v34  ;;  %v9733_v54 = vld [vmem:[%s13733_s26 + $0x80] sm:$0xff]  }
  0x29   :  { %438 = vmatmul.mubr.bf16.vlgmr.msra.gmra.mrb[0].mxu0 %v73_v40  ;;  %745 = vmatprep.subr.bf16.mxu1 %v9684_v57  ;;  %v9735_v57 = vld [vmem:[%s13733_s26 + $0xc8] sm:$0xff]  }
  0x2a   :  { %8975 = vmatpush3.bf16.msra.mxu0 %v9674_v42  ;;  %8990 = vmatprep.mubr.msk.bf16.mxu0 %vm10680_vm0, %v10679_v36 }
  0x2b   :  { %479 = vmatmul.mubr.bf16.vlgmr.msra.gmra.mrb[0].mxu1 %v75_v45  ;;  %8976 = vmatprep.subr.bf16.mxu0 %v10679_v36 }
  0x2c   :  { %746 = vmatpush1.bf16.msra.mxu1 %v9682_v56  ;;  %777 = vmatprep.mubr.bf16.mxu1 %v10681_v22  ;;  %v9734_v56 = vld [vmem:[%s13733_s26 + $0x48] sm:$0xff]  }
  0x2d   :  { %747 = vmatprep.subr.bf16.mxu1 %v9690_v61  ;;  %v9739_v61 = vld [vmem:[%s13733_s26 + $0xd0] sm:$0xff]  }
  0x2e   :  { %8977 = vmatpush3.bf16.msra.mxu0 %v9675_v46 }
  0x2f   :  { %8978 = vmatprep.subr.bf16.mxu0 %v10679_v36 }
  0x30   :  { %748 = vmatpush1.bf16.msra.mxu1 %v9688_v60  ;;  %v9738_v60 = vld [vmem:[%s13733_s26 + $0x50] sm:$0xff]  }
  0x31   :  { %749 = vmatprep.subr.bf16.mxu1 %v9696_v0  ;;  %v9742_v0 = vld [vmem:[%s13733_s26 + $0x58] sm:$0xff]  }
  0x32   :  { %8979 = vmatpush3.bf16.msra.mxu0 %v9676_v47 }
  0x33   :  { %8980 = vmatprep.subr.bf16.mxu0 %v10679_v36 }
  0x34   :  { %750 = vmatpush1.bf16.msra.mxu1 %v9694_v1  ;;  %v9743_v1 = vld [vmem:[%s13733_s26 + $0xd8] sm:$0xff]  }
  0x35   :  { %751 = vmatprep.subr.bf16.mxu1 %v9702_v4  ;;  %v9746_v4 = vld [vmem:[%s13733_s26 + $0x60] sm:$0xff]  }
  0x36   :  { %8981 = vmatpush3.bf16.msra.mxu0 %v9677_v48 }
  0x37   :  { %8982 = vmatprep.subr.bf16.mxu0 %v10679_v36 }
  0x38   :  { %752 = vmatpush1.bf16.msra.mxu1 %v9700_v5  ;;  %v9747_v5 = vld [vmem:[%s13733_s26 + $0xe0] sm:$0xff]  }
  0x39   :  { %753 = vmatprep.subr.bf16.mxu1 %v9708_v8  ;;  %v9750_v8 = vld [vmem:[%s13733_s26 + $0x68] sm:$0xff]  }
  0x3a   :  { %8983 = vmatpush3.bf16.msra.mxu0 %v9678_v49 }
  0x3b   :  { %8984 = vmatprep.subr.bf16.mxu0 %v10679_v36 }
  0x3c   :  { %754 = vmatpush1.bf16.msra.mxu1 %v9706_v10  ;;  %v9752_v10 = vld [vmem:[%s13733_s26 + $0x28] sm:$0xff]  }
  0x3d   :  { %755 = vmatprep.subr.bf16.mxu1 %v9714_v12  ;;  %v9754_v12 = vld [vmem:[%s13733_s26 + $0x70] sm:$0xff]  }
  0x3e   :  { %8985 = vmatpush3.bf16.msra.mxu0 %v9679_v50 }
  0x3f   :  { %8986 = vmatprep.subr.bf16.mxu0 %v10679_v36 }
  0x40   :  { %756 = vmatpush1.bf16.msra.mxu1 %v9712_v14  ;;  %v9756_v14 = vld [vmem:[%s13733_s26 + $0x30] sm:$0xff]  }
  0x41   :  { %757 = vmatprep.subr.bf16.mxu1 %v9720_v16  ;;  %v9758_v16 = vld [vmem:[%s13733_s26 + $0x78] sm:$0xff]  }
  0x42   :  { %8987 = vmatpush3.bf16.msra.mxu0 %v9680_v51 }
  0x43   :  { %8988 = vmatprep.subr.bf16.mxu0 %v10679_v36 }
  0x44   :  { %758 = vmatpush1.bf16.msra.mxu1 %v9718_v18  ;;  %v9760_v18 = vld [vmem:[%s13733_s26 + $0x38] sm:$0xff]  }
  0x45   :  { %759 = vmatprep.subr.bf16.mxu1 %v9726_v20  ;;  %v9764_v20 = vld [vmem:[%s13698_s8 + $0x4] ss:$20 sps:$4 sm:$0xff]  }
  0x46   :  { %8989 = vmatpush3.bf16.msra.mxu0 %v9681_v52 }
  0x47   :  { %788 = vmatprep.subr.bf16.mxu0 %v9687_v59  ;;  %v9737_v59 = vld [vmem:[%s13733_s26 + $0x88] sm:$0xff]  }
  0x48   :  { %760 = vmatpush1.bf16.msra.mxu1 %v9724_v23  ;;  %v565_v23 = vlaneseq }
  0x49   :  { %8991 = vmatmul.mubr.bf16.vlgmr.msra.gmra.mrb[4].mxu0 %v77_v55  ;;  %8921 = vmatprep.subr.bf16.mxu1 %v9730_v25 }
  0x4a   :  { %789 = vmatpush1.bf16.msra.mxu0 %v9685_v58  ;;  %820 = vmatprep.mubr.bf16.mxu0 %v10681_v22  ;;  %v9736_v58 = vld [vmem:[%s13733_s26 + $0x8] sm:$0xff]  }
  0x4b   :  { %790 = vmatprep.subr.bf16.mxu0 %v9693_v63  ;;  %v9741_v63 = vld [vmem:[%s13733_s26 + $0x90] sm:$0xff]  }
  0x4e   :  { %791 = vmatpush1.bf16.msra.mxu0 %v9691_v62  ;;  %v9740_v62 = vld [vmem:[%s13733_s26 + $0x10] sm:$0xff]  }
  0x4f   :  { %792 = vmatprep.subr.bf16.mxu0 %v9699_v2  ;;  %v9744_v2 = vld [vmem:[%s13733_s26 + $0x18] sm:$0xff]  }
  0x52   :  { %793 = vmatpush1.bf16.msra.mxu0 %v9697_v3  ;;  %v9745_v3 = vld [vmem:[%s13733_s26 + $0x98] sm:$0xff]  }
  0x53   :  { %794 = vmatprep.subr.bf16.mxu0 %v9705_v6  ;;  %v9748_v6 = vld [vmem:[%s13733_s26 + $0x20] sm:$0xff]  }
  0x56   :  { %795 = vmatpush1.bf16.msra.mxu0 %v9703_v7  ;;  %v9749_v7 = vld [vmem:[%s13733_s26 + $0xa0] sm:$0xff]  }
  0x57   :  { %796 = vmatprep.subr.bf16.mxu0 %v9711_v9  ;;  %v9751_v9 = vld [vmem:[%s13733_s26 + $0xe8] sm:$0xff]  }
  0x5a   :  { %797 = vmatpush1.bf16.msra.mxu0 %v9709_v11  ;;  %v9753_v11 = vld [vmem:[%s13733_s26 + $0xa8] sm:$0xff]  }
  0x5b   :  { %798 = vmatprep.subr.bf16.mxu0 %v9717_v13  ;;  %v9755_v13 = vld [vmem:[%s13733_s26 + $0xf0] sm:$0xff]  }
  0x5e   :  { %799 = vmatpush1.bf16.msra.mxu0 %v9715_v15  ;;  %v9757_v15 = vld [vmem:[%s13733_s26 + $0xb0] sm:$0xff]  }
  0x5f   :  { %800 = vmatprep.subr.bf16.mxu0 %v9723_v17  ;;  %v9759_v17 = vld [vmem:[%s13733_s26 + $0xf8] sm:$0xff]  }
  0x62   :  { %801 = vmatpush1.bf16.msra.mxu0 %v9721_v19  ;;  %v9761_v19 = vld [vmem:[%s13733_s26 + $0xb8] sm:$0xff]  }
  0x63   :  { %802 = vmatprep.subr.bf16.mxu0 %v9729_v21  ;;  %v9767_v21 = vld [vmem:[%s13698_s8 + $0xc] ss:$20 sps:$4 sm:$0xff]  }
  0x66   :  { %803 = vmatpush1.bf16.msra.mxu0 %v9727_v24  ;;  %v11151_v24 = vshrl.u32 %v565_v23, 7  ;;  %v9803_v23 = vld [vmem:[%s13698_s8 + $0xfc] ss:$20 sps:$4 sm:$0xff]  }
  0x67   :  { %8943 = vmatprep.subr.bf16.mxu0 %v9731_v26 }
  0x68   :  { %13735 = vst [vmem:[#allocation2_spill] sm:$0xff] %v11151_v24  ;;  %v11154_v25 = vsub.s32 0, %v11151_v24  ;;  %v11157_v26 = vsub.s32 2, %v11151_v24 }
  0x6a   :  { %13736 = vst [vmem:[#allocation3_spill] sm:$0xff] %v11154_v25  ;;  %13737 = vst [vmem:[#allocation4_spill] sm:$0xff] %v11157_v26 }
  0xfc   :  { %v8884_v27 = vpop.f32.mrb[0].mxu0 }
  0xfd   :  { %v8885_v29 = vpop.f32.mrb[1].mxu0 }
  0xfe   :  { %v8886_v30 = vadd.f32 %v8885_v29, %v8884_v27  ;;  %v8887_v31 = vpop.f32.mrb[2].mxu0  ;;  %v8906_v32 = vpop.f32.mrb[0].mxu1  ;;  %v563_v27 = vld [vmem:[%s13699_s5] sm:$0xf]  ;;  %v11166_v29 = vsub.s32 3, %v11151_v24 }
  0xff   :  { %v8888_v33 = vpop.f32.mrb[3].mxu0  ;;  %v8907_v34 = vpop.f32.mrb[1].mxu1 }
 0x100   :  { %v440_v35 = vadd.f32 %v8886_v30, %v8169_v28  ;;  %v8889_v37 = vadd.f32 %v8888_v33, %v8887_v31  ;;  %v8908_v38 = vadd.f32 %v8907_v34, %v8906_v32  ;;  %v8909_v39 = vpop.f32.mrb[2].mxu1  ;;  %13739 = vst [vmem:[#allocation6_spill] sm:$0xff] %v11166_v29  ;;  %v568_v30 = vrot.slane %v563_v27, %v11154_v25 }
 0x101   :  { %v8910_v40 = vpop.f32.mrb[3].mxu1  ;;  %v576_v31 = vrot.slane %v563_v27, %v11157_v26  ;;  %v580_v33 = vrot.slane %v563_v27, %v11166_v29 }
 0x102   :  { %v443_v41 = vadd.f32 %v8889_v37, %v8169_v28  ;;  %v8911_v42 = vadd.f32 %v8910_v40, %v8909_v39  ;;  %v481_v43 = vadd.f32 %v8908_v38, %v440_v35  ;;  %v11163_v28 = vsub.s32 1, %v11151_v24 }
 0x104   :  { %v484_v44 = vadd.f32 %v8911_v42, %v443_v41  ;;  %13738 = vst [vmem:[#allocation5_spill] sm:$0xff] %v11163_v28  ;;  %v572_v32 = vrot.slane %v563_v27, %v11163_v28  ;;  %v9798_v27 = vld [vmem:[%s13698_s8 + $0xf0] ss:$20 sps:$4 sm:$0xff]  }
 0x11c   :  { %v521_v45 = vpop.f32.mrb[4].mxu0 }
 0x11d   :  { %v522_v46 = vadd.f32 %v521_v45, %v481_v43  ;;  %v8992_v47 = vpop.f32.mrb[5].mxu0 }
 0x11e   :  { %v524_v48 = vpop.f32.mrb[6].mxu0 }
 0x11f   :  { %v525_v49 = vadd.f32 %v524_v48, %v484_v44  ;;  %v8993_v50 = vpop.f32.mrb[7].mxu0  ;;  %10622 = vtanh.f32 %v522_v46 }
 0x121   :  { %10624 = vtanh.f32 %v525_v49 }
 0x129   :  { %v10623_v51 = vpop.eup %10622 }
 0x12b   :  { %v10625_v52 = vpop.eup %10624 }
 0x12c   :  { %v530_v55 = vpack.c.bf16 %v10625_v52, %v10623_v51 }
 0x12e   :  { %778 = vmatmul.mubr.bf16.vlgmr.msra.gmra.mrb[4].mxu1 %v530_v55  ;;  %821 = vmatmul.mubr.bf16.vlgmr.msra.gmra.mrb[8].mxu0 %v530_v55 }
 0x12f   :  { %8922 = vmatpush3.bf16.msra.mxu1 %v9732_v53  ;;  %8944 = vmatpush3.bf16.msra.mxu0 %v9733_v54 }
 0x130   :  { %8923 = vmatprep.subr.bf16.mxu1 %v9734_v56  ;;  %8945 = vmatprep.subr.bf16.mxu0 %v9735_v57 }
 0x133   :  { %8924 = vmatpush3.bf16.msra.mxu1 %v9736_v58  ;;  %8946 = vmatpush3.bf16.msra.mxu0 %v9737_v59 }
 0x134   :  { %8925 = vmatprep.subr.bf16.mxu1 %v9738_v60  ;;  %8947 = vmatprep.subr.bf16.mxu0 %v9739_v61 }
 0x137   :  { %8926 = vmatpush3.bf16.msra.mxu1 %v9740_v62  ;;  %8948 = vmatpush3.bf16.msra.mxu0 %v9741_v63  ;;  %v9762_v62 = vld [vmem:[%s13698_s8] ss:$20 sps:$4 sm:$0xff]  }
 0x138   :  { %8927 = vmatprep.subr.bf16.mxu1 %v9742_v0  ;;  %8949 = vmatprep.subr.bf16.mxu0 %v9743_v1  ;;  %v9765_v0 = vld [vmem:[%s13698_s8 + $0x8] ss:$20 sps:$4 sm:$0xff]   ;;  %v9770_v1 = vld [vmem:[%s13698_s8 + $0x2c] ss:$20 sps:$4 sm:$0xff]  }
 0x13b   :  { %8928 = vmatpush3.bf16.msra.mxu1 %v9744_v2  ;;  %8950 = vmatpush3.bf16.msra.mxu0 %v9745_v3  ;;  %v9773_v2 = vld [vmem:[%s13698_s8 + $0x34] ss:$20 sps:$4 sm:$0xff]  }
 0x13c   :  { %8929 = vmatprep.subr.bf16.mxu1 %v9746_v4  ;;  %8951 = vmatprep.subr.bf16.mxu0 %v9747_v5  ;;  %v9768_v3 = vld [vmem:[%s13698_s8 + $0x28] ss:$20 sps:$4 sm:$0xff]   ;;  %v9771_v4 = vld [vmem:[%s13698_s8 + $0x30] ss:$20 sps:$4 sm:$0xff]  }
 0x13d   :  { %v9776_v5 = vld [vmem:[%s13698_s8 + $0x54] ss:$20 sps:$4 sm:$0xff]  }
 0x13f   :  { %8930 = vmatpush3.bf16.msra.mxu1 %v9748_v6  ;;  %8952 = vmatpush3.bf16.msra.mxu0 %v9749_v7  ;;  %v9779_v6 = vld [vmem:[%s13698_s8 + $0x5c] ss:$20 sps:$4 sm:$0xff]  }
 0x140   :  { %8931 = vmatprep.subr.bf16.mxu1 %v9750_v8  ;;  %8953 = vmatprep.subr.bf16.mxu0 %v9751_v9  ;;  %v9774_v7 = vld [vmem:[%s13698_s8 + $0x50] ss:$20 sps:$4 sm:$0xff]   ;;  %v9777_v8 = vld [vmem:[%s13698_s8 + $0x58] ss:$20 sps:$4 sm:$0xff]  }
 0x141   :  { %v9782_v9 = vld [vmem:[%s13698_s8 + $0x7c] ss:$20 sps:$4 sm:$0xff]  }
 0x143   :  { %8932 = vmatpush3.bf16.msra.mxu1 %v9752_v10  ;;  %8954 = vmatpush3.bf16.msra.mxu0 %v9753_v11  ;;  %v9785_v10 = vld [vmem:[%s13698_s8 + $0x84] ss:$20 sps:$4 sm:$0xff]  }
 0x144   :  { %8933 = vmatprep.subr.bf16.mxu1 %v9754_v12  ;;  %8955 = vmatprep.subr.bf16.mxu0 %v9755_v13  ;;  %v9780_v11 = vld [vmem:[%s13698_s8 + $0x78] ss:$20 sps:$4 sm:$0xff]   ;;  %v9783_v12 = vld [vmem:[%s13698_s8 + $0x80] ss:$20 sps:$4 sm:$0xff]  }
 0x145   :  { %v9788_v13 = vld [vmem:[%s13698_s8 + $0xa4] ss:$20 sps:$4 sm:$0xff]  }
 0x147   :  { %8934 = vmatpush3.bf16.msra.mxu1 %v9756_v14  ;;  %8956 = vmatpush3.bf16.msra.mxu0 %v9757_v15  ;;  %v9791_v14 = vld [vmem:[%s13698_s8 + $0xac] ss:$20 sps:$4 sm:$0xff]  }
 0x148   :  { %8935 = vmatprep.subr.bf16.mxu1 %v9758_v16  ;;  %8957 = vmatprep.subr.bf16.mxu0 %v9759_v17  ;;  %v9786_v15 = vld [vmem:[%s13698_s8 + $0xa0] ss:$20 sps:$4 sm:$0xff]   ;;  %v9789_v16 = vld [vmem:[%s13698_s8 + $0xa8] ss:$20 sps:$4 sm:$0xff]  }
 0x149   :  { %v9794_v17 = vld [vmem:[%s13698_s8 + $0xcc] ss:$20 sps:$4 sm:$0xff]  }
 0x14b   :  { %8936 = vmatpush3.bf16.msra.mxu1 %v9760_v18  ;;  %8958 = vmatpush3.bf16.msra.mxu0 %v9761_v19  ;;  %v9797_v18 = vld [vmem:[%s13698_s8 + $0xd4] ss:$20 sps:$4 sm:$0xff]  }
 0x14c   :  { %1474 = vmatprep.subr.bf16.mxu1 %v9764_v20  ;;  %1517 = vmatprep.subr.bf16.mxu0 %v9767_v21  ;;  %v9792_v19 = vld [vmem:[%s13698_s8 + $0xc8] ss:$20 sps:$4 sm:$0xff]   ;;  %v9795_v20 = vld [vmem:[%s13698_s8 + $0xd0] ss:$20 sps:$4 sm:$0xff]  }
 0x14d   :  { %v9800_v21 = vld [vmem:[%s13698_s8 + $0xf4] ss:$20 sps:$4 sm:$0xff]  }
 0x201   :  { %v779_v34 = vpop.f32.mrb[4].mxu1  ;;  %v822_v35 = vpop.f32.mrb[8].mxu0 }
 0x202   :  { %v780_v37 = vadd.f32 %v779_v34, %v568_v30  ;;  %v823_v38 = vadd.f32 %v822_v35, %v576_v31  ;;  %v781_v39 = vpop.f32.mrb[5].mxu1  ;;  %v824_v40 = vpop.f32.mrb[9].mxu0  ;;  %v9807_v34 = vld [vmem:[%s13698_s8 + $0x120] ss:$20 sps:$4 sm:$0xff]  }
 0x203   :  { %v782_v41 = vadd.f32 %v781_v39, %v572_v32  ;;  %v825_v42 = vadd.f32 %v824_v40, %v580_v33  ;;  %v783_v43 = vpop.f32.mrb[6].mxu1  ;;  %v826_v44 = vpop.f32.mrb[10].mxu0  ;;  %v9812_v35 = vld [vmem:[%s13700_s10 + $0x4] ss:$16 sps:$4 sm:$0xff]   ;;  %v8242_v39 = vld [vmem:[%s13701_s7] ss:$0 sm:$0xff] }
 0x204   :  { %10626 = vtanh.f32 %v780_v37  ;;  %v784_v45 = vadd.f32 %v783_v43, %v568_v30  ;;  %v785_v46 = vpop.f32.mrb[7].mxu1  ;;  %v828_v47 = vpop.f32.mrb[11].mxu0  ;;  %v827_v48 = vadd.f32 %v826_v44, %v576_v31  ;;  %v9801_v30 = vld [vmem:[%s13698_s8 + $0xf8] ss:$20 sps:$4 sm:$0xff]   ;;  %v9806_v31 = vld [vmem:[%s13698_s8 + $0x11c] ss:$20 sps:$4 sm:$0xff]  }
 0x205   :  { %10628 = vtanh.f32 %v823_v38  ;;  %v786_v49 = vadd.f32 %v785_v46, %v572_v32  ;;  %v829_v50 = vadd.f32 %v828_v47, %v580_v33  ;;  %v9809_v32 = vld [vmem:[%s13698_s8 + $0x124] ss:$20 sps:$4 sm:$0xff]  }
 0x206   :  { %10630 = vtanh.f32 %v782_v41  ;;  %v9804_v33 = vld [vmem:[%s13698_s8 + $0x118] ss:$20 sps:$4 sm:$0xff]  }
 0x207   :  { %10632 = vtanh.f32 %v825_v42 }
 0x208   :  { %10634 = vtanh.f32 %v784_v45 }
 0x209   :  { %10636 = vtanh.f32 %v827_v48 }
 0x20a   :  { %10638 = vtanh.f32 %v786_v49 }
 0x20b   :  { %10640 = vtanh.f32 %v829_v50 }
 0x20e   :  { %v10627_v51 = vpop.eup %10626 }
 0x20f   :  { %v10629_v52 = vpop.eup %10628 }
 0x210   :  { %v10631_v53 = vpop.eup %10630 }
 0x211   :  { %v10633_v54 = vpop.eup %10632 }
 0x212   :  { %v10635_v55 = vpop.eup %10634 }
 0x213   :  { %v10637_v56 = vpop.eup %10636  ;;  %v11172_v57 = vpack.c.bf16 %v10635_v55, %v10627_v51 }
 0x214   :  { %v10639_v58 = vpop.eup %10638  ;;  %v11174_v59 = vpack.c.bf16 %v10637_v56, %v10629_v52  ;;  %v9810_v56 = vld [vmem:[%s13700_s10] ss:$16 sps:$4 sm:$0xff]  }
 0x215   :  { %v10641_v60 = vpop.eup %10640  ;;  %v11176_v61 = vpack.c.bf16 %v10639_v58, %v10631_v53  ;;  %v9813_v58 = vld [vmem:[%s13698_s8 + $0x10] ss:$20 sps:$4 sm:$0xff]  }
 0x216   :  { %v11181_v63 = vpack.c.bf16 %v10641_v60, %v10633_v54 }
 0x217   :  { %1138 = vmatprep.mubr.bf16.mxu1 %v11176_v61 }
 0x218   :  { %1179 = vmatprep.mubr.bf16.mxu0 %v11181_v63  ;;  %1139 = vmatmul.mubr.bf16.vlgmr.msra.gmra.mrb[8].mxu1 %v11172_v57 }
 0x219   :  { %1180 = vmatmul.mubr.bf16.vlgmr.msra.gmra.mrb[12].mxu0 %v11174_v59  ;;  %1475 = vmatpush1.bf16.msra.mxu1 %v9762_v62  ;;  %v9816_v62 = vld [vmem:[%s13700_s10 + $0x24] ss:$16 sps:$4 sm:$0xff]  }
 0x21a   :  { %1518 = vmatpush1.bf16.msra.mxu0 %v9765_v0  ;;  %1476 = vmatprep.subr.bf16.mxu1 %v9770_v1  ;;  %v9814_v0 = vld [vmem:[%s13700_s10 + $0x20] ss:$16 sps:$4 sm:$0xff]   ;;  %v9817_v1 = vld [vmem:[%s13698_s8 + $0x38] ss:$20 sps:$4 sm:$0xff]  }
 0x21b   :  { %1519 = vmatprep.subr.bf16.mxu0 %v9773_v2  ;;  %1506 = vmatprep.mubr.bf16.mxu1 %v10681_v22  ;;  %v9820_v2 = vld [vmem:[%s13700_s10 + $0x44] ss:$16 sps:$4 sm:$0xff]  }
 0x21c   :  { %1549 = vmatprep.mubr.bf16.mxu0 %v10681_v22 }
 0x21d   :  { %1477 = vmatpush1.bf16.msra.mxu1 %v9768_v3  ;;  %v9818_v3 = vld [vmem:[%s13700_s10 + $0x40] ss:$16 sps:$4 sm:$0xff]  }
 0x21e   :  { %1520 = vmatpush1.bf16.msra.mxu0 %v9771_v4  ;;  %1478 = vmatprep.subr.bf16.mxu1 %v9776_v5  ;;  %v9821_v4 = vld [vmem:[%s13698_s8 + $0x60] ss:$20 sps:$4 sm:$0xff]  }
 0x21f   :  { %1521 = vmatprep.subr.bf16.mxu0 %v9779_v6  ;;  %v9824_v5 = vld [vmem:[%s13700_s10 + $0x64] ss:$16 sps:$4 sm:$0xff]   ;;  %v9822_v6 = vld [vmem:[%s13700_s10 + $0x60] ss:$16 sps:$4 sm:$0xff]  }
 0x221   :  { %1479 = vmatpush1.bf16.msra.mxu1 %v9774_v7  ;;  %v9825_v7 = vld [vmem:[%s13698_s8 + $0x88] ss:$20 sps:$4 sm:$0xff]  }
 0x222   :  { %1522 = vmatpush1.bf16.msra.mxu0 %v9777_v8  ;;  %1480 = vmatprep.subr.bf16.mxu1 %v9782_v9  ;;  %v9828_v8 = vld [vmem:[%s13700_s10 + $0x84] ss:$16 sps:$4 sm:$0xff]   ;;  %v9826_v9 = vld [vmem:[%s13700_s10 + $0x80] ss:$16 sps:$4 sm:$0xff]  }
 0x223   :  { %1523 = vmatprep.subr.bf16.mxu0 %v9785_v10  ;;  %v9829_v10 = vld [vmem:[%s13698_s8 + $0xb0] ss:$20 sps:$4 sm:$0xff]  }
 0x225   :  { %1481 = vmatpush1.bf16.msra.mxu1 %v9780_v11  ;;  %v9832_v11 = vld [vmem:[%s13700_s10 + $0xa4] ss:$16 sps:$4 sm:$0xff]  }
 0x226   :  { %1524 = vmatpush1.bf16.msra.mxu0 %v9783_v12  ;;  %1482 = vmatprep.subr.bf16.mxu1 %v9788_v13  ;;  %v9830_v12 = vld [vmem:[%s13700_s10 + $0xa0] ss:$16 sps:$4 sm:$0xff]   ;;  %v9833_v13 = vld [vmem:[%s13698_s8 + $0xd8] ss:$20 sps:$4 sm:$0xff]  }
 0x227   :  { %1525 = vmatprep.subr.bf16.mxu0 %v9791_v14  ;;  %v9836_v14 = vld [vmem:[%s13700_s10 + $0xc4] ss:$16 sps:$4 sm:$0xff]  }
 0x229   :  { %1483 = vmatpush1.bf16.msra.mxu1 %v9786_v15  ;;  %v9834_v15 = vld [vmem:[%s13700_s10 + $0xc0] ss:$16 sps:$4 sm:$0xff]  }
 0x22a   :  { %1526 = vmatpush1.bf16.msra.mxu0 %v9789_v16  ;;  %1484 = vmatprep.subr.bf16.mxu1 %v9794_v17  ;;  %v9837_v16 = vld [vmem:[%s13698_s8 + $0x100] ss:$20 sps:$4 sm:$0xff]  }
 0x22b   :  { %1527 = vmatprep.subr.bf16.mxu0 %v9797_v18  ;;  %v9840_v17 = vld [vmem:[%s13700_s10 + $0xe4] ss:$16 sps:$4 sm:$0xff]   ;;  %v9838_v18 = vld [vmem:[%s13700_s10 + $0xe0] ss:$16 sps:$4 sm:$0xff]  }
 0x22d   :  { %1485 = vmatpush1.bf16.msra.mxu1 %v9792_v19  ;;  %v9841_v19 = vld [vmem:[%s13698_s8 + $0x128] ss:$20 sps:$4 sm:$0xff]  }
 0x22e   :  { %1528 = vmatpush1.bf16.msra.mxu0 %v9795_v20  ;;  %1486 = vmatprep.subr.bf16.mxu1 %v9800_v21  ;;  %v9844_v20 = vld [vmem:[%s13700_s10 + $0x104] ss:$16 sps:$4 sm:$0xff]   ;;  %v9847_v21 = vld [vmem:[%s13700_s10 + $0xc] ss:$16 sps:$4 sm:$0xff]  }
 0x22f   :  { %1529 = vmatprep.subr.bf16.mxu0 %v9803_v23  ;;  %v9842_v23 = vld [vmem:[%s13700_s10 + $0x100] ss:$16 sps:$4 sm:$0xff]  }
 0x231   :  { %1487 = vmatpush1.bf16.msra.mxu1 %v9798_v27  ;;  %v9845_v27 = vld [vmem:[%s13700_s10 + $0x8] ss:$16 sps:$4 sm:$0xff]  }
 0x232   :  { %1530 = vmatpush1.bf16.msra.mxu0 %v9801_v30  ;;  %1488 = vmatprep.subr.bf16.mxu1 %v9806_v31  ;;  %v9853_v30 = vld [vmem:[%s13700_s10 + $0x2c] ss:$16 sps:$4 sm:$0xff]   ;;  %v9848_v31 = vld [vmem:[%s13700_s10 + $0x120] ss:$16 sps:$4 sm:$0xff]  }
 0x233   :  { %1531 = vmatprep.subr.bf16.mxu0 %v9809_v32  ;;  %v9851_v32 = vld [vmem:[%s13700_s10 + $0x28] ss:$16 sps:$4 sm:$0xff]  }
 0x235   :  { %1489 = vmatpush1.bf16.msra.mxu1 %v9804_v33  ;;  %v9856_v33 = vld [vmem:[%s13700_s10 + $0x144] ss:$16 sps:$4 sm:$0xff]  }
 0x236   :  { %1532 = vmatpush1.bf16.msra.mxu0 %v9807_v34  ;;  %8994 = vmatprep.subr.bf16.mxu1 %v10679_v36  ;;  %v9859_v34 = vld [vmem:[%s13700_s10 + $0x4c] ss:$16 sps:$4 sm:$0xff]  }
 0x237   :  { %2485 = vmatprep.subr.bf16.mxu0 %v9812_v35  ;;  %v9854_v35 = vld [vmem:[%s13700_s10 + $0x140] ss:$16 sps:$4 sm:$0xff]  }
 0x2eb   :  { %v8937_v37 = vpop.f32.mrb[8].mxu1 }
 0x2ec   :  { %v8959_v38 = vpop.f32.mrb[12].mxu0  ;;  %v8938_v40 = vpop.f32.mrb[9].mxu1 }
 0x2ed   :  { %v8939_v41 = vadd.f32 %v8938_v40, %v8937_v37  ;;  %v8960_v42 = vpop.f32.mrb[13].mxu0  ;;  %v8940_v43 = vpop.f32.mrb[10].mxu1  ;;  %v9862_v37 = vld [vmem:[%s13700_s10 + $0x164] ss:$16 sps:$4 sm:$0xff]   ;;  %v9863_v40 = vld [vmem:[%s13700_s10 + $0x68] ss:$16 sps:$4 sm:$0xff]  }
 0x2ee   :  { %v8961_v44 = vadd.f32 %v8960_v42, %v8959_v38  ;;  %v8962_v45 = vpop.f32.mrb[14].mxu0  ;;  %v8941_v46 = vpop.f32.mrb[11].mxu1  ;;  %v9865_v38 = vld [vmem:[%s13700_s10 + $0x6c] ss:$16 sps:$4 sm:$0xff]  }
 0x2ef   :  { %v1141_v47 = vadd.f32 %v8939_v41, %v8242_v39  ;;  %v8942_v48 = vadd.f32 %v8941_v46, %v8940_v43  ;;  %v8963_v49 = vpop.f32.mrb[15].mxu0  ;;  %v9868_v41 = vld [vmem:[%s13700_s10 + $0x184] ss:$16 sps:$4 sm:$0xff]   ;;  %v9871_v42 = vld [vmem:[%s13700_s10 + $0x8c] ss:$16 sps:$4 sm:$0xff]  }
 0x2f0   :  { %v8964_v50 = vadd.f32 %v8963_v49, %v8962_v45  ;;  %v9866_v43 = vld [vmem:[%s13700_s10 + $0x180] ss:$16 sps:$4 sm:$0xff]   ;;  %v9874_v45 = vld [vmem:[%s13700_s10 + $0x1a4] ss:$16 sps:$4 sm:$0xff]   ;;  %v9877_v46 = vld [vmem:[%s13700_s10 + $0xac] ss:$16 sps:$4 sm:$0xff]  }
 0x2f1   :  { %v1182_v51 = vadd.f32 %v8961_v44, %v1141_v47  ;;  %v1144_v52 = vadd.f32 %v8942_v48, %v8242_v39  ;;  %v9860_v39 = vld [vmem:[%s13700_s10 + $0x160] ss:$16 sps:$4 sm:$0xff]   ;;  %v9869_v44 = vld [vmem:[%s13700_s10 + $0x88] ss:$16 sps:$4 sm:$0xff]   ;;  %v9880_v49 = vld [vmem:[%s13700_s10 + $0x1c4] ss:$16 sps:$4 sm:$0xff]  }
 0x2f2   :  { %v9872_v47 = vld [vmem:[%s13700_s10 + $0x1a0] ss:$16 sps:$4 sm:$0xff]   ;;  %v9875_v48 = vld [vmem:[%s13700_s10 + $0xa8] ss:$16 sps:$4 sm:$0xff]  }
 0x2f3   :  { %v1185_v53 = vadd.f32 %v8964_v50, %v1144_v52  ;;  %10642 = vtanh.f32 %v1182_v51  ;;  %v9883_v50 = vld [vmem:[%s13700_s10 + $0xcc] ss:$16 sps:$4 sm:$0xff]   ;;  %v9878_v51 = vld [vmem:[%s13700_s10 + $0x1c0] ss:$16 sps:$4 sm:$0xff]   ;;  %v9881_v52 = vld [vmem:[%s13700_s10 + $0xc8] ss:$16 sps:$4 sm:$0xff]  }
 0x2f5   :  { %10644 = vtanh.f32 %v1185_v53  ;;  %v9886_v53 = vld [vmem:[%s13700_s10 + $0x1e4] ss:$16 sps:$4 sm:$0xff]  }
 0x2fd   :  { %v10643_v54 = vpop.eup %10642 }
 0x2ff   :  { %v10645_v55 = vpop.eup %10644 }
 0x300   :  { %v11289_v60 = vpack.c.bf16 %v10645_v55, %v10643_v54  ;;  %v9889_v54 = vld [vmem:[%s13700_s10 + $0xec] ss:$16 sps:$4 sm:$0xff]   ;;  %v9884_v55 = vld [vmem:[%s13700_s10 + $0x1e0] ss:$16 sps:$4 sm:$0xff]  }
 0x302   :  { %1507 = vmatmul.mubr.bf16.vlgmr.msra.gmra.mrb[12].mxu1 %v11289_v60  ;;  %1550 = vmatmul.mubr.bf16.vlgmr.msra.gmra.mrb[16].mxu0 %v11289_v60 }
 0x303   :  { %8995 = vmatpush3.bf16.msra.mxu1 %v9813_v58  ;;  %2486 = vmatpush1.bf16.msra.mxu0 %v9810_v56  ;;  %v9887_v56 = vld [vmem:[%s13700_s10 + $0xe8] ss:$16 sps:$4 sm:$0xff]   ;;  %v9892_v58 = vld [vmem:[%s13700_s10 + $0x204] ss:$16 sps:$4 sm:$0xff]  }
 0x304   :  { %2517 = vmatprep.mubr.bf16.mxu0 %v11176_v61  ;;  %8996 = vmatprep.subr.bf16.mxu1 %v10679_v36 }
 0x305   :  { %2487 = vmatprep.subr.bf16.mxu0 %v9816_v62  ;;  %9010 = vmatprep.mubr.msk.bf16.mxu1 %vm10680_vm0, %v10679_v36  ;;  %v9890_v62 = vld [vmem:[%s13700_s10 + $0x200] ss:$16 sps:$4 sm:$0xff]   ;;  %vm8074_vm0 = vcmask 130048  }
 0x307   :  { %8997 = vmatpush3.bf16.msra.mxu1 %v9817_v1  ;;  %2488 = vmatpush1.bf16.msra.mxu0 %v9814_v0  ;;  %v9893_v0 = vld [vmem:[%s13700_s10 + $0x108] ss:$16 sps:$4 sm:$0xff]   ;;  %v9898_v1 = vld [vmem:[%s13700_s10 + $0x224] ss:$16 sps:$4 sm:$0xff]  }
 0x308   :  { %8998 = vmatprep.subr.bf16.mxu1 %v10679_v36  ;;  %2489 = vmatprep.subr.bf16.mxu0 %v9820_v2  ;;  %v9901_v2 = vld [vmem:[%s13700_s10 + $0x12c] ss:$16 sps:$4 sm:$0xff]  }
 0x30b   :  { %8999 = vmatpush3.bf16.msra.mxu1 %v9821_v4  ;;  %2490 = vmatpush1.bf16.msra.mxu0 %v9818_v3  ;;  %v9896_v3 = vld [vmem:[%s13700_s10 + $0x220] ss:$16 sps:$4 sm:$0xff]   ;;  %v9899_v4 = vld [vmem:[%s13700_s10 + $0x128] ss:$16 sps:$4 sm:$0xff]  }
 0x30c   :  { %9000 = vmatprep.subr.bf16.mxu1 %v10679_v36  ;;  %2491 = vmatprep.subr.bf16.mxu0 %v9824_v5  ;;  %v9904_v5 = vld [vmem:[%s13700_s10 + $0x244] ss:$16 sps:$4 sm:$0xff]  }
 0x30f   :  { %9001 = vmatpush3.bf16.msra.mxu1 %v9825_v7  ;;  %2492 = vmatpush1.bf16.msra.mxu0 %v9822_v6  ;;  %v9907_v6 = vld [vmem:[%s13700_s10 + $0x14c] ss:$16 sps:$4 sm:$0xff]   ;;  %v9902_v7 = vld [vmem:[%s13700_s10 + $0x240] ss:$16 sps:$4 sm:$0xff]  }
 0x310   :  { %9002 = vmatprep.subr.bf16.mxu1 %v10679_v36  ;;  %2493 = vmatprep.subr.bf16.mxu0 %v9828_v8  ;;  %v9905_v8 = vld [vmem:[%s13700_s10 + $0x148] ss:$16 sps:$4 sm:$0xff]  }
 0x313   :  { %9003 = vmatpush3.bf16.msra.mxu1 %v9829_v10  ;;  %2494 = vmatpush1.bf16.msra.mxu0 %v9826_v9  ;;  %v9910_v9 = vld [vmem:[%s13700_s10 + $0x264] ss:$16 sps:$4 sm:$0xff]   ;;  %v9913_v10 = vld [vmem:[%s13700_s10 + $0x16c] ss:$16 sps:$4 sm:$0xff]  }
 0x314   :  { %9004 = vmatprep.subr.bf16.mxu1 %v10679_v36  ;;  %2495 = vmatprep.subr.bf16.mxu0 %v9832_v11  ;;  %v9908_v11 = vld [vmem:[%s13700_s10 + $0x260] ss:$16 sps:$4 sm:$0xff]  }
 0x317   :  { %9005 = vmatpush3.bf16.msra.mxu1 %v9833_v13  ;;  %2496 = vmatpush1.bf16.msra.mxu0 %v9830_v12  ;;  %v9911_v12 = vld [vmem:[%s13700_s10 + $0x168] ss:$16 sps:$4 sm:$0xff]   ;;  %v9916_v13 = vld [vmem:[%s13700_s10 + $0x284] ss:$16 sps:$4 sm:$0xff]  }
 0x318   :  { %9006 = vmatprep.subr.bf16.mxu1 %v10679_v36  ;;  %2497 = vmatprep.subr.bf16.mxu0 %v9836_v14  ;;  %v9919_v14 = vld [vmem:[%s13700_s10 + $0x18c] ss:$16 sps:$4 sm:$0xff]  }
 0x31b   :  { %9007 = vmatpush3.bf16.msra.mxu1 %v9837_v16  ;;  %2498 = vmatpush1.bf16.msra.mxu0 %v9834_v15  ;;  %v9914_v15 = vld [vmem:[%s13700_s10 + $0x280] ss:$16 sps:$4 sm:$0xff]   ;;  %v9917_v16 = vld [vmem:[%s13700_s10 + $0x188] ss:$16 sps:$4 sm:$0xff]  }
 0x31c   :  { %9008 = vmatprep.subr.bf16.mxu1 %v10679_v36  ;;  %2499 = vmatprep.subr.bf16.mxu0 %v9840_v17  ;;  %v9850_v36 = vld [vmem:[%s13700_s10 + $0x124] ss:$16 sps:$4 sm:$0xff]  }
 0x31d   :  { %v9922_v17 = vld [vmem:[%s13700_s10 + $0x2a4] ss:$16 sps:$4 sm:$0xff]  }
 0x31f   :  { %9009 = vmatpush3.bf16.msra.mxu1 %v9841_v19  ;;  %2500 = vmatpush1.bf16.msra.mxu0 %v9838_v18  ;;  %v9925_v18 = vld [vmem:[%s13700_s10 + $0x1ac] ss:$16 sps:$4 sm:$0xff]   ;;  %v9920_v19 = vld [vmem:[%s13700_s10 + $0x2a0] ss:$16 sps:$4 sm:$0xff]  }
 0x320   :  { %2501 = vmatprep.subr.bf16.mxu0 %v9844_v20  ;;  %2571 = vmatprep.subr.bf16.mxu1 %v9847_v21  ;;  %v9923_v20 = vld [vmem:[%s13700_s10 + $0x1a8] ss:$16 sps:$4 sm:$0xff]   ;;  %v9928_v21 = vld [vmem:[%s13700_s10 + $0x2c4] ss:$16 sps:$4 sm:$0xff]  }
 0x322   :  { %9011 = vmatmul.mubr.bf16.vlgmr.msra.gmra.mrb[16].mxu1 %v11289_v60  ;;  %v9895_v60 = vld [vmem:[%s13700_s10 + $0x10c] ss:$16 sps:$4 sm:$0xff]  }
 0x323   :  { %2502 = vmatpush1.bf16.msra.mxu0 %v9842_v23  ;;  %2572 = vmatpush1.bf16.msra.mxu1 %v9845_v27  ;;  %v9931_v23 = vld [vmem:[%s13700_s10 + $0x1cc] ss:$16 sps:$4 sm:$0xff]   ;;  %v9926_v27 = vld [vmem:[%s13700_s10 + $0x2c0] ss:$16 sps:$4 sm:$0xff]  }
 0x324   :  { %2603 = vmatprep.mubr.bf16.mxu1 %v11176_v61  ;;  %2503 = vmatprep.subr.bf16.mxu0 %v9850_v36  ;;  %v9857_v61 = vld [vmem:[%s13700_s10 + $0x48] ss:$16 sps:$4 sm:$0xff]  }
 0x325   :  { %2573 = vmatprep.subr.bf16.mxu1 %v9853_v30  ;;  %v9929_v36 = vld [vmem:[%s13700_s10 + $0x1c8] ss:$16 sps:$4 sm:$0xff]   ;;  %v9934_v30 = vld [vmem:[%s13700_s10 + $0x2e4] ss:$16 sps:$4 sm:$0xff]  }
 0x327   :  { %2504 = vmatpush1.bf16.msra.mxu0 %v9848_v31  ;;  %2574 = vmatpush1.bf16.msra.mxu1 %v9851_v32  ;;  %v9937_v31 = vld [vmem:[%s13700_s10 + $0x1ec] ss:$16 sps:$4 sm:$0xff]   ;;  %v9932_v32 = vld [vmem:[%s13700_s10 + $0x2e0] ss:$16 sps:$4 sm:$0xff]  }
 0x328   :  { %2505 = vmatprep.subr.bf16.mxu0 %v9856_v33  ;;  %2575 = vmatprep.subr.bf16.mxu1 %v9859_v34  ;;  %v9935_v33 = vld [vmem:[%s13700_s10 + $0x1e8] ss:$16 sps:$4 sm:$0xff]   ;;  %v9940_v34 = vld [vmem:[%s13700_s10 + $0x304] ss:$16 sps:$4 sm:$0xff]  }
 0x32b   :  { %2506 = vmatpush1.bf16.msra.mxu0 %v9854_v35  ;;  %2576 = vmatpush1.bf16.msra.mxu1 %v9857_v61  ;;  %v9943_v35 = vld [vmem:[%s13700_s10 + $0x20c] ss:$16 sps:$4 sm:$0xff]   ;;  %v9938_v61 = vld [vmem:[%s13700_s10 + $0x300] ss:$16 sps:$4 sm:$0xff]  }
 0x32c   :  { %2507 = vmatprep.subr.bf16.mxu0 %v9862_v37  ;;  %2577 = vmatprep.subr.bf16.mxu1 %v9865_v38  ;;  %v9941_v37 = vld [vmem:[%s13700_s10 + $0x208] ss:$16 sps:$4 sm:$0xff]   ;;  %v9946_v38 = vld [vmem:[%s13700_s10 + $0x324] ss:$16 sps:$4 sm:$0xff]  }
 0x32f   :  { %2508 = vmatpush1.bf16.msra.mxu0 %v9860_v39  ;;  %2578 = vmatpush1.bf16.msra.mxu1 %v9863_v40  ;;  %v9949_v39 = vld [vmem:[%s13700_s10 + $0x22c] ss:$16 sps:$4 sm:$0xff]   ;;  %v9944_v40 = vld [vmem:[%s13700_s10 + $0x320] ss:$16 sps:$4 sm:$0xff]  }
 0x330   :  { %2509 = vmatprep.subr.bf16.mxu0 %v9868_v41  ;;  %2579 = vmatprep.subr.bf16.mxu1 %v9871_v42  ;;  %v9947_v41 = vld [vmem:[%s13700_s10 + $0x228] ss:$16 sps:$4 sm:$0xff]   ;;  %v9952_v42 = vld [vmem:[%s13700_s10 + $0x344] ss:$16 sps:$4 sm:$0xff]  }
 0x333   :  { %2510 = vmatpush1.bf16.msra.mxu0 %v9866_v43  ;;  %2580 = vmatpush1.bf16.msra.mxu1 %v9869_v44  ;;  %v9950_v43 = vld [vmem:[%s13700_s10 + $0x340] ss:$16 sps:$4 sm:$0xff]   ;;  %v9958_v44 = vld [vmem:[%s13700_s10 + $0x364] ss:$16 sps:$4 sm:$0xff]  }
 0x334   :  { %2511 = vmatprep.subr.bf16.mxu0 %v9874_v45  ;;  %2581 = vmatprep.subr.bf16.mxu1 %v9877_v46  ;;  %v9961_v45 = vld [vmem:[%s13700_s10 + $0x26c] ss:$16 sps:$4 sm:$0xff]   ;;  %v9956_v46 = vld [vmem:[%s13700_s10 + $0x360] ss:$16 sps:$4 sm:$0xff]  }
 0x337   :  { %2512 = vmatpush1.bf16.msra.mxu0 %v9872_v47  ;;  %2582 = vmatpush1.bf16.msra.mxu1 %v9875_v48  ;;  %v9959_v47 = vld [vmem:[%s13700_s10 + $0x268] ss:$16 sps:$4 sm:$0xff]   ;;  %v9964_v48 = vld [vmem:[%s13700_s10 + $0x384] ss:$16 sps:$4 sm:$0xff]  }
 0x338   :  { %2513 = vmatprep.subr.bf16.mxu0 %v9880_v49  ;;  %2583 = vmatprep.subr.bf16.mxu1 %v9883_v50  ;;  %v9967_v49 = vld [vmem:[%s13700_s10 + $0x28c] ss:$16 sps:$4 sm:$0xff]   ;;  %v9962_v50 = vld [vmem:[%s13700_s10 + $0x380] ss:$16 sps:$4 sm:$0xff]  }
 0x33b   :  { %2514 = vmatpush1.bf16.msra.mxu0 %v9878_v51  ;;  %2584 = vmatpush1.bf16.msra.mxu1 %v9881_v52  ;;  %v9965_v51 = vld [vmem:[%s13700_s10 + $0x288] ss:$16 sps:$4 sm:$0xff]   ;;  %v9970_v52 = vld [vmem:[%s13700_s10 + $0x3a4] ss:$16 sps:$4 sm:$0xff]  }
 0x33c   :  { %2515 = vmatprep.subr.bf16.mxu0 %v9886_v53  ;;  %2585 = vmatprep.subr.bf16.mxu1 %v9889_v54  ;;  %v9973_v53 = vld [vmem:[%s13700_s10 + $0x2ac] ss:$16 sps:$4 sm:$0xff]   ;;  %v9968_v54 = vld [vmem:[%s13700_s10 + $0x3a0] ss:$16 sps:$4 sm:$0xff]  }
 0x33f   :  { %2516 = vmatpush1.bf16.msra.mxu0 %v9884_v55  ;;  %2586 = vmatpush1.bf16.msra.mxu1 %v9887_v56  ;;  %v9971_v55 = vld [vmem:[%s13700_s10 + $0x2a8] ss:$16 sps:$4 sm:$0xff]   ;;  %v9976_v56 = vld [vmem:[%s13700_s10 + $0x3c4] ss:$16 sps:$4 sm:$0xff]  }
 0x340   :  { %2528 = vmatprep.subr.bf16.mxu0 %v9892_v58  ;;  %2587 = vmatprep.subr.bf16.mxu1 %v9895_v60  ;;  %v9979_v58 = vld [vmem:[%s13700_s10 + $0x2cc] ss:$16 sps:$4 sm:$0xff]   ;;  %v9974_v60 = vld [vmem:[%s13700_s10 + $0x3c0] ss:$16 sps:$4 sm:$0xff]  }
 0x342   :  { %2518 = vmatmul.mubr.bf16.vlgmr.msra.gmra.mrb[20].mxu0 %v11172_v57 }
 0x343   :  { %2529 = vmatpush1.bf16.msra.mxu0 %v9890_v62  ;;  %2560 = vmatprep.mubr.bf16.mxu0 %v11181_v63  ;;  %v9977_v62 = vld [vmem:[%s13700_s10 + $0x2c8] ss:$16 sps:$4 sm:$0xff]  }
 0x344   :  { %2588 = vmatpush1.bf16.msra.mxu1 %v9893_v0  ;;  %2530 = vmatprep.subr.bf16.mxu0 %v9898_v1  ;;  %v9982_v0 = vld [vmem:[%s13700_s10 + $0x3e4] ss:$16 sps:$4 sm:$0xff]   ;;  %v9985_v1 = vld [vmem:[%s13700_s10 + $0x2ec] ss:$16 sps:$4 sm:$0xff]  }
 0x345   :  { %2589 = vmatprep.subr.bf16.mxu1 %v9901_v2  ;;  %v9980_v2 = vld [vmem:[%s13700_s10 + $0x3e0] ss:$16 sps:$4 sm:$0xff]  }
 0x347   :  { %2531 = vmatpush1.bf16.msra.mxu0 %v9896_v3  ;;  %v9983_v3 = vld [vmem:[%s13700_s10 + $0x2e8] ss:$16 sps:$4 sm:$0xff]  }
 0x348   :  { %2590 = vmatpush1.bf16.msra.mxu1 %v9899_v4  ;;  %2532 = vmatprep.subr.bf16.mxu0 %v9904_v5  ;;  %v9988_v4 = vld [vmem:[%s13700_s10 + $0x30c] ss:$16 sps:$4 sm:$0xff]   ;;  %v9986_v5 = vld [vmem:[%s13700_s10 + $0x308] ss:$16 sps:$4 sm:$0xff]  }
 0x349   :  { %2591 = vmatprep.subr.bf16.mxu1 %v9907_v6  ;;  %v9991_v6 = vld [vmem:[%s13700_s10 + $0x32c] ss:$16 sps:$4 sm:$0xff]  }
 0x34b   :  { %2533 = vmatpush1.bf16.msra.mxu0 %v9902_v7  ;;  %v9989_v7 = vld [vmem:[%s13700_s10 + $0x328] ss:$16 sps:$4 sm:$0xff]  }
 0x34c   :  { %2592 = vmatpush1.bf16.msra.mxu1 %v9905_v8  ;;  %2534 = vmatprep.subr.bf16.mxu0 %v9910_v9  ;;  %v9994_v8 = vld [vmem:[%s13700_s10 + $0x34c] ss:$16 sps:$4 sm:$0xff]   ;;  %v9992_v9 = vld [vmem:[%s13700_s10 + $0x348] ss:$16 sps:$4 sm:$0xff]  }
 0x34d   :  { %2593 = vmatprep.subr.bf16.mxu1 %v9913_v10  ;;  %v9997_v10 = vld [vmem:[%s13700_s10 + $0x36c] ss:$16 sps:$4 sm:$0xff]  }
 0x34f   :  { %2535 = vmatpush1.bf16.msra.mxu0 %v9908_v11  ;;  %v10010_v11 = vld [vmem:[%s13702_s12] ss:$16 sps:$4 sm:$0xff]  }
 0x350   :  { %2594 = vmatpush1.bf16.msra.mxu1 %v9911_v12  ;;  %2536 = vmatprep.subr.bf16.mxu0 %v9916_v13  ;;  %v10012_v12 = vld [vmem:[%s13702_s12 + $0x4] ss:$16 sps:$4 sm:$0xff]   ;;  %v9995_v13 = vld [vmem:[%s13700_s10 + $0x368] ss:$16 sps:$4 sm:$0xff]  }
 0x351   :  { %2595 = vmatprep.subr.bf16.mxu1 %v9919_v14  ;;  %v10018_v14 = vld [vmem:[%s13702_s12 + $0x24] ss:$16 sps:$4 sm:$0xff]  }
 0x353   :  { %2537 = vmatpush1.bf16.msra.mxu0 %v9914_v15  ;;  %v10016_v15 = vld [vmem:[%s13702_s12 + $0x20] ss:$16 sps:$4 sm:$0xff]  }
 0x354   :  { %2596 = vmatpush1.bf16.msra.mxu1 %v9917_v16  ;;  %2538 = vmatprep.subr.bf16.mxu0 %v9922_v17  ;;  %v10000_v16 = vld [vmem:[%s13700_s10 + $0x38c] ss:$16 sps:$4 sm:$0xff]   ;;  %v10024_v17 = vld [vmem:[%s13702_s12 + $0x44] ss:$16 sps:$4 sm:$0xff]  }
 0x355   :  { %2597 = vmatprep.subr.bf16.mxu1 %v9925_v18  ;;  %v9998_v18 = vld [vmem:[%s13700_s10 + $0x388] ss:$16 sps:$4 sm:$0xff]  }
 0x357   :  { %2539 = vmatpush1.bf16.msra.mxu0 %v9920_v19  ;;  %v10003_v19 = vld [vmem:[%s13700_s10 + $0x3ac] ss:$16 sps:$4 sm:$0xff]  }
 0x358   :  { %2598 = vmatpush1.bf16.msra.mxu1 %v9923_v20  ;;  %2540 = vmatprep.subr.bf16.mxu0 %v9928_v21  ;;  %v10022_v20 = vld [vmem:[%s13702_s12 + $0x40] ss:$16 sps:$4 sm:$0xff]   ;;  %v10030_v21 = vld [vmem:[%s13702_s12 + $0x64] ss:$16 sps:$4 sm:$0xff]  }
 0x359   :  { %2599 = vmatprep.subr.bf16.mxu1 %v9931_v23  ;;  %v10001_v23 = vld [vmem:[%s13700_s10 + $0x3a8] ss:$16 sps:$4 sm:$0xff]  }
 0x35b   :  { %2541 = vmatpush1.bf16.msra.mxu0 %v9926_v27  ;;  %v10006_v27 = vld [vmem:[%s13700_s10 + $0x3cc] ss:$16 sps:$4 sm:$0xff]  }
 0x35c   :  { %2600 = vmatpush1.bf16.msra.mxu1 %v9929_v36  ;;  %2542 = vmatprep.subr.bf16.mxu0 %v9934_v30  ;;  %v10028_v36 = vld [vmem:[%s13702_s12 + $0x60] ss:$16 sps:$4 sm:$0xff]   ;;  %v10036_v30 = vld [vmem:[%s13702_s12 + $0x84] ss:$16 sps:$4 sm:$0xff]  }
 0x35d   :  { %2601 = vmatprep.subr.bf16.mxu1 %v9937_v31  ;;  %v10004_v31 = vld [vmem:[%s13700_s10 + $0x3c8] ss:$16 sps:$4 sm:$0xff]  }
 0x35f   :  { %2543 = vmatpush1.bf16.msra.mxu0 %v9932_v32  ;;  %v10009_v32 = vld [vmem:[%s13700_s10 + $0x3ec] ss:$16 sps:$4 sm:$0xff]  }
 0x360   :  { %2602 = vmatpush1.bf16.msra.mxu1 %v9935_v33  ;;  %2544 = vmatprep.subr.bf16.mxu0 %v9940_v34  ;;  %v10034_v33 = vld [vmem:[%s13702_s12 + $0x80] ss:$16 sps:$4 sm:$0xff]   ;;  %v10042_v34 = vld [vmem:[%s13702_s12 + $0xa4] ss:$16 sps:$4 sm:$0xff]  }
 0x361   :  { %2614 = vmatprep.subr.bf16.mxu1 %v9943_v35  ;;  %v10007_v35 = vld [vmem:[%s13700_s10 + $0x3e8] ss:$16 sps:$4 sm:$0xff]  }
 0x363   :  { %2604 = vmatmul.mubr.bf16.vlgmr.msra.gmra.mrb[20].mxu1 %v11172_v57  ;;  %2545 = vmatpush1.bf16.msra.mxu0 %v9938_v61  ;;  %v9955_v57 = vld [vmem:[%s13700_s10 + $0x24c] ss:$16 sps:$4 sm:$0xff]  }
 0x364   :  { %2615 = vmatpush1.bf16.msra.mxu1 %v9941_v37  ;;  %2646 = vmatprep.mubr.bf16.mxu1 %v11181_v63  ;;  %v9953_v63 = vld [vmem:[%s13700_s10 + $0x248] ss:$16 sps:$4 sm:$0xff]   ;;  %v10015_v61 = vld [vmem:[%s13702_s12 + $0xc] ss:$16 sps:$4 sm:$0xff]   ;;  %v10040_v37 = vld [vmem:[%s13702_s12 + $0xa0] ss:$16 sps:$4 sm:$0xff]  }
 0x365   :  { %2546 = vmatprep.subr.bf16.mxu0 %v9946_v38  ;;  %2616 = vmatprep.subr.bf16.mxu1 %v9949_v39  ;;  %v10048_v38 = vld [vmem:[%s13702_s12 + $0xc4] ss:$16 sps:$4 sm:$0xff]   ;;  %v10013_v39 = vld [vmem:[%s13702_s12 + $0x8] ss:$16 sps:$4 sm:$0xff]  }
 0x367   :  { %2547 = vmatpush1.bf16.msra.mxu0 %v9944_v40  ;;  %v10021_v40 = vld [vmem:[%s13702_s12 + $0x2c] ss:$16 sps:$4 sm:$0xff]  }
 0x368   :  { %2617 = vmatpush1.bf16.msra.mxu1 %v9947_v41  ;;  %2548 = vmatprep.subr.bf16.mxu0 %v9952_v42  ;;  %v10046_v41 = vld [vmem:[%s13702_s12 + $0xc0] ss:$16 sps:$4 sm:$0xff]   ;;  %v10054_v42 = vld [vmem:[%s13702_s12 + $0xe4] ss:$16 sps:$4 sm:$0xff]  }
 0x369   :  { %2618 = vmatprep.subr.bf16.mxu1 %v9955_v57  ;;  %v10019_v57 = vld [vmem:[%s13702_s12 + $0x28] ss:$16 sps:$4 sm:$0xff]  }
 0x36b   :  { %2549 = vmatpush1.bf16.msra.mxu0 %v9950_v43  ;;  %v10027_v43 = vld [vmem:[%s13702_s12 + $0x4c] ss:$16 sps:$4 sm:$0xff]  }
 0x36c   :  { %2619 = vmatpush1.bf16.msra.mxu1 %v9953_v63  ;;  %2550 = vmatprep.subr.bf16.mxu0 %v9958_v44  ;;  %v10052_v63 = vld [vmem:[%s13702_s12 + $0xe0] ss:$16 sps:$4 sm:$0xff]   ;;  %v10025_v44 = vld [vmem:[%s13702_s12 + $0x48] ss:$16 sps:$4 sm:$0xff]  }
 0x36d   :  { %2620 = vmatprep.subr.bf16.mxu1 %v9961_v45  ;;  %v10033_v45 = vld [vmem:[%s13702_s12 + $0x6c] ss:$16 sps:$4 sm:$0xff]  }
 0x36f   :  { %2551 = vmatpush1.bf16.msra.mxu0 %v9956_v46  ;;  %v10058_v46 = vld [vmem:[%s13702_s12 + $0x100] ss:$16 sps:$4 sm:$0xff]  }
 0x370   :  { %2621 = vmatpush1.bf16.msra.mxu1 %v9959_v47  ;;  %2552 = vmatprep.subr.bf16.mxu0 %v9964_v48  ;;  %v10066_v47 = vld [vmem:[%s13702_s12 + $0x124] ss:$16 sps:$4 sm:$0xff]   ;;  %v10031_v48 = vld [vmem:[%s13702_s12 + $0x68] ss:$16 sps:$4 sm:$0xff]  }
 0x371   :  { %2622 = vmatprep.subr.bf16.mxu1 %v9967_v49  ;;  %v10064_v49 = vld [vmem:[%s13702_s12 + $0x120] ss:$16 sps:$4 sm:$0xff]  }
 0x373   :  { %2553 = vmatpush1.bf16.msra.mxu0 %v9962_v50  ;;  %v10039_v50 = vld [vmem:[%s13702_s12 + $0x8c] ss:$16 sps:$4 sm:$0xff]  }
 0x374   :  { %2623 = vmatpush1.bf16.msra.mxu1 %v9965_v51  ;;  %2554 = vmatprep.subr.bf16.mxu0 %v9970_v52  ;;  %v10072_v51 = vld [vmem:[%s13702_s12 + $0x144] ss:$16 sps:$4 sm:$0xff]   ;;  %v10037_v52 = vld [vmem:[%s13702_s12 + $0x88] ss:$16 sps:$4 sm:$0xff]  }
 0x375   :  { %2624 = vmatprep.subr.bf16.mxu1 %v9973_v53  ;;  %v10070_v53 = vld [vmem:[%s13702_s12 + $0x140] ss:$16 sps:$4 sm:$0xff]  }
 0x377   :  { %2555 = vmatpush1.bf16.msra.mxu0 %v9968_v54  ;;  %v10045_v54 = vld [vmem:[%s13702_s12 + $0xac] ss:$16 sps:$4 sm:$0xff]  }
 0x378   :  { %2625 = vmatpush1.bf16.msra.mxu1 %v9971_v55  ;;  %2556 = vmatprep.subr.bf16.mxu0 %v9976_v56  ;;  %v10078_v55 = vld [vmem:[%s13702_s12 + $0x164] ss:$16 sps:$4 sm:$0xff]   ;;  %v10043_v56 = vld [vmem:[%s13702_s12 + $0xa8] ss:$16 sps:$4 sm:$0xff]  }
 0x379   :  { %2626 = vmatprep.subr.bf16.mxu1 %v9979_v58  ;;  %v10076_v58 = vld [vmem:[%s13702_s12 + $0x160] ss:$16 sps:$4 sm:$0xff]  }
 0x37b   :  { %2557 = vmatpush1.bf16.msra.mxu0 %v9974_v60  ;;  %v10051_v60 = vld [vmem:[%s13702_s12 + $0xcc] ss:$16 sps:$4 sm:$0xff]  }
 0x37c   :  { %2627 = vmatpush1.bf16.msra.mxu1 %v9977_v62  ;;  %2558 = vmatprep.subr.bf16.mxu0 %v9982_v0  ;;  %v10084_v62 = vld [vmem:[%s13702_s12 + $0x184] ss:$16 sps:$4 sm:$0xff]   ;;  %v10049_v0 = vld [vmem:[%s13702_s12 + $0xc8] ss:$16 sps:$4 sm:$0xff]  }
 0x37d   :  { %2628 = vmatprep.subr.bf16.mxu1 %v9985_v1  ;;  %v10082_v1 = vld [vmem:[%s13702_s12 + $0x180] ss:$16 sps:$4 sm:$0xff]  }
 0x37f   :  { %2559 = vmatpush1.bf16.msra.mxu0 %v9980_v2  ;;  %v10057_v2 = vld [vmem:[%s13702_s12 + $0xec] ss:$16 sps:$4 sm:$0xff]  }
 0x380   :  { %2629 = vmatpush1.bf16.msra.mxu1 %v9983_v3  ;;  %3459 = vmatprep.subr.bf16.mxu0 %v10012_v12  ;;  %v10090_v3 = vld [vmem:[%s13702_s12 + $0x1a4] ss:$16 sps:$4 sm:$0xff]   ;;  %v10081_v12 = vld [vmem:[%s13702_s12 + $0x16c] ss:$16 sps:$4 sm:$0xff]  }
 0x381   :  { %2630 = vmatprep.subr.bf16.mxu1 %v9988_v4  ;;  %v10055_v4 = vld [vmem:[%s13702_s12 + $0xe8] ss:$16 sps:$4 sm:$0xff]  }
 0x382   :  { %2561 = vmatmul.mubr.bf16.vlgmr.msra.gmra.mrb[20].mxu0 %v11174_v59 }
 0x383   :  { %3460 = vmatpush1.bf16.msra.mxu0 %v10010_v11  ;;  %v10073_v11 = vld [vmem:[%s13702_s12 + $0x148] ss:$16 sps:$4 sm:$0xff]  }
 0x384   :  { %2631 = vmatpush1.bf16.msra.mxu1 %v9986_v5  ;;  %3461 = vmatprep.subr.bf16.mxu0 %v10018_v14  ;;  %v10088_v5 = vld [vmem:[%s13702_s12 + $0x1a0] ss:$16 sps:$4 sm:$0xff]   ;;  %v10087_v14 = vld [vmem:[%s13702_s12 + $0x18c] ss:$16 sps:$4 sm:$0xff]  }
 0x385   :  { %2632 = vmatprep.subr.bf16.mxu1 %v9991_v6  ;;  %v10063_v6 = vld [vmem:[%s13702_s12 + $0x10c] ss:$16 sps:$4 sm:$0xff]  }
 0x387   :  { %3462 = vmatpush1.bf16.msra.mxu0 %v10016_v15  ;;  %v11872_v15 = vld [vmem:[%s13703_s9] sm:$0x1f] }
 0x388   :  { %2633 = vmatpush1.bf16.msra.mxu1 %v9989_v7  ;;  %3463 = vmatprep.subr.bf16.mxu0 %v10024_v17  ;;  %v10061_v7 = vld [vmem:[%s13702_s12 + $0x108] ss:$16 sps:$4 sm:$0xff]   ;;  %v10093_v17 = vld [vmem:[%s13702_s12 + $0x1ac] ss:$16 sps:$4 sm:$0xff]  }
 0x389   :  { %2634 = vmatprep.subr.bf16.mxu1 %v9994_v8  ;;  %v10069_v8 = vld [vmem:[%s13702_s12 + $0x12c] ss:$16 sps:$4 sm:$0xff]  }
 0x38b   :  { %3464 = vmatpush1.bf16.msra.mxu0 %v10022_v20  ;;  %v1248_v20 = vrot.slane %v11872_v15, %v11163_v28 }
 0x38c   :  { %2635 = vmatpush1.bf16.msra.mxu1 %v9992_v9  ;;  %3465 = vmatprep.subr.bf16.mxu0 %v10030_v21  ;;  %v10067_v9 = vld [vmem:[%s13702_s12 + $0x128] ss:$16 sps:$4 sm:$0xff]   ;;  %v1256_v21 = vrot.slane %v11872_v15, %v11166_v29 }
 0x38d   :  { %2636 = vmatprep.subr.bf16.mxu1 %v9997_v10  ;;  %v10075_v10 = vld [vmem:[%s13702_s12 + $0x14c] ss:$16 sps:$4 sm:$0xff]  }
 0x38f   :  { %3466 = vmatpush1.bf16.msra.mxu0 %v10028_v36 }
 0x390   :  { %2637 = vmatpush1.bf16.msra.mxu1 %v9995_v13  ;;  %3467 = vmatprep.subr.bf16.mxu0 %v10036_v30  ;;  %v10079_v13 = vld [vmem:[%s13702_s12 + $0x168] ss:$16 sps:$4 sm:$0xff]  }
 0x391   :  { %2638 = vmatprep.subr.bf16.mxu1 %v10000_v16  ;;  %v10085_v16 = vld [vmem:[%s13702_s12 + $0x188] ss:$16 sps:$4 sm:$0xff]  }
 0x393   :  { %3468 = vmatpush1.bf16.msra.mxu0 %v10034_v33 }
 0x394   :  { %2639 = vmatpush1.bf16.msra.mxu1 %v9998_v18  ;;  %3469 = vmatprep.subr.bf16.mxu0 %v10042_v34  ;;  %v1244_v18 = vrot.slane %v11872_v15, %v11154_v25  ;;  %v10096_v34 = vld [vmem:[%s13702_s12 + $0x1c4] ss:$16 sps:$4 sm:$0xff]  }
 0x395   :  { %2640 = vmatprep.subr.bf16.mxu1 %v10003_v19  ;;  %v1252_v19 = vrot.slane %v11872_v15, %v11157_v26 }
 0x397   :  { %3470 = vmatpush1.bf16.msra.mxu0 %v10040_v37 }
 0x398   :  { %2641 = vmatpush1.bf16.msra.mxu1 %v10001_v23  ;;  %3471 = vmatprep.subr.bf16.mxu0 %v10048_v38  ;;  %v10091_v23 = vld [vmem:[%s13702_s12 + $0x1a8] ss:$16 sps:$4 sm:$0xff]  }
 0x399   :  { %2642 = vmatprep.subr.bf16.mxu1 %v10006_v27 }
 0x39b   :  { %3472 = vmatpush1.bf16.msra.mxu0 %v10046_v41  ;;  %v10097_v41 = vld [vmem:[%s13702_s12 + $0x1c8] ss:$16 sps:$4 sm:$0xff]  }
 0x39c   :  { %2643 = vmatpush1.bf16.msra.mxu1 %v10004_v31  ;;  %3473 = vmatprep.subr.bf16.mxu0 %v10054_v42 }
 0x39d   :  { %2644 = vmatprep.subr.bf16.mxu1 %v10009_v32 }
 0x39f   :  { %3474 = vmatpush1.bf16.msra.mxu0 %v10052_v63 }
 0x3a0   :  { %2645 = vmatpush1.bf16.msra.mxu1 %v10007_v35  ;;  %v10099_v35 = vld [vmem:[%s13702_s12 + $0x1cc] ss:$16 sps:$4 sm:$0xff]  }
 0x3a1   :  { %3545 = vmatprep.subr.bf16.mxu1 %v10015_v61 }
 0x3a3   :  { %2647 = vmatmul.mubr.bf16.vlgmr.msra.gmra.mrb[20].mxu1 %v11174_v59  ;;  %v10060_v59 = vld [vmem:[%s13702_s12 + $0x104] ss:$16 sps:$4 sm:$0xff]  }
 0x3a4   :  { %3546 = vmatpush1.bf16.msra.mxu1 %v10013_v39  ;;  %3475 = vmatprep.subr.bf16.mxu0 %v10060_v59 }
 0x3a5   :  { %3547 = vmatprep.subr.bf16.mxu1 %v10021_v40  ;;  %3476 = vmatpush1.bf16.msra.mxu0 %v10058_v46  ;;  %v10094_v40 = vld [vmem:[%s13702_s12 + $0x1c0] ss:$16 sps:$4 sm:$0xff]   ;;  %v10105_v46 = vld [vmem:[%s13702_s12 + $0x1ec] ss:$16 sps:$4 sm:$0xff]  }
 0x3a6   :  { %3477 = vmatprep.subr.bf16.mxu0 %v10066_v47  ;;  %v10100_v47 = vld [vmem:[%s13702_s12 + $0x1e0] ss:$16 sps:$4 sm:$0xff]  }
 0x3a8   :  { %3548 = vmatpush1.bf16.msra.mxu1 %v10019_v57 }
 0x3a9   :  { %3549 = vmatprep.subr.bf16.mxu1 %v10027_v43  ;;  %3478 = vmatpush1.bf16.msra.mxu0 %v10064_v49  ;;  %v10108_v49 = vld [vmem:[%s13702_s12 + $0x204] ss:$16 sps:$4 sm:$0xff]  }
 0x3aa   :  { %3479 = vmatprep.subr.bf16.mxu0 %v10072_v51 }
 0x3ac   :  { %3550 = vmatpush1.bf16.msra.mxu1 %v10025_v44 }
 0x3ad   :  { %3551 = vmatprep.subr.bf16.mxu1 %v10033_v45  ;;  %3480 = vmatpush1.bf16.msra.mxu0 %v10070_v53  ;;  %v10102_v45 = vld [vmem:[%s13702_s12 + $0x1e4] ss:$16 sps:$4 sm:$0xff]  }
 0x3ae   :  { %3481 = vmatprep.subr.bf16.mxu0 %v10078_v55 }
 0x3b0   :  { %3552 = vmatpush1.bf16.msra.mxu1 %v10031_v48  ;;  %v10103_v48 = vld [vmem:[%s13702_s12 + $0x1e8] ss:$16 sps:$4 sm:$0xff]  }
 0x3b1   :  { %3553 = vmatprep.subr.bf16.mxu1 %v10039_v50  ;;  %3482 = vmatpush1.bf16.msra.mxu0 %v10076_v58  ;;  %v10111_v50 = vld [vmem:[%s13702_s12 + $0x20c] ss:$16 sps:$4 sm:$0xff]  }
 0x3b2   :  { %3483 = vmatprep.subr.bf16.mxu0 %v10084_v62  ;;  %v1259_v62 = vsub.s32 4, %v11151_v24 }
 0x3b4   :  { %3554 = vmatpush1.bf16.msra.mxu1 %v10037_v52 }
 0x3b5   :  { %3555 = vmatprep.subr.bf16.mxu1 %v10045_v54  ;;  %3484 = vmatpush1.bf16.msra.mxu0 %v10082_v1 }
 0x3b6   :  { %3485 = vmatprep.subr.bf16.mxu0 %v10090_v3  ;;  %v10670_v3 = vld [vmem:[%s13731_s28] sm:$0xff] }
 0x3b8   :  { %3556 = vmatpush1.bf16.msra.mxu1 %v10043_v56 }
 0x3b9   :  { %3557 = vmatprep.subr.bf16.mxu1 %v10051_v60  ;;  %3486 = vmatpush1.bf16.msra.mxu0 %v10088_v5 }
 0x3ba   :  { %3487 = vmatprep.subr.bf16.mxu0 %v10096_v34  ;;  %v10674_v34 = vld [vmem:[%s13731_s28 + $0x20] sm:$0xff] }
 0x3bc   :  { %3558 = vmatpush1.bf16.msra.mxu1 %v10049_v0 }
 0x3bd   :  { %3559 = vmatprep.subr.bf16.mxu1 %v10057_v2  ;;  %3488 = vmatpush1.bf16.msra.mxu0 %v10094_v40  ;;  %v1260_v2 = vrot.slane %v11872_v15, %v1259_v62  ;;  %v10673_v15 = vld [vmem:[%s13731_s28 + $0x18] sm:$0xff] }
 0x3be   :  { %3489 = vmatprep.subr.bf16.mxu0 %v10102_v45  ;;  %v10123_v62 = vld [vmem:[%s13702_s12 + $0x24c] ss:$16 sps:$4 sm:$0xff]  }
 0x3c0   :  { %3560 = vmatpush1.bf16.msra.mxu1 %v10055_v4 }
 0x3c1   :  { %3561 = vmatprep.subr.bf16.mxu1 %v10063_v6  ;;  %3490 = vmatpush1.bf16.msra.mxu0 %v10100_v47 }
 0x3c2   :  { %3502 = vmatprep.subr.bf16.mxu0 %v10108_v49 }
 0x3c4   :  { %3562 = vmatpush1.bf16.msra.mxu1 %v10061_v7  ;;  %v10671_v7 = vld [vmem:[%s13731_s28 + $0x8] sm:$0xff] }
 0x3c5   :  { %3563 = vmatprep.subr.bf16.mxu1 %v10069_v8 }
 0x3c8   :  { %3564 = vmatpush1.bf16.msra.mxu1 %v10067_v9  ;;  %v10672_v9 = vld [vmem:[%s13731_s28 + $0x10] sm:$0xff] }
 0x3c9   :  { %3565 = vmatprep.subr.bf16.mxu1 %v10075_v10 }
 0x3cc   :  { %3566 = vmatpush1.bf16.msra.mxu1 %v10073_v11 }
 0x3cd   :  { %3567 = vmatprep.subr.bf16.mxu1 %v10081_v12 }
 0x3d0   :  { %3568 = vmatpush1.bf16.msra.mxu1 %v10079_v13 }
 0x3d1   :  { %3569 = vmatprep.subr.bf16.mxu1 %v10087_v14 }
 0x3d4   :  { %3570 = vmatpush1.bf16.msra.mxu1 %v10085_v16 }
 0x3d5   :  { %v1508_v27 = vpop.f32.mrb[12].mxu1  ;;  %v1551_v36 = vpop.f32.mrb[16].mxu0  ;;  %3571 = vmatprep.subr.bf16.mxu1 %v10093_v17 }
 0x3d6   :  { %v1509_v30 = vadd.f32 %v1508_v27, %v1244_v18  ;;  %v1552_v31 = vadd.f32 %v1551_v36, %v1252_v19  ;;  %v1510_v32 = vpop.f32.mrb[13].mxu1  ;;  %v1553_v33 = vpop.f32.mrb[17].mxu0 }
 0x3d7   :  { %v1511_v61 = vadd.f32 %v1510_v32, %v1248_v20  ;;  %v1554_v37 = vadd.f32 %v1553_v33, %v1256_v21  ;;  %v1512_v38 = vpop.f32.mrb[14].mxu1  ;;  %v1555_v39 = vpop.f32.mrb[18].mxu0 }
 0x3d8   :  { %v8315_v42 = vmul.f32 -1.442695, %v1509_v30  ;;  %v8317_v57 = vmul.f32 -1.442695, %v1552_v31  ;;  %v1514_v43 = vpop.f32.mrb[15].mxu1  ;;  %v1557_v63 = vpop.f32.mrb[19].mxu0  ;;  %3572 = vmatpush1.bf16.msra.mxu1 %v10091_v23 }
 0x3d9   :  { %v8316_v59 = vmul.f32 -1.442695, %v1511_v61  ;;  %v8318_v44 = vmul.f32 -1.442695, %v1554_v37  ;;  %3573 = vmatprep.subr.bf16.mxu1 %v10099_v35  ;;  %v11943_v38 = vld [vmem:[%s13705_s11] sm:$0xf] }
 0x3da   :  { %10646 = vpow2.f32 %v8315_v42  ;;  %v1828_v39 = vrot.slane %v11943_v38, %v11154_v25  ;;  %v1832_v40 = vrot.slane %v11943_v38, %v11163_v28 }
 0x3db   :  { %10648 = vpow2.f32 %v8317_v57 }
 0x3dc   :  { %10650 = vpow2.f32 %v8316_v59  ;;  %3574 = vmatpush1.bf16.msra.mxu1 %v10097_v41 }
 0x3dd   :  { %10652 = vpow2.f32 %v8318_v44  ;;  %3575 = vmatprep.subr.bf16.mxu1 %v10105_v46 }
 0x3e0   :  { %3576 = vmatpush1.bf16.msra.mxu1 %v10103_v48 }
 0x3e1   :  { %3588 = vmatprep.subr.bf16.mxu1 %v10111_v50 }
 0x3e4   :  { %v10647_v51 = vpop.eup %10646 }
 0x3e5   :  { %v10649_v52 = vpop.eup %10648  ;;  %v1631_v53 = vadd.f32 1.0, %v10647_v51  ;;  %v10106_v51 = vld [vmem:[%s13702_s12 + $0x200] ss:$16 sps:$4 sm:$0xff]  }
 0x3e6   :  { %v10651_v54 = vpop.eup %10650  ;;  %v1633_v55 = vadd.f32 1.0, %v10649_v52  ;;  %v10109_v52 = vld [vmem:[%s13702_s12 + $0x208] ss:$16 sps:$4 sm:$0xff]  }
 0x3e7   :  { %v10653_v56 = vpop.eup %10652  ;;  %10654 = vrcp.f32 %v1631_v53  ;;  %v1632_v58 = vadd.f32 1.0, %v10651_v54  ;;  %v10114_v54 = vld [vmem:[%s13702_s12 + $0x224] ss:$16 sps:$4 sm:$0xff]  }
 0x3e8   :  { %10656 = vrcp.f32 %v1633_v55  ;;  %v1634_v60 = vadd.f32 1.0, %v10653_v56  ;;  %v10117_v55 = vld [vmem:[%s13702_s12 + $0x22c] ss:$16 sps:$4 sm:$0xff]   ;;  %v10112_v56 = vld [vmem:[%s13702_s12 + $0x220] ss:$16 sps:$4 sm:$0xff]  }
 0x3e9   :  { %10658 = vrcp.f32 %v1632_v58  ;;  %v10115_v58 = vld [vmem:[%s13702_s12 + $0x228] ss:$16 sps:$4 sm:$0xff]  }
 0x3ea   :  { %10660 = vrcp.f32 %v1634_v60  ;;  %v10120_v60 = vld [vmem:[%s13702_s12 + $0x244] ss:$16 sps:$4 sm:$0xff]  }
 0x3f1   :  { %v10655_v0 = vpop.eup %10654 }
 0x3f2   :  { %v10657_v1 = vpop.eup %10656  ;;  %v1661_v4 = vsub.f32 %v10670_v3, %v10655_v0  ;;  %v10118_v0 = vld [vmem:[%s13702_s12 + $0x240] ss:$16 sps:$4 sm:$0xff]   ;;  %v10129_v3 = vld [vmem:[%s13702_s12 + $0x26c] ss:$16 sps:$4 sm:$0xff]  }
 0x3f3   :  { %v10659_v5 = vpop.eup %10658  ;;  %v1663_v10 = vsub.f32 %v10672_v9, %v10657_v1  ;;  %v10121_v1 = vld [vmem:[%s13702_s12 + $0x248] ss:$16 sps:$4 sm:$0xff]  }
 0x3f4   :  { %v10661_v6 = vpop.eup %10660  ;;  %v1662_v8 = vsub.f32 %v10671_v7, %v10659_v5  ;;  %v1671_v11 = vmul.f32 %v1661_v4, %v1661_v4  ;;  %v10124_v4 = vld [vmem:[%s13702_s12 + $0x260] ss:$16 sps:$4 sm:$0xff]   ;;  %v10127_v5 = vld [vmem:[%s13702_s12 + $0x268] ss:$16 sps:$4 sm:$0xff]   ;;  %v10135_v7 = vld [vmem:[%s13702_s12 + $0x28c] ss:$16 sps:$4 sm:$0xff]  }
 0x3f5   :  { %v1594_v12 = vpop.f32.mrb[16].mxu1  ;;  %v1664_v16 = vsub.f32 %v10673_v15, %v10661_v6  ;;  %v1673_v21 = vmul.f32 %v1663_v10, %v1663_v10  ;;  %v10132_v6 = vld [vmem:[%s13702_s12 + $0x284] ss:$16 sps:$4 sm:$0xff]   ;;  %v10133_v9 = vld [vmem:[%s13702_s12 + $0x288] ss:$16 sps:$4 sm:$0xff]  }
 0x3f6   :  { %v1595_v13 = vadd.f32 %v1594_v12, %v1260_v2  ;;  %v9012_v14 = vpop.f32.mrb[17].mxu1  ;;  %v1672_v17 = vmul.f32 %v1662_v8, %v1662_v8  ;;  %v10126_v2 = vld [vmem:[%s13702_s12 + $0x264] ss:$16 sps:$4 sm:$0xff]   ;;  %v10130_v8 = vld [vmem:[%s13702_s12 + $0x280] ss:$16 sps:$4 sm:$0xff]  }
 0x3f7   :  { %v1597_v18 = vpop.f32.mrb[18].mxu1  ;;  %v1674_v27 = vmul.f32 %v1664_v16, %v1664_v16  ;;  %v10138_v10 = vld [vmem:[%s13702_s12 + $0x2a4] ss:$16 sps:$4 sm:$0xff]   ;;  %v10136_v12 = vld [vmem:[%s13702_s12 + $0x2a0] ss:$16 sps:$4 sm:$0xff]   ;;  %v1836_v16 = vrot.slane %v11943_v38, %v11157_v26 }
 0x3f8   :  { %v8319_v19 = vmul.f32 -1.442695, %v1595_v13  ;;  %v9013_v20 = vpop.f32.mrb[19].mxu1  ;;  %v1681_v23 = vadd.f32 %v1672_v17, %v1671_v11  ;;  %v10141_v11 = vld [vmem:[%s13702_s12 + $0x2ac] ss:$16 sps:$4 sm:$0xff]  }
 0x3f9   :  { %v10139_v13 = vld [vmem:[%s13702_s12 + $0x2a8] ss:$16 sps:$4 sm:$0xff]   ;;  %v10144_v14 = vld [vmem:[%s13702_s12 + $0x2c4] ss:$16 sps:$4 sm:$0xff]   ;;  %v10147_v15 = vld [vmem:[%s13702_s12 + $0x2cc] ss:$16 sps:$4 sm:$0xff]  }
 0x3fa   :  { %10662 = vpow2.f32 %v8319_v19  ;;  %v1682_v36 = vadd.f32 %v1681_v23, %v1673_v21  ;;  %v10142_v17 = vld [vmem:[%s13702_s12 + $0x2c0] ss:$16 sps:$4 sm:$0xff]   ;;  %v10145_v18 = vld [vmem:[%s13702_s12 + $0x2c8] ss:$16 sps:$4 sm:$0xff]   ;;  %v1840_v19 = vrot.slane %v11943_v38, %v11166_v29  ;;  %v10150_v20 = vld [vmem:[%s13702_s12 + $0x2e4] ss:$16 sps:$4 sm:$0xff]  }
 0x3fb   :  { %v10153_v21 = vld [vmem:[%s13702_s12 + $0x2ec] ss:$16 sps:$4 sm:$0xff]  }
 0x3fc   :  { %v1683_v30 = vadd.f32 %v1682_v36, %v1674_v27 }
 0x404   :  { %v10663_v31 = vpop.eup %10662 }
 0x405   :  { %v1635_v32 = vadd.f32 1.0, %v10663_v31 }
 0x407   :  { %10664 = vrcp.f32 %v1635_v32 }
 0x411   :  { %v10665_v33 = vpop.eup %10664 }
 0x412   :  { %v1665_v35 = vsub.f32 %v10674_v34, %v10665_v33  ;;  %v10151_v33 = vld [vmem:[%s13702_s12 + $0x2e8] ss:$16 sps:$4 sm:$0xff]  }
 0x414   :  { %v1675_v61 = vmul.f32 %v1665_v35, %v1665_v35 }
 0x416   :  { %v11938_v37 = vadd.f32 %v1683_v30, %v1675_v61  ;;  %v10148_v30 = vld [vmem:[%s13702_s12 + $0x2e0] ss:$16 sps:$4 sm:$0xff]   ;;  %v10156_v61 = vld [vmem:[%s13702_s12 + $0x304] ss:$16 sps:$4 sm:$0xff]  }
 0x418   :  { %13740 = vst [vmem:[#allocation7_spill] sm:$0xff] %v11938_v37 }
 0x455   :  { %v2562_v41 = vpop.f32.mrb[20].mxu0 }
 0x456   :  { %v9014_v42 = vadd.f32 %v2562_v41, %v1828_v39  ;;  %v2564_v57 = vpop.f32.mrb[21].mxu0 }
 0x457   :  { %v9015_v43 = vadd.f32 %v2564_v57, %v1832_v40  ;;  %v2566_v63 = vpop.f32.mrb[22].mxu0  ;;  %v10157_v57 = vld [vmem:[%s13702_s12 + $0x308] ss:$16 sps:$4 sm:$0xff]  }
 0x458   :  { %v9016_v59 = vadd.f32 %v2566_v63, %v1828_v39  ;;  %v2568_v44 = vpop.f32.mrb[23].mxu0  ;;  %v2657_v46 = vmax.f32 %v9014_v42, 0.0  ;;  %v10159_v39 = vld [vmem:[%s13702_s12 + $0x30c] ss:$16 sps:$4 sm:$0xff]   ;;  %v10154_v42 = vld [vmem:[%s13702_s12 + $0x300] ss:$16 sps:$4 sm:$0xff]  }
 0x459   :  { %v9017_v45 = vadd.f32 %v2568_v44, %v1832_v40  ;;  %v2658_v48 = vmax.f32 %v9015_v43, 0.0  ;;  %v10165_v44 = vld [vmem:[%s13702_s12 + $0x32c] ss:$16 sps:$4 sm:$0xff]  }
 0x45a   :  { %v2661_v47 = vmax.f32 %v9016_v59, 0.0  ;;  %v10162_v59 = vld [vmem:[%s13702_s12 + $0x324] ss:$16 sps:$4 sm:$0xff]  }
 0x45b   :  { %v2662_v49 = vmax.f32 %v9017_v45, 0.0 }
 0x45c   :  { %v2665_v50 = vpack.c.bf16 %v2661_v47, %v2657_v46  ;;  %v10160_v47 = vld [vmem:[%s13702_s12 + $0x320] ss:$16 sps:$4 sm:$0xff]  }
 0x45d   :  { %v2666_v53 = vpack.c.bf16 %v2662_v49, %v2658_v48  ;;  %v10163_v48 = vld [vmem:[%s13702_s12 + $0x328] ss:$16 sps:$4 sm:$0xff]   ;;  %v10168_v49 = vld [vmem:[%s13702_s12 + $0x344] ss:$16 sps:$4 sm:$0xff]  }
 0x45f   :  { %3491 = vmatprep.mubr.bf16.mxu0 %v2666_v53  ;;  %3577 = vmatprep.mubr.bf16.mxu1 %v2666_v53  ;;  %v10174_v53 = vld [vmem:[%s13702_s12 + $0x364] ss:$16 sps:$4 sm:$0xff]  }
 0x460   :  { %3492 = vmatmul.mubr.bf16.vlgmr.msra.gmra.mrb[24].mxu0 %v2665_v50  ;;  %3578 = vmatmul.mubr.bf16.vlgmr.msra.gmra.mrb[24].mxu1 %v2665_v50  ;;  %v10171_v50 = vld [vmem:[%s13702_s12 + $0x34c] ss:$16 sps:$4 sm:$0xff]  }
 0x461   :  { %3503 = vmatpush1.bf16.msra.mxu0 %v10106_v51  ;;  %3589 = vmatpush1.bf16.msra.mxu1 %v10109_v52  ;;  %v10166_v51 = vld [vmem:[%s13702_s12 + $0x340] ss:$16 sps:$4 sm:$0xff]   ;;  %v10169_v52 = vld [vmem:[%s13702_s12 + $0x348] ss:$16 sps:$4 sm:$0xff]  }
 0x462   :  { %3504 = vmatprep.subr.bf16.mxu0 %v10114_v54  ;;  %3590 = vmatprep.subr.bf16.mxu1 %v10117_v55  ;;  %v10177_v54 = vld [vmem:[%s13702_s12 + $0x36c] ss:$16 sps:$4 sm:$0xff]   ;;  %v10172_v55 = vld [vmem:[%s13702_s12 + $0x360] ss:$16 sps:$4 sm:$0xff]  }
 0x465   :  { %3505 = vmatpush1.bf16.msra.mxu0 %v10112_v56  ;;  %3591 = vmatpush1.bf16.msra.mxu1 %v10115_v58  ;;  %v10175_v56 = vld [vmem:[%s13702_s12 + $0x368] ss:$16 sps:$4 sm:$0xff]   ;;  %v10180_v58 = vld [vmem:[%s13702_s12 + $0x384] ss:$16 sps:$4 sm:$0xff]  }
 0x466   :  { %3506 = vmatprep.subr.bf16.mxu0 %v10120_v60  ;;  %3592 = vmatprep.subr.bf16.mxu1 %v10123_v62  ;;  %v10183_v60 = vld [vmem:[%s13702_s12 + $0x38c] ss:$16 sps:$4 sm:$0xff]   ;;  %v10178_v62 = vld [vmem:[%s13702_s12 + $0x380] ss:$16 sps:$4 sm:$0xff]  }
 0x469   :  { %3507 = vmatpush1.bf16.msra.mxu0 %v10118_v0  ;;  %3593 = vmatpush1.bf16.msra.mxu1 %v10121_v1  ;;  %v10181_v0 = vld [vmem:[%s13702_s12 + $0x388] ss:$16 sps:$4 sm:$0xff]   ;;  %v10186_v1 = vld [vmem:[%s13702_s12 + $0x3a4] ss:$16 sps:$4 sm:$0xff]  }
 0x46a   :  { %3508 = vmatprep.subr.bf16.mxu0 %v10126_v2  ;;  %3594 = vmatprep.subr.bf16.mxu1 %v10129_v3  ;;  %v10189_v2 = vld [vmem:[%s13702_s12 + $0x3ac] ss:$16 sps:$4 sm:$0xff]   ;;  %v10184_v3 = vld [vmem:[%s13702_s12 + $0x3a0] ss:$16 sps:$4 sm:$0xff]  }
 0x46d   :  { %3509 = vmatpush1.bf16.msra.mxu0 %v10124_v4  ;;  %3595 = vmatpush1.bf16.msra.mxu1 %v10127_v5  ;;  %v10187_v4 = vld [vmem:[%s13702_s12 + $0x3a8] ss:$16 sps:$4 sm:$0xff]   ;;  %v10192_v5 = vld [vmem:[%s13702_s12 + $0x3c4] ss:$16 sps:$4 sm:$0xff]  }
 0x46e   :  { %3510 = vmatprep.subr.bf16.mxu0 %v10132_v6  ;;  %3596 = vmatprep.subr.bf16.mxu1 %v10135_v7  ;;  %v10195_v6 = vld [vmem:[%s13702_s12 + $0x3cc] ss:$16 sps:$4 sm:$0xff]   ;;  %v10190_v7 = vld [vmem:[%s13702_s12 + $0x3c0] ss:$16 sps:$4 sm:$0xff]  }
 0x471   :  { %3511 = vmatpush1.bf16.msra.mxu0 %v10130_v8  ;;  %3597 = vmatpush1.bf16.msra.mxu1 %v10133_v9  ;;  %v10193_v8 = vld [vmem:[%s13702_s12 + $0x3c8] ss:$16 sps:$4 sm:$0xff]   ;;  %v10198_v9 = vld [vmem:[%s13702_s12 + $0x3e4] ss:$16 sps:$4 sm:$0xff]  }
 0x472   :  { %3512 = vmatprep.subr.bf16.mxu0 %v10138_v10  ;;  %3598 = vmatprep.subr.bf16.mxu1 %v10141_v11  ;;  %v10201_v10 = vld [vmem:[%s13702_s12 + $0x3ec] ss:$16 sps:$4 sm:$0xff]   ;;  %v10196_v11 = vld [vmem:[%s13702_s12 + $0x3e0] ss:$16 sps:$4 sm:$0xff]  }
 0x475   :  { %3513 = vmatpush1.bf16.msra.mxu0 %v10136_v12  ;;  %3599 = vmatpush1.bf16.msra.mxu1 %v10139_v13  ;;  %v10199_v12 = vld [vmem:[%s13702_s12 + $0x3e8] ss:$16 sps:$4 sm:$0xff]   ;;  %v10204_v13 = vld [vmem:[%s13704_s14 + $0x4] ss:$16 sps:$4 sm:$0xff]  }
 0x476   :  { %v2648_v23 = vpop.f32.mrb[20].mxu1  ;;  %3514 = vmatprep.subr.bf16.mxu0 %v10144_v14  ;;  %3600 = vmatprep.subr.bf16.mxu1 %v10147_v15  ;;  %v10207_v14 = vld [vmem:[%s13704_s14 + $0xc] ss:$16 sps:$4 sm:$0xff]   ;;  %v10202_v15 = vld [vmem:[%s13704_s14] ss:$16 sps:$4 sm:$0xff]  }
 0x477   :  { %v9018_v27 = vadd.f32 %v2648_v23, %v1836_v16  ;;  %v2650_v36 = vpop.f32.mrb[21].mxu1  ;;  %v10216_v23 = vld [vmem:[%s13704_s14 + $0x44] ss:$16 sps:$4 sm:$0xff]  }
 0x478   :  { %v9019_v31 = vadd.f32 %v2650_v36, %v1840_v19  ;;  %v2652_v32 = vpop.f32.mrb[22].mxu1  ;;  %v10214_v36 = vld [vmem:[%s13704_s14 + $0x40] ss:$16 sps:$4 sm:$0xff]  }
 0x479   :  { %v9020_v34 = vadd.f32 %v2652_v32, %v1836_v16  ;;  %v2654_v35 = vpop.f32.mrb[23].mxu1  ;;  %3515 = vmatpush1.bf16.msra.mxu0 %v10142_v17  ;;  %3601 = vmatpush1.bf16.msra.mxu1 %v10145_v18  ;;  %v2659_v40 = vmax.f32 %v9018_v27, 0.0  ;;  %v10205_v16 = vld [vmem:[%s13704_s14 + $0x8] ss:$16 sps:$4 sm:$0xff]   ;;  %v10210_v17 = vld [vmem:[%s13704_s14 + $0x24] ss:$16 sps:$4 sm:$0xff]  }
 0x47a   :  { %v9021_v38 = vadd.f32 %v2654_v35, %v1840_v19  ;;  %3516 = vmatprep.subr.bf16.mxu0 %v10150_v20  ;;  %3602 = vmatprep.subr.bf16.mxu1 %v10153_v21  ;;  %v2660_v43 = vmax.f32 %v9019_v31, 0.0  ;;  %v10213_v18 = vld [vmem:[%s13704_s14 + $0x2c] ss:$16 sps:$4 sm:$0xff]   ;;  %v10300_v19 = vld [vmem:[%s13706_s1 + $0x4] ss:$12 sps:$4 sm:$0xff]  }
 0x47b   :  { %v2663_v41 = vmax.f32 %v9020_v34, 0.0  ;;  %v10208_v20 = vld [vmem:[%s13704_s14 + $0x20] ss:$16 sps:$4 sm:$0xff]   ;;  %v10211_v21 = vld [vmem:[%s13704_s14 + $0x28] ss:$16 sps:$4 sm:$0xff]  }
 0x47c   :  { %v2664_v63 = vmax.f32 %v9021_v38, 0.0  ;;  %v10219_v27 = vld [vmem:[%s13704_s14 + $0x4c] ss:$16 sps:$4 sm:$0xff]   ;;  %v10222_v31 = vld [vmem:[%s13704_s14 + $0x64] ss:$16 sps:$4 sm:$0xff]  }
 0x47d   :  { %v12061_v45 = vpack.c.bf16 %v2663_v41, %v2659_v40  ;;  %3517 = vmatpush1.bf16.msra.mxu0 %v10148_v30  ;;  %3603 = vmatpush1.bf16.msra.mxu1 %v10151_v33  ;;  %v10217_v30 = vld [vmem:[%s13704_s14 + $0x48] ss:$16 sps:$4 sm:$0xff]   ;;  %v10225_v32 = vld [vmem:[%s13704_s14 + $0x6c] ss:$16 sps:$4 sm:$0xff]   ;;  %v10220_v33 = vld [vmem:[%s13704_s14 + $0x60] ss:$16 sps:$4 sm:$0xff]  }
 0x47e   :  { %v2668_v46 = vpack.c.bf16 %v2664_v63, %v2660_v43  ;;  %3518 = vmatprep.subr.bf16.mxu0 %v10156_v61  ;;  %3604 = vmatprep.subr.bf16.mxu1 %v10159_v39  ;;  %v10223_v34 = vld [vmem:[%s13704_s14 + $0x68] ss:$16 sps:$4 sm:$0xff]   ;;  %v10228_v35 = vld [vmem:[%s13704_s14 + $0x84] ss:$16 sps:$4 sm:$0xff]   ;;  %v10231_v61 = vld [vmem:[%s13704_s14 + $0x8c] ss:$16 sps:$4 sm:$0xff]  }
 0x47f   :  { %v10226_v38 = vld [vmem:[%s13704_s14 + $0x80] ss:$16 sps:$4 sm:$0xff]   ;;  %v10229_v39 = vld [vmem:[%s13704_s14 + $0x88] ss:$16 sps:$4 sm:$0xff]   ;;  %v10234_v40 = vld [vmem:[%s13704_s14 + $0xa4] ss:$16 sps:$4 sm:$0xff]  }
 0x480   :  { %3534 = vmatprep.mubr.bf16.mxu0 %v2668_v46  ;;  %3620 = vmatprep.mubr.bf16.mxu1 %v2668_v46  ;;  %v10237_v41 = vld [vmem:[%s13704_s14 + $0xac] ss:$16 sps:$4 sm:$0xff]   ;;  %v10240_v43 = vld [vmem:[%s13704_s14 + $0xc4] ss:$16 sps:$4 sm:$0xff]  }
 0x481   :  { %3519 = vmatpush1.bf16.msra.mxu0 %v10154_v42  ;;  %3605 = vmatpush1.bf16.msra.mxu1 %v10157_v57  ;;  %v10232_v42 = vld [vmem:[%s13704_s14 + $0xa0] ss:$16 sps:$4 sm:$0xff]   ;;  %v10235_v57 = vld [vmem:[%s13704_s14 + $0xa8] ss:$16 sps:$4 sm:$0xff]   ;;  %v10243_v63 = vld [vmem:[%s13704_s14 + $0xcc] ss:$16 sps:$4 sm:$0xff]  }
 0x482   :  { %3520 = vmatprep.subr.bf16.mxu0 %v10162_v59  ;;  %3606 = vmatprep.subr.bf16.mxu1 %v10165_v44  ;;  %v10238_v59 = vld [vmem:[%s13704_s14 + $0xc0] ss:$16 sps:$4 sm:$0xff]   ;;  %v10241_v44 = vld [vmem:[%s13704_s14 + $0xc8] ss:$16 sps:$4 sm:$0xff]   ;;  %v10249_v46 = vld [vmem:[%s13704_s14 + $0xec] ss:$16 sps:$4 sm:$0xff]  }
 0x485   :  { %3521 = vmatpush1.bf16.msra.mxu0 %v10160_v47  ;;  %3607 = vmatpush1.bf16.msra.mxu1 %v10163_v48  ;;  %v10244_v47 = vld [vmem:[%s13704_s14 + $0xe0] ss:$16 sps:$4 sm:$0xff]   ;;  %v10247_v48 = vld [vmem:[%s13704_s14 + $0xe8] ss:$16 sps:$4 sm:$0xff]  }
 0x486   :  { %3522 = vmatprep.subr.bf16.mxu0 %v10168_v49  ;;  %3608 = vmatprep.subr.bf16.mxu1 %v10171_v50  ;;  %v10252_v49 = vld [vmem:[%s13704_s14 + $0x104] ss:$16 sps:$4 sm:$0xff]   ;;  %v10255_v50 = vld [vmem:[%s13704_s14 + $0x10c] ss:$16 sps:$4 sm:$0xff]  }
 0x489   :  { %3523 = vmatpush1.bf16.msra.mxu0 %v10166_v51  ;;  %3609 = vmatpush1.bf16.msra.mxu1 %v10169_v52  ;;  %v10250_v51 = vld [vmem:[%s13704_s14 + $0x100] ss:$16 sps:$4 sm:$0xff]   ;;  %v10253_v52 = vld [vmem:[%s13704_s14 + $0x108] ss:$16 sps:$4 sm:$0xff]  }
 0x48a   :  { %3524 = vmatprep.subr.bf16.mxu0 %v10174_v53  ;;  %3610 = vmatprep.subr.bf16.mxu1 %v10177_v54  ;;  %v10258_v53 = vld [vmem:[%s13704_s14 + $0x124] ss:$16 sps:$4 sm:$0xff]   ;;  %v10261_v54 = vld [vmem:[%s13704_s14 + $0x12c] ss:$16 sps:$4 sm:$0xff]  }
 0x48d   :  { %3525 = vmatpush1.bf16.msra.mxu0 %v10172_v55  ;;  %3611 = vmatpush1.bf16.msra.mxu1 %v10175_v56  ;;  %v10256_v55 = vld [vmem:[%s13704_s14 + $0x120] ss:$16 sps:$4 sm:$0xff]   ;;  %v10259_v56 = vld [vmem:[%s13704_s14 + $0x128] ss:$16 sps:$4 sm:$0xff]  }
 0x48e   :  { %3526 = vmatprep.subr.bf16.mxu0 %v10180_v58  ;;  %3612 = vmatprep.subr.bf16.mxu1 %v10183_v60  ;;  %v10264_v58 = vld [vmem:[%s13704_s14 + $0x144] ss:$16 sps:$4 sm:$0xff]   ;;  %v10267_v60 = vld [vmem:[%s13704_s14 + $0x14c] ss:$16 sps:$4 sm:$0xff]  }
 0x491   :  { %3527 = vmatpush1.bf16.msra.mxu0 %v10178_v62  ;;  %3613 = vmatpush1.bf16.msra.mxu1 %v10181_v0  ;;  %v10262_v62 = vld [vmem:[%s13704_s14 + $0x140] ss:$16 sps:$4 sm:$0xff]   ;;  %v10265_v0 = vld [vmem:[%s13704_s14 + $0x148] ss:$16 sps:$4 sm:$0xff]  }
 0x492   :  { %3528 = vmatprep.subr.bf16.mxu0 %v10186_v1  ;;  %3614 = vmatprep.subr.bf16.mxu1 %v10189_v2  ;;  %v10270_v1 = vld [vmem:[%s13704_s14 + $0x164] ss:$16 sps:$4 sm:$0xff]   ;;  %v10273_v2 = vld [vmem:[%s13704_s14 + $0x16c] ss:$16 sps:$4 sm:$0xff]  }
 0x495   :  { %3529 = vmatpush1.bf16.msra.mxu0 %v10184_v3  ;;  %3615 = vmatpush1.bf16.msra.mxu1 %v10187_v4  ;;  %v10268_v3 = vld [vmem:[%s13704_s14 + $0x160] ss:$16 sps:$4 sm:$0xff]   ;;  %v10271_v4 = vld [vmem:[%s13704_s14 + $0x168] ss:$16 sps:$4 sm:$0xff]  }
 0x496   :  { %3530 = vmatprep.subr.bf16.mxu0 %v10192_v5  ;;  %3616 = vmatprep.subr.bf16.mxu1 %v10195_v6  ;;  %v10276_v5 = vld [vmem:[%s13704_s14 + $0x184] ss:$16 sps:$4 sm:$0xff]   ;;  %v10279_v6 = vld [vmem:[%s13704_s14 + $0x18c] ss:$16 sps:$4 sm:$0xff]  }
 0x499   :  { %3531 = vmatpush1.bf16.msra.mxu0 %v10190_v7  ;;  %3617 = vmatpush1.bf16.msra.mxu1 %v10193_v8  ;;  %v10274_v7 = vld [vmem:[%s13704_s14 + $0x180] ss:$16 sps:$4 sm:$0xff]   ;;  %v10277_v8 = vld [vmem:[%s13704_s14 + $0x188] ss:$16 sps:$4 sm:$0xff]  }
 0x49a   :  { %3532 = vmatprep.subr.bf16.mxu0 %v10198_v9  ;;  %3618 = vmatprep.subr.bf16.mxu1 %v10201_v10  ;;  %v10282_v9 = vld [vmem:[%s13704_s14 + $0x1a4] ss:$16 sps:$4 sm:$0xff]   ;;  %v10285_v10 = vld [vmem:[%s13704_s14 + $0x1ac] ss:$16 sps:$4 sm:$0xff]  }
 0x49d   :  { %3533 = vmatpush1.bf16.msra.mxu0 %v10196_v11  ;;  %3619 = vmatpush1.bf16.msra.mxu1 %v10199_v12  ;;  %v10280_v11 = vld [vmem:[%s13704_s14 + $0x1a0] ss:$16 sps:$4 sm:$0xff]   ;;  %v10283_v12 = vld [vmem:[%s13704_s14 + $0x1a8] ss:$16 sps:$4 sm:$0xff]  }
 0x49e   :  { %4649 = vmatprep.subr.bf16.mxu0 %v10204_v13  ;;  %5135 = vmatprep.subr.bf16.mxu1 %v10207_v14  ;;  %v10288_v13 = vld [vmem:[%s13704_s14 + $0x1c4] ss:$16 sps:$4 sm:$0xff]   ;;  %v10291_v14 = vld [vmem:[%s13704_s14 + $0x1cc] ss:$16 sps:$4 sm:$0xff]  }
 0x4a0   :  { %3535 = vmatmul.mubr.bf16.vlgmr.msra.gmra.mrb[24].mxu0 %v12061_v45  ;;  %3621 = vmatmul.mubr.bf16.vlgmr.msra.gmra.mrb[24].mxu1 %v12061_v45  ;;  %v10246_v45 = vld [vmem:[%s13704_s14 + $0xe4] ss:$16 sps:$4 sm:$0xff]  }
 0x4a1   :  { %4650 = vmatpush1.bf16.msra.mxu0 %v10202_v15  ;;  %5136 = vmatpush1.bf16.msra.mxu1 %v10205_v16  ;;  %v10286_v15 = vld [vmem:[%s13704_s14 + $0x1c0] ss:$16 sps:$4 sm:$0xff]   ;;  %v10289_v16 = vld [vmem:[%s13704_s14 + $0x1c8] ss:$16 sps:$4 sm:$0xff]  }
 0x4a2   :  { %4651 = vmatprep.subr.bf16.mxu0 %v10210_v17  ;;  %5137 = vmatprep.subr.bf16.mxu1 %v10213_v18  ;;  %v10294_v17 = vld [vmem:[%s13704_s14 + $0x1e4] ss:$16 sps:$4 sm:$0xff]   ;;  %v10297_v18 = vld [vmem:[%s13704_s14 + $0x1ec] ss:$16 sps:$4 sm:$0xff]  }
 0x4a3   :  { %4681 = vmatprep.mubr.bf16.mxu0 %v10300_v19  ;;  %5167 = vmatprep.mubr.bf16.mxu1 %v10300_v19  ;;  %v10292_v19 = vld [vmem:[%s13704_s14 + $0x1e0] ss:$16 sps:$4 sm:$0xff]  }
 0x4a5   :  { %4652 = vmatpush1.bf16.msra.mxu0 %v10208_v20  ;;  %5138 = vmatpush1.bf16.msra.mxu1 %v10211_v21  ;;  %v10295_v20 = vld [vmem:[%s13704_s14 + $0x1e8] ss:$16 sps:$4 sm:$0xff]   ;;  %v10303_v21 = vld [vmem:[%s13704_s14 + $0x204] ss:$16 sps:$4 sm:$0xff]  }
 0x4a6   :  { %4653 = vmatprep.subr.bf16.mxu0 %v10216_v23  ;;  %5139 = vmatprep.subr.bf16.mxu1 %v10219_v27  ;;  %v10333_v23 = vld [vmem:[%s13704_s14 + $0x20c] ss:$16 sps:$4 sm:$0xff]  }
 0x4a7   :  { %v10298_v27 = vld [vmem:[%s13706_s1] ss:$12 sps:$4 sm:$0xff]  }
 0x4a9   :  { %4654 = vmatpush1.bf16.msra.mxu0 %v10214_v36  ;;  %5140 = vmatpush1.bf16.msra.mxu1 %v10217_v30  ;;  %v10301_v36 = vld [vmem:[%s13704_s14 + $0x200] ss:$16 sps:$4 sm:$0xff]   ;;  %v10304_v30 = vld [vmem:[%s13706_s1 + $0x1c] ss:$12 sps:$4 sm:$0xff]  }
 0x4aa   :  { %4655 = vmatprep.subr.bf16.mxu0 %v10222_v31  ;;  %5141 = vmatprep.subr.bf16.mxu1 %v10225_v32  ;;  %v10312_v31 = vld [vmem:[%s13704_s14 + $0x224] ss:$16 sps:$4 sm:$0xff]   ;;  %v10331_v32 = vld [vmem:[%s13704_s14 + $0x208] ss:$16 sps:$4 sm:$0xff]  }
 0x4ad   :  { %4656 = vmatpush1.bf16.msra.mxu0 %v10220_v33  ;;  %5142 = vmatpush1.bf16.msra.mxu1 %v10223_v34  ;;  %v10345_v33 = vld [vmem:[%s13704_s14 + $0x22c] ss:$16 sps:$4 sm:$0xff]   ;;  %v10310_v34 = vld [vmem:[%s13704_s14 + $0x220] ss:$16 sps:$4 sm:$0xff]  }
 0x4ae   :  { %4657 = vmatprep.subr.bf16.mxu0 %v10228_v35  ;;  %5143 = vmatprep.subr.bf16.mxu1 %v10231_v61  ;;  %v10324_v35 = vld [vmem:[%s13704_s14 + $0x244] ss:$16 sps:$4 sm:$0xff]   ;;  %v10343_v61 = vld [vmem:[%s13704_s14 + $0x228] ss:$16 sps:$4 sm:$0xff]  }
 0x4b1   :  { %4658 = vmatpush1.bf16.msra.mxu0 %v10226_v38  ;;  %5144 = vmatpush1.bf16.msra.mxu1 %v10229_v39  ;;  %v10306_v38 = vld [vmem:[%s13706_s1 + $0x18] ss:$12 sps:$4 sm:$0xff]   ;;  %v10307_v39 = vld [vmem:[%s13706_s1 + $0x34] ss:$12 sps:$4 sm:$0xff]  }
 0x4b2   :  { %4659 = vmatprep.subr.bf16.mxu0 %v10234_v40  ;;  %5145 = vmatprep.subr.bf16.mxu1 %v10237_v41  ;;  %v10322_v40 = vld [vmem:[%s13704_s14 + $0x240] ss:$16 sps:$4 sm:$0xff]   ;;  %v10360_v41 = vld [vmem:[%s13704_s14 + $0x24c] ss:$16 sps:$4 sm:$0xff]  }
 0x4b5   :  { %4660 = vmatpush1.bf16.msra.mxu0 %v10232_v42  ;;  %5146 = vmatpush1.bf16.msra.mxu1 %v10235_v57  ;;  %v10338_v42 = vld [vmem:[%s13704_s14 + $0x264] ss:$16 sps:$4 sm:$0xff]   ;;  %v10358_v57 = vld [vmem:[%s13704_s14 + $0x248] ss:$16 sps:$4 sm:$0xff]  }
 0x4b6   :  { %4661 = vmatprep.subr.bf16.mxu0 %v10240_v43  ;;  %5147 = vmatprep.subr.bf16.mxu1 %v10243_v63  ;;  %v10375_v43 = vld [vmem:[%s13704_s14 + $0x26c] ss:$16 sps:$4 sm:$0xff]   ;;  %v10336_v63 = vld [vmem:[%s13704_s14 + $0x260] ss:$16 sps:$4 sm:$0xff]  }
 0x4b9   :  { %4662 = vmatpush1.bf16.msra.mxu0 %v10238_v59  ;;  %5148 = vmatpush1.bf16.msra.mxu1 %v10241_v44  ;;  %v10351_v59 = vld [vmem:[%s13704_s14 + $0x284] ss:$16 sps:$4 sm:$0xff]   ;;  %v10373_v44 = vld [vmem:[%s13704_s14 + $0x268] ss:$16 sps:$4 sm:$0xff]  }
 0x4ba   :  { %4663 = vmatprep.subr.bf16.mxu0 %v10246_v45  ;;  %5149 = vmatprep.subr.bf16.mxu1 %v10249_v46  ;;  %v10309_v45 = vld [vmem:[%s13706_s1 + $0x30] ss:$12 sps:$4 sm:$0xff]   ;;  %v10313_v46 = vld [vmem:[%s13706_s1 + $0x4c] ss:$12 sps:$4 sm:$0xff]  }
 0x4bd   :  { %4664 = vmatpush1.bf16.msra.mxu0 %v10244_v47  ;;  %5150 = vmatpush1.bf16.msra.mxu1 %v10247_v48  ;;  %v10349_v47 = vld [vmem:[%s13704_s14 + $0x280] ss:$16 sps:$4 sm:$0xff]   ;;  %v10387_v48 = vld [vmem:[%s13704_s14 + $0x28c] ss:$16 sps:$4 sm:$0xff]  }
 0x4be   :  { %4665 = vmatprep.subr.bf16.mxu0 %v10252_v49  ;;  %5151 = vmatprep.subr.bf16.mxu1 %v10255_v50  ;;  %v10366_v49 = vld [vmem:[%s13704_s14 + $0x2a4] ss:$16 sps:$4 sm:$0xff]   ;;  %v10385_v50 = vld [vmem:[%s13704_s14 + $0x288] ss:$16 sps:$4 sm:$0xff]  }
 0x4c1   :  { %4666 = vmatpush1.bf16.msra.mxu0 %v10250_v51  ;;  %5152 = vmatpush1.bf16.msra.mxu1 %v10253_v52  ;;  %v10364_v51 = vld [vmem:[%s13704_s14 + $0x2a0] ss:$16 sps:$4 sm:$0xff]   ;;  %v10378_v52 = vld [vmem:[%s13704_s14 + $0x2c4] ss:$16 sps:$4 sm:$0xff]  }
 0x4c2   :  { %4667 = vmatprep.subr.bf16.mxu0 %v10258_v53  ;;  %5153 = vmatprep.subr.bf16.mxu1 %v10261_v54  ;;  %v10315_v53 = vld [vmem:[%s13706_s1 + $0x48] ss:$12 sps:$4 sm:$0xff]   ;;  %v10316_v54 = vld [vmem:[%s13706_s1 + $0x64] ss:$12 sps:$4 sm:$0xff]  }
 0x4c5   :  { %4668 = vmatpush1.bf16.msra.mxu0 %v10256_v55  ;;  %5154 = vmatpush1.bf16.msra.mxu1 %v10259_v56  ;;  %v10376_v55 = vld [vmem:[%s13704_s14 + $0x2c0] ss:$16 sps:$4 sm:$0xff]   ;;  %v10393_v56 = vld [vmem:[%s13704_s14 + $0x2e4] ss:$16 sps:$4 sm:$0xff]  }
 0x4c6   :  { %4669 = vmatprep.subr.bf16.mxu0 %v10264_v58  ;;  %5155 = vmatprep.subr.bf16.mxu1 %v10267_v60  ;;  %v10397_v58 = vld [vmem:[%s13704_s14 + $0x2a8] ss:$16 sps:$4 sm:$0xff]   ;;  %v10399_v60 = vld [vmem:[%s13704_s14 + $0x2ac] ss:$16 sps:$4 sm:$0xff]  }
 0x4c9   :  { %4670 = vmatpush1.bf16.msra.mxu0 %v10262_v62  ;;  %5156 = vmatpush1.bf16.msra.mxu1 %v10265_v0  ;;  %v10391_v62 = vld [vmem:[%s13704_s14 + $0x2e0] ss:$16 sps:$4 sm:$0xff]  }
 0x4ca   :  { %4671 = vmatprep.subr.bf16.mxu0 %v10270_v1  ;;  %5157 = vmatprep.subr.bf16.mxu1 %v10273_v2  ;;  %v10318_v0 = vld [vmem:[%s13706_s1 + $0x60] ss:$12 sps:$4 sm:$0xff]   ;;  %v10319_v1 = vld [vmem:[%s13706_s1 + $0x7c] ss:$12 sps:$4 sm:$0xff]  }
 0x4cb   :  { %v10405_v2 = vld [vmem:[%s13704_s14 + $0x2cc] ss:$16 sps:$4 sm:$0xff]  }
 0x4cd   :  { %4672 = vmatpush1.bf16.msra.mxu0 %v10268_v3  ;;  %5158 = vmatpush1.bf16.msra.mxu1 %v10271_v4  ;;  %v10403_v3 = vld [vmem:[%s13704_s14 + $0x2c8] ss:$16 sps:$4 sm:$0xff]   ;;  %v10408_v4 = vld [vmem:[%s13704_s14 + $0x2ec] ss:$16 sps:$4 sm:$0xff]  }
 0x4ce   :  { %4673 = vmatprep.subr.bf16.mxu0 %v10276_v5  ;;  %5159 = vmatprep.subr.bf16.mxu1 %v10279_v6  ;;  %v10406_v5 = vld [vmem:[%s13704_s14 + $0x2e8] ss:$16 sps:$4 sm:$0xff]  }
 0x4cf   :  { %v10321_v6 = vld [vmem:[%s13706_s1 + $0x78] ss:$12 sps:$4 sm:$0xff]  }
 0x4d1   :  { %4674 = vmatpush1.bf16.msra.mxu0 %v10274_v7  ;;  %5160 = vmatpush1.bf16.msra.mxu1 %v10277_v8  ;;  %v10325_v7 = vld [vmem:[%s13706_s1 + $0x94] ss:$12 sps:$4 sm:$0xff]   ;;  %v10327_v8 = vld [vmem:[%s13706_s1 + $0x90] ss:$12 sps:$4 sm:$0xff]  }
 0x4d2   :  { %4675 = vmatprep.subr.bf16.mxu0 %v10282_v9  ;;  %5161 = vmatprep.subr.bf16.mxu1 %v10285_v10  ;;  %v10328_v9 = vld [vmem:[%s13706_s1 + $0xac] ss:$12 sps:$4 sm:$0xff]   ;;  %v10330_v10 = vld [vmem:[%s13706_s1 + $0xa8] ss:$12 sps:$4 sm:$0xff]  }
 0x4d5   :  { %4676 = vmatpush1.bf16.msra.mxu0 %v10280_v11  ;;  %5162 = vmatpush1.bf16.msra.mxu1 %v10283_v12  ;;  %v10334_v11 = vld [vmem:[%s13706_s1 + $0xc4] ss:$12 sps:$4 sm:$0xff]   ;;  %v10339_v12 = vld [vmem:[%s13706_s1 + $0xc0] ss:$12 sps:$4 sm:$0xff]  }
 0x4d6   :  { %4677 = vmatprep.subr.bf16.mxu0 %v10288_v13  ;;  %5163 = vmatprep.subr.bf16.mxu1 %v10291_v14  ;;  %v10340_v13 = vld [vmem:[%s13706_s1 + $0xdc] ss:$12 sps:$4 sm:$0xff]   ;;  %v10342_v14 = vld [vmem:[%s13706_s1 + $0xd8] ss:$12 sps:$4 sm:$0xff]  }
 0x4d9   :  { %4678 = vmatpush1.bf16.msra.mxu0 %v10286_v15  ;;  %5164 = vmatpush1.bf16.msra.mxu1 %v10289_v16  ;;  %v10346_v15 = vld [vmem:[%s13706_s1 + $0xf4] ss:$12 sps:$4 sm:$0xff]   ;;  %v10348_v16 = vld [vmem:[%s13706_s1 + $0xf0] ss:$12 sps:$4 sm:$0xff]  }
 0x4da   :  { %4679 = vmatprep.subr.bf16.mxu0 %v10294_v17  ;;  %5165 = vmatprep.subr.bf16.mxu1 %v10297_v18  ;;  %v10352_v17 = vld [vmem:[%s13706_s1 + $0x10c] ss:$12 sps:$4 sm:$0xff]   ;;  %v10354_v18 = vld [vmem:[%s13706_s1 + $0x108] ss:$12 sps:$4 sm:$0xff]  }
 0x4dd   :  { %4680 = vmatpush1.bf16.msra.mxu0 %v10292_v19  ;;  %5166 = vmatpush1.bf16.msra.mxu1 %v10295_v20  ;;  %v10355_v19 = vld [vmem:[%s13706_s1 + $0x124] ss:$12 sps:$4 sm:$0xff]   ;;  %v10357_v20 = vld [vmem:[%s13706_s1 + $0x120] ss:$12 sps:$4 sm:$0xff]  }
 0x4de   :  { %4892 = vmatprep.subr.bf16.mxu0 %v10303_v21  ;;  %5378 = vmatprep.subr.bf16.mxu1 %v10333_v23  ;;  %v10418_v21 = vld [vmem:[%s13707_s16 + $0x4] ss:$16 sps:$4 sm:$0xff]   ;;  %v10361_v23 = vld [vmem:[%s13706_s1 + $0x13c] ss:$12 sps:$4 sm:$0xff]  }
 0x4e0   :  { %4682 = vmatmul.mubr.bf16.vlgmr.msra.gmra.mrb[28].mxu0 %v10298_v27  ;;  %5168 = vmatmul.mubr.bf16.vlgmr.msra.gmra.mrb[28].mxu1 %v10298_v27  ;;  %v10422_v27 = vld [vmem:[%s13707_s16 + $0xc] ss:$16 sps:$4 sm:$0xff]  }
 0x4e1   :  { %4893 = vmatpush1.bf16.msra.mxu0 %v10301_v36  ;;  %4691 = vmatprep.mubr.bf16.mxu0 %v10304_v30  ;;  %v10363_v36 = vld [vmem:[%s13706_s1 + $0x138] ss:$12 sps:$4 sm:$0xff]  }
 0x4e2   :  { %5177 = vmatprep.mubr.bf16.mxu1 %v10304_v30  ;;  %4894 = vmatprep.subr.bf16.mxu0 %v10312_v31  ;;  %v10367_v30 = vld [vmem:[%s13706_s1 + $0x154] ss:$12 sps:$4 sm:$0xff]   ;;  %v10369_v31 = vld [vmem:[%s13706_s1 + $0x150] ss:$12 sps:$4 sm:$0xff]  }
 0x4e3   :  { %5379 = vmatpush1.bf16.msra.mxu1 %v10331_v32  ;;  %v10370_v32 = vld [vmem:[%s13706_s1 + $0x16c] ss:$12 sps:$4 sm:$0xff]  }
 0x4e4   :  { %5380 = vmatprep.subr.bf16.mxu1 %v10345_v33  ;;  %v10372_v33 = vld [vmem:[%s13706_s1 + $0x168] ss:$12 sps:$4 sm:$0xff]  }
 0x4e5   :  { %4895 = vmatpush1.bf16.msra.mxu0 %v10310_v34  ;;  %v10379_v34 = vld [vmem:[%s13706_s1 + $0x184] ss:$12 sps:$4 sm:$0xff]  }
 0x4e6   :  { %4896 = vmatprep.subr.bf16.mxu0 %v10324_v35  ;;  %v10381_v35 = vld [vmem:[%s13706_s1 + $0x180] ss:$12 sps:$4 sm:$0xff]  }
 0x4e7   :  { %5381 = vmatpush1.bf16.msra.mxu1 %v10343_v61  ;;  %v10382_v61 = vld [vmem:[%s13706_s1 + $0x19c] ss:$12 sps:$4 sm:$0xff]  }
 0x4e8   :  { %4692 = vmatmul.mubr.bf16.gmra.mrb[32].mxu0 %v10306_v38  ;;  %5178 = vmatmul.mubr.bf16.gmra.mrb[32].mxu1 %v10306_v38  ;;  %v10384_v38 = vld [vmem:[%s13706_s1 + $0x198] ss:$12 sps:$4 sm:$0xff]  }
 0x4e9   :  { %4701 = vmatprep.mubr.bf16.mxu0 %v10307_v39  ;;  %5187 = vmatprep.mubr.bf16.mxu1 %v10307_v39  ;;  %v10388_v39 = vld [vmem:[%s13706_s1 + $0x1b4] ss:$12 sps:$4 sm:$0xff]  }
 0x4ea   :  { %4897 = vmatpush1.bf16.msra.mxu0 %v10322_v40  ;;  %5382 = vmatprep.subr.bf16.mxu1 %v10360_v41  ;;  %v10390_v40 = vld [vmem:[%s13706_s1 + $0x1b0] ss:$12 sps:$4 sm:$0xff]   ;;  %v2797_v41 = vld [vmem:[%s13708_s13] sm:$0xf] }
 0x4eb   :  { %4898 = vmatprep.subr.bf16.mxu0 %v10338_v42  ;;  %5383 = vmatpush1.bf16.msra.mxu1 %v10358_v57  ;;  %v10394_v42 = vld [vmem:[%s13706_s1 + $0x1cc] ss:$12 sps:$4 sm:$0xff]   ;;  %v2802_v57 = vrot.slane %v2797_v41, %v11154_v25 }
 0x4ec   :  { %5384 = vmatprep.subr.bf16.mxu1 %v10375_v43  ;;  %v2810_v43 = vrot.slane %v2797_v41, %v11157_v26 }
 0x4ee   :  { %4899 = vmatpush1.bf16.msra.mxu0 %v10336_v63  ;;  %v2806_v63 = vrot.slane %v2797_v41, %v11163_v28 }
 0x4ef   :  { %4900 = vmatprep.subr.bf16.mxu0 %v10351_v59  ;;  %5385 = vmatpush1.bf16.msra.mxu1 %v10373_v44  ;;  %v2814_v59 = vrot.slane %v2797_v41, %v11166_v29  ;;  %v10468_v41 = vld [vmem:[%s13707_s16 + $0xe0] ss:$16 sps:$4 sm:$0xff]  }
 0x4f0   :  { %4702 = vmatmul.mubr.bf16.gmra.mrb[36].mxu0 %v10309_v45  ;;  %5188 = vmatmul.mubr.bf16.gmra.mrb[36].mxu1 %v10309_v45 }
 0x4f1   :  { %4711 = vmatprep.mubr.bf16.mxu0 %v10313_v46  ;;  %5197 = vmatprep.mubr.bf16.mxu1 %v10313_v46 }
 0x4f2   :  { %4901 = vmatpush1.bf16.msra.mxu0 %v10349_v47  ;;  %5386 = vmatprep.subr.bf16.mxu1 %v10387_v48 }
 0x4f3   :  { %4902 = vmatprep.subr.bf16.mxu0 %v10366_v49  ;;  %5387 = vmatpush1.bf16.msra.mxu1 %v10385_v50  ;;  %v10396_v50 = vld [vmem:[%s13706_s1 + $0x1c8] ss:$12 sps:$4 sm:$0xff]  }
 0x4f4   :  { %5388 = vmatprep.subr.bf16.mxu1 %v10399_v60 }
 0x4f6   :  { %4903 = vmatpush1.bf16.msra.mxu0 %v10364_v51 }
 0x4f7   :  { %4904 = vmatprep.subr.bf16.mxu0 %v10378_v52  ;;  %5389 = vmatpush1.bf16.msra.mxu1 %v10397_v58 }
 0x4f8   :  { %4712 = vmatmul.mubr.bf16.gmra.mrb[40].mxu0 %v10315_v53  ;;  %5198 = vmatmul.mubr.bf16.gmra.mrb[40].mxu1 %v10315_v53 }
 0x4f9   :  { %4721 = vmatprep.mubr.bf16.mxu0 %v10316_v54  ;;  %5207 = vmatprep.mubr.bf16.mxu1 %v10316_v54 }
 0x4fa   :  { %4905 = vmatpush1.bf16.msra.mxu0 %v10376_v55  ;;  %5390 = vmatprep.subr.bf16.mxu1 %v10405_v2  ;;  %v10400_v55 = vld [vmem:[%s13706_s1 + $0x1e4] ss:$12 sps:$4 sm:$0xff]   ;;  %v10402_v2 = vld [vmem:[%s13706_s1 + $0x1e0] ss:$12 sps:$4 sm:$0xff]  }
 0x4fb   :  { %4906 = vmatprep.subr.bf16.mxu0 %v10393_v56  ;;  %5391 = vmatpush1.bf16.msra.mxu1 %v10403_v3  ;;  %v10409_v3 = vld [vmem:[%s13706_s1 + $0x8] ss:$12 sps:$4 sm:$0xff]  }
 0x4fc   :  { %5392 = vmatprep.subr.bf16.mxu1 %v10408_v4  ;;  %v10416_v4 = vld [vmem:[%s13707_s16] ss:$16 sps:$4 sm:$0xff]  }
 0x4fe   :  { %4907 = vmatpush1.bf16.msra.mxu0 %v10391_v62 }
 0x4ff   :  { %5393 = vmatpush1.bf16.msra.mxu1 %v10406_v5  ;;  %6663 = vmatprep.subr.bf16.mxu0 %v10418_v21  ;;  %v10420_v5 = vld [vmem:[%s13707_s16 + $0x8] ss:$16 sps:$4 sm:$0xff]  }
 0x500   :  { %4722 = vmatmul.mubr.bf16.gmra.mrb[44].mxu0 %v10318_v0  ;;  %5208 = vmatmul.mubr.bf16.gmra.mrb[44].mxu1 %v10318_v0  ;;  %v10411_v21 = vld [vmem:[%s13706_s1 + $0x38] ss:$12 sps:$4 sm:$0xff]  }
 0x501   :  { %4731 = vmatprep.mubr.bf16.mxu0 %v10319_v1  ;;  %5217 = vmatprep.mubr.bf16.mxu1 %v10319_v1 }
 0x502   :  { %7149 = vmatprep.subr.bf16.mxu1 %v10422_v27  ;;  %v10449_v27 = vld [vmem:[%s13707_s16 + $0x88] ss:$16 sps:$4 sm:$0xff]  }
 0x508   :  { %4732 = vmatmul.mubr.bf16.gmra.mrb[48].mxu0 %v10321_v6  ;;  %5218 = vmatmul.mubr.bf16.gmra.mrb[48].mxu1 %v10321_v6  ;;  %v10426_v6 = vld [vmem:[%s13707_s16 + $0x24] ss:$16 sps:$4 sm:$0xff]  }
 0x509   :  { %4741 = vmatprep.mubr.bf16.mxu0 %v10325_v7  ;;  %5227 = vmatprep.mubr.bf16.mxu1 %v10325_v7  ;;  %v10429_v7 = vld [vmem:[%s13707_s16 + $0x2c] ss:$16 sps:$4 sm:$0xff]  }
 0x510   :  { %4742 = vmatmul.mubr.bf16.gmra.mrb[52].mxu0 %v10327_v8  ;;  %5228 = vmatmul.mubr.bf16.gmra.mrb[52].mxu1 %v10327_v8  ;;  %v10424_v8 = vld [vmem:[%s13707_s16 + $0x20] ss:$16 sps:$4 sm:$0xff]  }
 0x511   :  { %4751 = vmatprep.mubr.bf16.mxu0 %v10328_v9  ;;  %5237 = vmatprep.mubr.bf16.mxu1 %v10328_v9  ;;  %v10427_v9 = vld [vmem:[%s13707_s16 + $0x28] ss:$16 sps:$4 sm:$0xff]  }
 0x518   :  { %4752 = vmatmul.mubr.bf16.gmra.mrb[56].mxu0 %v10330_v10  ;;  %5238 = vmatmul.mubr.bf16.gmra.mrb[56].mxu1 %v10330_v10  ;;  %v10433_v10 = vld [vmem:[%s13707_s16 + $0x44] ss:$16 sps:$4 sm:$0xff]  }
 0x519   :  { %4761 = vmatprep.mubr.bf16.mxu0 %v10334_v11  ;;  %5247 = vmatprep.mubr.bf16.mxu1 %v10334_v11  ;;  %v10436_v11 = vld [vmem:[%s13707_s16 + $0x4c] ss:$16 sps:$4 sm:$0xff]  }
 0x520   :  { %4762 = vmatmul.mubr.bf16.gmra.mrb[60].mxu0 %v10339_v12  ;;  %5248 = vmatmul.mubr.bf16.gmra.mrb[60].mxu1 %v10339_v12  ;;  %v10410_v12 = vld [vmem:[%s13706_s1 + $0x20] ss:$12 sps:$4 sm:$0xff]  }
 0x521   :  { %4771 = vmatprep.mubr.bf16.mxu0 %v10340_v13  ;;  %5257 = vmatprep.mubr.bf16.mxu1 %v10340_v13  ;;  %v10431_v13 = vld [vmem:[%s13707_s16 + $0x40] ss:$16 sps:$4 sm:$0xff]  }
 0x528   :  { %4772 = vmatmul.mubr.bf16.gmra.mrb[64].mxu0 %v10342_v14  ;;  %5258 = vmatmul.mubr.bf16.gmra.mrb[64].mxu1 %v10342_v14  ;;  %v10434_v14 = vld [vmem:[%s13707_s16 + $0x48] ss:$16 sps:$4 sm:$0xff]  }
 0x529   :  { %4781 = vmatprep.mubr.bf16.mxu0 %v10346_v15  ;;  %5267 = vmatprep.mubr.bf16.mxu1 %v10346_v15  ;;  %v10440_v15 = vld [vmem:[%s13707_s16 + $0x64] ss:$16 sps:$4 sm:$0xff]  }
 0x530   :  { %4782 = vmatmul.mubr.bf16.gmra.mrb[68].mxu0 %v10348_v16  ;;  %5268 = vmatmul.mubr.bf16.gmra.mrb[68].mxu1 %v10348_v16  ;;  %v10444_v16 = vld [vmem:[%s13707_s16 + $0x6c] ss:$16 sps:$4 sm:$0xff]  }
 0x531   :  { %4791 = vmatprep.mubr.bf16.mxu0 %v10352_v17  ;;  %5277 = vmatprep.mubr.bf16.mxu1 %v10352_v17  ;;  %v10438_v17 = vld [vmem:[%s13707_s16 + $0x60] ss:$16 sps:$4 sm:$0xff]  }
 0x538   :  { %4792 = vmatmul.mubr.bf16.gmra.mrb[72].mxu0 %v10354_v18  ;;  %5278 = vmatmul.mubr.bf16.gmra.mrb[72].mxu1 %v10354_v18  ;;  %v10442_v18 = vld [vmem:[%s13707_s16 + $0x68] ss:$16 sps:$4 sm:$0xff]  }
 0x539   :  { %4801 = vmatprep.mubr.bf16.mxu0 %v10355_v19  ;;  %5287 = vmatprep.mubr.bf16.mxu1 %v10355_v19  ;;  %v10448_v19 = vld [vmem:[%s13707_s16 + $0x84] ss:$16 sps:$4 sm:$0xff]  }
 0x540   :  { %4802 = vmatmul.mubr.bf16.gmra.mrb[76].mxu0 %v10357_v20  ;;  %5288 = vmatmul.mubr.bf16.gmra.mrb[76].mxu1 %v10357_v20  ;;  %v10451_v20 = vld [vmem:[%s13707_s16 + $0x8c] ss:$16 sps:$4 sm:$0xff]  }
 0x541   :  { %4811 = vmatprep.mubr.bf16.mxu0 %v10361_v23  ;;  %5297 = vmatprep.mubr.bf16.mxu1 %v10361_v23  ;;  %v10446_v23 = vld [vmem:[%s13707_s16 + $0x80] ss:$16 sps:$4 sm:$0xff]  }
 0x548   :  { %4812 = vmatmul.mubr.bf16.gmra.mrb[80].mxu0 %v10363_v36  ;;  %5298 = vmatmul.mubr.bf16.gmra.mrb[80].mxu1 %v10363_v36  ;;  %v10455_v36 = vld [vmem:[%s13707_s16 + $0xa4] ss:$16 sps:$4 sm:$0xff]  }
 0x549   :  { %4821 = vmatprep.mubr.bf16.mxu0 %v10367_v30  ;;  %5307 = vmatprep.mubr.bf16.mxu1 %v10367_v30  ;;  %v10458_v30 = vld [vmem:[%s13707_s16 + $0xac] ss:$16 sps:$4 sm:$0xff]  }
 0x550   :  { %4822 = vmatmul.mubr.bf16.gmra.mrb[84].mxu0 %v10369_v31  ;;  %5308 = vmatmul.mubr.bf16.gmra.mrb[84].mxu1 %v10369_v31  ;;  %v10453_v31 = vld [vmem:[%s13707_s16 + $0xa0] ss:$16 sps:$4 sm:$0xff]  }
 0x551   :  { %4831 = vmatprep.mubr.bf16.mxu0 %v10370_v32  ;;  %5317 = vmatprep.mubr.bf16.mxu1 %v10370_v32  ;;  %v10456_v32 = vld [vmem:[%s13707_s16 + $0xa8] ss:$16 sps:$4 sm:$0xff]  }
 0x558   :  { %4832 = vmatmul.mubr.bf16.gmra.mrb[88].mxu0 %v10372_v33  ;;  %5318 = vmatmul.mubr.bf16.gmra.mrb[88].mxu1 %v10372_v33  ;;  %v10462_v33 = vld [vmem:[%s13707_s16 + $0xc4] ss:$16 sps:$4 sm:$0xff]  }
 0x559   :  { %4841 = vmatprep.mubr.bf16.mxu0 %v10379_v34  ;;  %5327 = vmatprep.mubr.bf16.mxu1 %v10379_v34  ;;  %v10466_v34 = vld [vmem:[%s13707_s16 + $0xcc] ss:$16 sps:$4 sm:$0xff]  }
 0x560   :  { %4842 = vmatmul.mubr.bf16.gmra.mrb[92].mxu0 %v10381_v35  ;;  %5328 = vmatmul.mubr.bf16.gmra.mrb[92].mxu1 %v10381_v35  ;;  %v10412_v35 = vld [vmem:[%s13706_s1 + $0x50] ss:$12 sps:$4 sm:$0xff]  }
 0x561   :  { %4851 = vmatprep.mubr.bf16.mxu0 %v10382_v61  ;;  %5337 = vmatprep.mubr.bf16.mxu1 %v10382_v61  ;;  %v10460_v61 = vld [vmem:[%s13707_s16 + $0xc0] ss:$16 sps:$4 sm:$0xff]  }
 0x568   :  { %4852 = vmatmul.mubr.bf16.gmra.mrb[96].mxu0 %v10384_v38  ;;  %5338 = vmatmul.mubr.bf16.gmra.mrb[96].mxu1 %v10384_v38  ;;  %v10464_v38 = vld [vmem:[%s13707_s16 + $0xc8] ss:$16 sps:$4 sm:$0xff]  }
 0x569   :  { %4861 = vmatprep.mubr.bf16.mxu0 %v10388_v39  ;;  %5347 = vmatprep.mubr.bf16.mxu1 %v10388_v39  ;;  %v10470_v39 = vld [vmem:[%s13707_s16 + $0xe4] ss:$16 sps:$4 sm:$0xff]  }
 0x570   :  { %4862 = vmatmul.mubr.bf16.gmra.mrb[100].mxu0 %v10390_v40  ;;  %5348 = vmatmul.mubr.bf16.gmra.mrb[100].mxu1 %v10390_v40  ;;  %v10473_v40 = vld [vmem:[%s13707_s16 + $0xec] ss:$16 sps:$4 sm:$0xff]  }
 0x571   :  { %4871 = vmatprep.mubr.bf16.mxu0 %v10394_v42  ;;  %5357 = vmatprep.mubr.bf16.mxu1 %v10394_v42  ;;  %v10471_v42 = vld [vmem:[%s13707_s16 + $0xe8] ss:$16 sps:$4 sm:$0xff]  }
 0x573   :  { %v3536_v44 = vpop.f32.mrb[24].mxu0  ;;  %v3622_v45 = vpop.f32.mrb[24].mxu1 }
 0x574   :  { %v9022_v46 = vadd.f32 %v3536_v44, %v2802_v57  ;;  %v9026_v47 = vadd.f32 %v3622_v45, %v2810_v43  ;;  %v3538_v48 = vpop.f32.mrb[25].mxu0  ;;  %v3624_v49 = vpop.f32.mrb[25].mxu1  ;;  %v10478_v44 = vld [vmem:[%s13707_s16 + $0x108] ss:$16 sps:$4 sm:$0xff]   ;;  %v10484_v45 = vld [vmem:[%s13707_s16 + $0x124] ss:$16 sps:$4 sm:$0xff]  }
 0x575   :  { %v9023_v51 = vadd.f32 %v3538_v48, %v2806_v63  ;;  %v9027_v52 = vadd.f32 %v3624_v49, %v2814_v59  ;;  %v3540_v53 = vpop.f32.mrb[26].mxu0  ;;  %v3626_v54 = vpop.f32.mrb[26].mxu1  ;;  %v10486_v48 = vld [vmem:[%s13707_s16 + $0x128] ss:$16 sps:$4 sm:$0xff]   ;;  %v10491_v49 = vld [vmem:[%s13707_s16 + $0x144] ss:$16 sps:$4 sm:$0xff]  }
 0x576   :  { %v9024_v56 = vadd.f32 %v3540_v53, %v2802_v57  ;;  %8149 = vst [vmem:[%s13709_s20] sm:$0xff] %v9022_v46  ;;  %8151 = vst [vmem:[%s13709_s20 + $0x10] sm:$0xff] %v9026_v47  ;;  %v9028_v58 = vadd.f32 %v3626_v54, %v2810_v43  ;;  %v3542_v60 = vpop.f32.mrb[27].mxu0  ;;  %v3628_v62 = vpop.f32.mrb[27].mxu1  ;;  %v10477_v57 = vld [vmem:[%s13707_s16 + $0x104] ss:$16 sps:$4 sm:$0xff]  }
 0x577   :  { %8150 = vst [vmem:[%s13709_s20 + $0x8] sm:$0xff] %v9023_v51  ;;  %8152 = vst [vmem:[%s13709_s20 + $0x18] sm:$0xff] %v9027_v52  ;;  %v9025_v0 = vadd.f32 %v3542_v60, %v2806_v63  ;;  %v9029_v1 = vadd.f32 %v3628_v62, %v2814_v59  ;;  %v10480_v43 = vld [vmem:[%s13707_s16 + $0x10c] ss:$16 sps:$4 sm:$0xff]   ;;  %v10413_v63 = vld [vmem:[%s13706_s1 + $0x68] ss:$12 sps:$4 sm:$0xff]  }
 0x578   :  { %8153 = vst [vmem:[%s13709_s20 + $0x20] sm:$0xff] %v9024_v56  ;;  %8155 = vst [vmem:[%s13709_s20 + $0x30] sm:$0xff] %v9028_v58  ;;  %4872 = vmatmul.mubr.bf16.gmra.mrb[104].mxu0 %v10396_v50  ;;  %5358 = vmatmul.mubr.bf16.gmra.mrb[104].mxu1 %v10396_v50  ;;  %v10475_v59 = vld [vmem:[%s13707_s16 + $0x100] ss:$16 sps:$4 sm:$0xff]   ;;  %v10488_v46 = vld [vmem:[%s13707_s16 + $0x12c] ss:$16 sps:$4 sm:$0xff]  }
 0x579   :  { %8154 = vst [vmem:[%s13709_s20 + $0x28] sm:$0xff] %v9025_v0  ;;  %8156 = vst [vmem:[%s13709_s20 + $0x38] sm:$0xff] %v9029_v1  ;;  %4881 = vmatprep.mubr.bf16.mxu0 %v10400_v55  ;;  %5367 = vmatprep.mubr.bf16.mxu1 %v10400_v55  ;;  %v10482_v47 = vld [vmem:[%s13707_s16 + $0x120] ss:$16 sps:$4 sm:$0xff]   ;;  %v10495_v50 = vld [vmem:[%s13707_s16 + $0x14c] ss:$16 sps:$4 sm:$0xff]  }
 0x57a   :  { %v10414_v51 = vld [vmem:[%s13706_s1 + $0x80] ss:$12 sps:$4 sm:$0xff]   ;;  %v10493_v53 = vld [vmem:[%s13707_s16 + $0x148] ss:$16 sps:$4 sm:$0xff]   ;;  %v10498_v54 = vld [vmem:[%s13707_s16 + $0x164] ss:$16 sps:$4 sm:$0xff]  }
 0x57b   :  { %v10489_v52 = vld [vmem:[%s13707_s16 + $0x140] ss:$16 sps:$4 sm:$0xff]   ;;  %v10501_v55 = vld [vmem:[%s13707_s16 + $0x16c] ss:$16 sps:$4 sm:$0xff]   ;;  %v10499_v58 = vld [vmem:[%s13707_s16 + $0x168] ss:$16 sps:$4 sm:$0xff]  }
 0x57c   :  { %v10496_v56 = vld [vmem:[%s13707_s16 + $0x160] ss:$16 sps:$4 sm:$0xff]   ;;  %v10504_v60 = vld [vmem:[%s13707_s16 + $0x184] ss:$16 sps:$4 sm:$0xff]   ;;  %v10507_v62 = vld [vmem:[%s13707_s16 + $0x18c] ss:$16 sps:$4 sm:$0xff]  }
 0x57d   :  { %v10415_v0 = vld [vmem:[%s13706_s1 + $0x98] ss:$12 sps:$4 sm:$0xff]   ;;  %v10502_v1 = vld [vmem:[%s13707_s16 + $0x180] ss:$16 sps:$4 sm:$0xff]  }
 0x580   :  { %4882 = vmatmul.mubr.bf16.gmra.mrb[108].mxu0 %v10402_v2  ;;  %5368 = vmatmul.mubr.bf16.gmra.mrb[108].mxu1 %v10402_v2  ;;  %v10505_v2 = vld [vmem:[%s13707_s16 + $0x188] ss:$16 sps:$4 sm:$0xff]  }
 0x581   :  { %4924 = vmatprep.mubr.bf16.mxu0 %v10681_v22  ;;  %5410 = vmatprep.mubr.bf16.mxu1 %v10681_v22 }
 0x588   :  { %4925 = vmatmul.mubr.bf16.vlgmr.msra.gmra.mrb[28].mxu0 %v10409_v3  ;;  %5411 = vmatmul.mubr.bf16.vlgmr.msra.gmra.mrb[28].mxu1 %v10409_v3  ;;  %v10510_v3 = vld [vmem:[%s13707_s16 + $0x1a4] ss:$16 sps:$4 sm:$0xff]  }
 0x589   :  { %4934 = vmatprep.mubr.bf16.mxu0 %v10681_v22  ;;  %5420 = vmatprep.mubr.bf16.mxu1 %v10681_v22 }
 0x58a   :  { %6664 = vmatpush1.bf16.msra.mxu0 %v10416_v4  ;;  %7150 = vmatpush1.bf16.msra.mxu1 %v10420_v5  ;;  %v10513_v4 = vld [vmem:[%s13707_s16 + $0x1ac] ss:$16 sps:$4 sm:$0xff]   ;;  %v10508_v5 = vld [vmem:[%s13707_s16 + $0x1a0] ss:$16 sps:$4 sm:$0xff]  }
 0x58b   :  { %6665 = vmatprep.subr.bf16.mxu0 %v10426_v6  ;;  %7151 = vmatprep.subr.bf16.mxu1 %v10429_v7  ;;  %v10511_v6 = vld [vmem:[%s13707_s16 + $0x1a8] ss:$16 sps:$4 sm:$0xff]   ;;  %v10516_v7 = vld [vmem:[%s13707_s16 + $0x1c4] ss:$16 sps:$4 sm:$0xff]  }
 0x58e   :  { %6666 = vmatpush1.bf16.msra.mxu0 %v10424_v8  ;;  %7152 = vmatpush1.bf16.msra.mxu1 %v10427_v9  ;;  %v10519_v8 = vld [vmem:[%s13707_s16 + $0x1cc] ss:$16 sps:$4 sm:$0xff]  }
 0x58f   :  { %6667 = vmatprep.subr.bf16.mxu0 %v10433_v10  ;;  %7153 = vmatprep.subr.bf16.mxu1 %v10436_v11  ;;  %v10419_v9 = vld [vmem:[%s13706_s1 + $0xb0] ss:$12 sps:$4 sm:$0xff]   ;;  %v10517_v11 = vld [vmem:[%s13707_s16 + $0x1c8] ss:$16 sps:$4 sm:$0xff]  }
 0x590   :  { %4935 = vmatmul.mubr.bf16.gmra.mrb[32].mxu0 %v10410_v12  ;;  %5421 = vmatmul.mubr.bf16.gmra.mrb[32].mxu1 %v10410_v12  ;;  %v10514_v10 = vld [vmem:[%s13707_s16 + $0x1c0] ss:$16 sps:$4 sm:$0xff]   ;;  %v10423_v12 = vld [vmem:[%s13706_s1 + $0xc8] ss:$12 sps:$4 sm:$0xff]  }
 0x591   :  { %4944 = vmatprep.mubr.bf16.mxu0 %v10681_v22  ;;  %5430 = vmatprep.mubr.bf16.mxu1 %v10681_v22 }
 0x592   :  { %6668 = vmatpush1.bf16.msra.mxu0 %v10431_v13  ;;  %7154 = vmatpush1.bf16.msra.mxu1 %v10434_v14  ;;  %v10430_v13 = vld [vmem:[%s13706_s1 + $0xe0] ss:$12 sps:$4 sm:$0xff]   ;;  %v10437_v14 = vld [vmem:[%s13706_s1 + $0xf8] ss:$12 sps:$4 sm:$0xff]  }
 0x593   :  { %6669 = vmatprep.subr.bf16.mxu0 %v10440_v15  ;;  %7155 = vmatprep.subr.bf16.mxu1 %v10444_v16  ;;  %v10441_v15 = vld [vmem:[%s13706_s1 + $0x110] ss:$12 sps:$4 sm:$0xff]  }
 0x594   :  { %v10520_v16 = vld [vmem:[%s13707_s16 + $0x1e0] ss:$16 sps:$4 sm:$0xff]  }
 0x596   :  { %6670 = vmatpush1.bf16.msra.mxu0 %v10438_v17  ;;  %7156 = vmatpush1.bf16.msra.mxu1 %v10442_v18  ;;  %v10522_v17 = vld [vmem:[%s13707_s16 + $0x1e4] ss:$16 sps:$4 sm:$0xff]   ;;  %v10525_v18 = vld [vmem:[%s13707_s16 + $0x1ec] ss:$16 sps:$4 sm:$0xff]  }
 0x597   :  { %6671 = vmatprep.subr.bf16.mxu0 %v10448_v19  ;;  %7157 = vmatprep.subr.bf16.mxu1 %v10451_v20  ;;  %v10523_v19 = vld [vmem:[%s13707_s16 + $0x1e8] ss:$16 sps:$4 sm:$0xff]  }
 0x598   :  { %4945 = vmatmul.mubr.bf16.gmra.mrb[36].mxu0 %v10411_v21  ;;  %5431 = vmatmul.mubr.bf16.gmra.mrb[36].mxu1 %v10411_v21  ;;  %v10445_v20 = vld [vmem:[%s13706_s1 + $0x128] ss:$12 sps:$4 sm:$0xff]  }
 0x599   :  { %4954 = vmatprep.mubr.bf16.mxu0 %v10681_v22  ;;  %5440 = vmatprep.mubr.bf16.mxu1 %v10681_v22  ;;  %v10528_v21 = vld [vmem:[%s13707_s16 + $0x204] ss:$16 sps:$4 sm:$0xff]  }
 0x59a   :  { %6672 = vmatpush1.bf16.msra.mxu0 %v10446_v23  ;;  %7158 = vmatpush1.bf16.msra.mxu1 %v10449_v27  ;;  %v10452_v23 = vld [vmem:[%s13706_s1 + $0x140] ss:$12 sps:$4 sm:$0xff]  }
 0x59b   :  { %6673 = vmatprep.subr.bf16.mxu0 %v10455_v36  ;;  %7159 = vmatprep.subr.bf16.mxu1 %v10458_v30  ;;  %v10531_v27 = vld [vmem:[%s13707_s16 + $0x20c] ss:$16 sps:$4 sm:$0xff]   ;;  %v10459_v36 = vld [vmem:[%s13706_s1 + $0x158] ss:$12 sps:$4 sm:$0xff]  }
 0x59c   :  { %v10463_v30 = vld [vmem:[%s13706_s1 + $0x170] ss:$12 sps:$4 sm:$0xff]  }
 0x59e   :  { %6674 = vmatpush1.bf16.msra.mxu0 %v10453_v31  ;;  %7160 = vmatpush1.bf16.msra.mxu1 %v10456_v32  ;;  %v10467_v31 = vld [vmem:[%s13706_s1 + $0x188] ss:$12 sps:$4 sm:$0xff]   ;;  %v10474_v32 = vld [vmem:[%s13706_s1 + $0x1a0] ss:$12 sps:$4 sm:$0xff]  }
 0x59f   :  { %6675 = vmatprep.subr.bf16.mxu0 %v10462_v33  ;;  %7161 = vmatprep.subr.bf16.mxu1 %v10466_v34  ;;  %v10481_v33 = vld [vmem:[%s13706_s1 + $0x1b8] ss:$12 sps:$4 sm:$0xff]   ;;  %v10485_v34 = vld [vmem:[%s13706_s1 + $0x1d0] ss:$12 sps:$4 sm:$0xff]  }
 0x5a0   :  { %4955 = vmatmul.mubr.bf16.gmra.mrb[40].mxu0 %v10412_v35  ;;  %5441 = vmatmul.mubr.bf16.gmra.mrb[40].mxu1 %v10412_v35  ;;  %v10492_v35 = vld [vmem:[%s13706_s1 + $0x1e8] ss:$12 sps:$4 sm:$0xff]  }
 0x5a1   :  { %4964 = vmatprep.mubr.bf16.mxu0 %v10681_v22  ;;  %5450 = vmatprep.mubr.bf16.mxu1 %v10681_v22 }
 0x5a2   :  { %6676 = vmatpush1.bf16.msra.mxu0 %v10460_v61  ;;  %7162 = vmatpush1.bf16.msra.mxu1 %v10464_v38  ;;  %v3811_v61 = vld [vmem:[%s13710_s15] sm:$0xf] }
 0x5a3   :  { %6677 = vmatprep.subr.bf16.mxu0 %v10470_v39  ;;  %7163 = vmatprep.subr.bf16.mxu1 %v10473_v40  ;;  %v12895_v38 = vrot.slane %v3811_v61, %v11154_v25  ;;  %v12898_v39 = vrot.slane %v3811_v61, %v11157_v26  ;;  %v12901_v40 = vrot.slane %v3811_v61, %v11163_v28 }
 0x5a6   :  { %6678 = vmatpush1.bf16.msra.mxu0 %v10468_v41  ;;  %7164 = vmatpush1.bf16.msra.mxu1 %v10471_v42 }
 0x5a7   :  { %6679 = vmatprep.subr.bf16.mxu0 %v10477_v57  ;;  %7165 = vmatprep.subr.bf16.mxu1 %v10480_v43 }
 0x5a8   :  { %4965 = vmatmul.mubr.bf16.gmra.mrb[44].mxu0 %v10413_v63  ;;  %5451 = vmatmul.mubr.bf16.gmra.mrb[44].mxu1 %v10413_v63 }
 0x5a9   :  { %4974 = vmatprep.mubr.bf16.mxu0 %v10681_v22  ;;  %5460 = vmatprep.mubr.bf16.mxu1 %v10681_v22 }
 0x5aa   :  { %6680 = vmatpush1.bf16.msra.mxu0 %v10475_v59  ;;  %7166 = vmatpush1.bf16.msra.mxu1 %v10478_v44 }
 0x5ab   :  { %6681 = vmatprep.subr.bf16.mxu0 %v10484_v45  ;;  %7167 = vmatprep.subr.bf16.mxu1 %v10488_v46 }
 0x5ae   :  { %6682 = vmatpush1.bf16.msra.mxu0 %v10482_v47  ;;  %7168 = vmatpush1.bf16.msra.mxu1 %v10486_v48 }
 0x5af   :  { %6683 = vmatprep.subr.bf16.mxu0 %v10491_v49  ;;  %7169 = vmatprep.subr.bf16.mxu1 %v10495_v50 }
 0x5b0   :  { %4975 = vmatmul.mubr.bf16.gmra.mrb[48].mxu0 %v10414_v51  ;;  %5461 = vmatmul.mubr.bf16.gmra.mrb[48].mxu1 %v10414_v51 }
 0x5b1   :  { %4984 = vmatprep.mubr.bf16.mxu0 %v10681_v22  ;;  %5470 = vmatprep.mubr.bf16.mxu1 %v10681_v22 }
 0x5b2   :  { %6684 = vmatpush1.bf16.msra.mxu0 %v10489_v52  ;;  %7170 = vmatpush1.bf16.msra.mxu1 %v10493_v53 }
 0x5b3   :  { %6685 = vmatprep.subr.bf16.mxu0 %v10498_v54  ;;  %7171 = vmatprep.subr.bf16.mxu1 %v10501_v55 }
 0x5b6   :  { %6686 = vmatpush1.bf16.msra.mxu0 %v10496_v56  ;;  %7172 = vmatpush1.bf16.msra.mxu1 %v10499_v58 }
 0x5b7   :  { %6687 = vmatprep.subr.bf16.mxu0 %v10504_v60  ;;  %7173 = vmatprep.subr.bf16.mxu1 %v10507_v62 }
 0x5b8   :  { %4985 = vmatmul.mubr.bf16.gmra.mrb[52].mxu0 %v10415_v0  ;;  %5471 = vmatmul.mubr.bf16.gmra.mrb[52].mxu1 %v10415_v0 }
 0x5b9   :  { %4994 = vmatprep.mubr.bf16.mxu0 %v10681_v22  ;;  %5480 = vmatprep.mubr.bf16.mxu1 %v10681_v22 }
 0x5ba   :  { %6688 = vmatpush1.bf16.msra.mxu0 %v10502_v1  ;;  %7174 = vmatpush1.bf16.msra.mxu1 %v10505_v2 }
 0x5bb   :  { %6689 = vmatprep.subr.bf16.mxu0 %v10510_v3  ;;  %7175 = vmatprep.subr.bf16.mxu1 %v10513_v4 }
 0x5be   :  { %6690 = vmatpush1.bf16.msra.mxu0 %v10508_v5  ;;  %7176 = vmatpush1.bf16.msra.mxu1 %v10511_v6 }
 0x5bf   :  { %6691 = vmatprep.subr.bf16.mxu0 %v10516_v7  ;;  %7177 = vmatprep.subr.bf16.mxu1 %v10519_v8  ;;  %v10526_v8 = vld [vmem:[%s13707_s16 + $0x200] ss:$16 sps:$4 sm:$0xff]  }
 0x5c0   :  { %4995 = vmatmul.mubr.bf16.gmra.mrb[56].mxu0 %v10419_v9  ;;  %5481 = vmatmul.mubr.bf16.gmra.mrb[56].mxu1 %v10419_v9  ;;  %v10529_v9 = vld [vmem:[%s13707_s16 + $0x208] ss:$16 sps:$4 sm:$0xff]  }
 0x5c1   :  { %5004 = vmatprep.mubr.bf16.mxu0 %v10681_v22  ;;  %5490 = vmatprep.mubr.bf16.mxu1 %v10681_v22 }
 0x5c2   :  { %6692 = vmatpush1.bf16.msra.mxu0 %v10514_v10  ;;  %7178 = vmatpush1.bf16.msra.mxu1 %v10517_v11 }
 0x5c3   :  { %6693 = vmatprep.subr.bf16.mxu0 %v10522_v17  ;;  %7179 = vmatprep.subr.bf16.mxu1 %v10525_v18 }
 0x5c6   :  { %6694 = vmatpush1.bf16.msra.mxu0 %v10520_v16  ;;  %7180 = vmatpush1.bf16.msra.mxu1 %v10523_v19 }
 0x5c7   :  { %6906 = vmatprep.subr.bf16.mxu0 %v10528_v21  ;;  %7392 = vmatprep.subr.bf16.mxu1 %v10531_v27 }
 0x5c8   :  { %5005 = vmatmul.mubr.bf16.gmra.mrb[60].mxu0 %v10423_v12  ;;  %5491 = vmatmul.mubr.bf16.gmra.mrb[60].mxu1 %v10423_v12 }
 0x5c9   :  { %5014 = vmatprep.mubr.bf16.mxu0 %v10681_v22  ;;  %5500 = vmatprep.mubr.bf16.mxu1 %v10681_v22 }
 0x5d0   :  { %5015 = vmatmul.mubr.bf16.gmra.mrb[64].mxu0 %v10430_v13  ;;  %5501 = vmatmul.mubr.bf16.gmra.mrb[64].mxu1 %v10430_v13 }
 0x5d1   :  { %5024 = vmatprep.mubr.bf16.mxu0 %v10681_v22  ;;  %5510 = vmatprep.mubr.bf16.mxu1 %v10681_v22 }
 0x5d8   :  { %5025 = vmatmul.mubr.bf16.gmra.mrb[68].mxu0 %v10437_v14  ;;  %5511 = vmatmul.mubr.bf16.gmra.mrb[68].mxu1 %v10437_v14  ;;  %v10534_v14 = vld [vmem:[%s13707_s16 + $0x224] ss:$16 sps:$4 sm:$0xff]  }
 0x5d9   :  { %5034 = vmatprep.mubr.bf16.mxu0 %v10681_v22  ;;  %5520 = vmatprep.mubr.bf16.mxu1 %v10681_v22 }
 0x5e0   :  { %5035 = vmatmul.mubr.bf16.gmra.mrb[72].mxu0 %v10441_v15  ;;  %5521 = vmatmul.mubr.bf16.gmra.mrb[72].mxu1 %v10441_v15  ;;  %v10537_v15 = vld [vmem:[%s13707_s16 + $0x22c] ss:$16 sps:$4 sm:$0xff]  }
 0x5e1   :  { %5044 = vmatprep.mubr.bf16.mxu0 %v10681_v22  ;;  %5530 = vmatprep.mubr.bf16.mxu1 %v10681_v22 }
 0x5e8   :  { %5045 = vmatmul.mubr.bf16.gmra.mrb[76].mxu0 %v10445_v20  ;;  %5531 = vmatmul.mubr.bf16.gmra.mrb[76].mxu1 %v10445_v20 }
 0x5e9   :  { %5054 = vmatprep.mubr.bf16.mxu0 %v10681_v22  ;;  %5540 = vmatprep.mubr.bf16.mxu1 %v10681_v22 }
 0x5f0   :  { %5055 = vmatmul.mubr.bf16.gmra.mrb[80].mxu0 %v10452_v23  ;;  %5541 = vmatmul.mubr.bf16.gmra.mrb[80].mxu1 %v10452_v23 }
 0x5f1   :  { %5064 = vmatprep.mubr.bf16.mxu0 %v10681_v22  ;;  %5550 = vmatprep.mubr.bf16.mxu1 %v10681_v22 }
 0x5f8   :  { %5065 = vmatmul.mubr.bf16.gmra.mrb[84].mxu0 %v10459_v36  ;;  %5551 = vmatmul.mubr.bf16.gmra.mrb[84].mxu1 %v10459_v36 }
 0x5f9   :  { %5074 = vmatprep.mubr.bf16.mxu0 %v10681_v22  ;;  %5560 = vmatprep.mubr.bf16.mxu1 %v10681_v22 }
 0x600   :  { %5075 = vmatmul.mubr.bf16.gmra.mrb[88].mxu0 %v10463_v30  ;;  %5561 = vmatmul.mubr.bf16.gmra.mrb[88].mxu1 %v10463_v30 }
 0x601   :  { %5084 = vmatprep.mubr.bf16.mxu0 %v10681_v22  ;;  %5570 = vmatprep.mubr.bf16.mxu1 %v10681_v22 }
 0x608   :  { %5085 = vmatmul.mubr.bf16.gmra.mrb[92].mxu0 %v10467_v31  ;;  %5571 = vmatmul.mubr.bf16.gmra.mrb[92].mxu1 %v10467_v31  ;;  %v10532_v31 = vld [vmem:[%s13707_s16 + $0x220] ss:$16 sps:$4 sm:$0xff]  }
 0x609   :  { %5094 = vmatprep.mubr.bf16.mxu0 %v10681_v22  ;;  %5580 = vmatprep.mubr.bf16.mxu1 %v10681_v22 }
 0x610   :  { %5095 = vmatmul.mubr.bf16.gmra.mrb[96].mxu0 %v10474_v32  ;;  %5581 = vmatmul.mubr.bf16.gmra.mrb[96].mxu1 %v10474_v32  ;;  %v10535_v32 = vld [vmem:[%s13707_s16 + $0x228] ss:$16 sps:$4 sm:$0xff]  }
 0x611   :  { %5104 = vmatprep.mubr.bf16.mxu0 %v10681_v22  ;;  %5590 = vmatprep.mubr.bf16.mxu1 %v10681_v22 }
 0x618   :  { %5105 = vmatmul.mubr.bf16.gmra.mrb[100].mxu0 %v10481_v33  ;;  %5591 = vmatmul.mubr.bf16.gmra.mrb[100].mxu1 %v10481_v33  ;;  %v10540_v33 = vld [vmem:[%s13707_s16 + $0x244] ss:$16 sps:$4 sm:$0xff]  }
 0x619   :  { %5114 = vmatprep.mubr.bf16.mxu0 %v10681_v22  ;;  %5600 = vmatprep.mubr.bf16.mxu1 %v10681_v22 }
 0x620   :  { %5115 = vmatmul.mubr.bf16.gmra.mrb[104].mxu0 %v10485_v34  ;;  %5601 = vmatmul.mubr.bf16.gmra.mrb[104].mxu1 %v10485_v34 }
 0x621   :  { %5124 = vmatprep.mubr.bf16.mxu0 %v10681_v22  ;;  %5610 = vmatprep.mubr.bf16.mxu1 %v10681_v22  ;;  %v12904_v22 = vrot.slane %v3811_v61, %v11166_v29 }
 0x628   :  { %5125 = vmatmul.mubr.bf16.gmra.mrb[108].mxu0 %v10492_v35  ;;  %5611 = vmatmul.mubr.bf16.gmra.mrb[108].mxu1 %v10492_v35 }
 0x65b   :  { %v4926_v41 = vpop.f32.mrb[28].mxu0  ;;  %v5412_v42 = vpop.f32.mrb[28].mxu1 }
 0x65c   :  { %v9030_v57 = vadd.f32 %v4926_v41, %v12895_v38  ;;  %v9114_v43 = vadd.f32 %v5412_v42, %v12898_v39  ;;  %v4928_v63 = vpop.f32.mrb[29].mxu0  ;;  %v5414_v59 = vpop.f32.mrb[29].mxu1  ;;  %v10543_v42 = vld [vmem:[%s13707_s16 + $0x24c] ss:$16 sps:$4 sm:$0xff]  }
 0x65d   :  { %v9031_v44 = vadd.f32 %v4928_v63, %v12901_v40  ;;  %v9115_v45 = vadd.f32 %v5414_v59, %v12904_v22  ;;  %v4930_v46 = vpop.f32.mrb[30].mxu0  ;;  %v5416_v47 = vpop.f32.mrb[30].mxu1 }
 0x65e   :  { %v9032_v48 = vadd.f32 %v4930_v46, %v12895_v38  ;;  %v9116_v49 = vadd.f32 %v5416_v47, %v12898_v39  ;;  %v4932_v50 = vpop.f32.mrb[31].mxu0  ;;  %v5418_v51 = vpop.f32.mrb[31].mxu1  ;;  %v5621_v54 = vmax.f32 %v9030_v57, 0.0  ;;  %v5623_v55 = vmax.f32 %v9114_v43, 0.0 }
 0x65f   :  { %v9033_v52 = vadd.f32 %v4932_v50, %v12901_v40  ;;  %v9117_v53 = vadd.f32 %v5418_v51, %v12904_v22  ;;  %v5622_v60 = vmax.f32 %v9031_v44, 0.0  ;;  %v5624_v62 = vmax.f32 %v9115_v45, 0.0  ;;  %v10538_v50 = vld [vmem:[%s13707_s16 + $0x240] ss:$16 sps:$4 sm:$0xff]   ;;  %v10541_v51 = vld [vmem:[%s13707_s16 + $0x248] ss:$16 sps:$4 sm:$0xff]  }
 0x660   :  { %v5625_v56 = vmax.f32 %v9032_v48, 0.0  ;;  %v5627_v58 = vmax.f32 %v9116_v49, 0.0 }
 0x661   :  { %v5626_v0 = vmax.f32 %v9033_v52, 0.0  ;;  %v5628_v1 = vmax.f32 %v9117_v53, 0.0 }
 0x662   :  { %v5789_v2 = vpack.c.bf16 %v5625_v56, %v5621_v54  ;;  %v12914_v3 = vpack.c.bf16 %v5627_v58, %v5623_v55  ;;  %v10546_v56 = vld [vmem:[%s13707_s16 + $0x264] ss:$16 sps:$4 sm:$0xff]   ;;  %v10549_v58 = vld [vmem:[%s13707_s16 + $0x26c] ss:$16 sps:$4 sm:$0xff]  }
 0x663   :  { %v5790_v4 = vpack.c.bf16 %v5626_v0, %v5622_v60  ;;  %v12916_v5 = vpack.c.bf16 %v5628_v1, %v5624_v62  ;;  %v4936_v6 = vpop.f32.mrb[32].mxu0  ;;  %v5422_v7 = vpop.f32.mrb[32].mxu1 }
 0x664   :  { %v9034_v10 = vadd.f32 %v4936_v6, %v12895_v38  ;;  %v9118_v11 = vadd.f32 %v5422_v7, %v12898_v39  ;;  %v4938_v12 = vpop.f32.mrb[33].mxu0  ;;  %v5424_v13 = vpop.f32.mrb[33].mxu1 }
 0x665   :  { %v9035_v16 = vadd.f32 %v4938_v12, %v12901_v40  ;;  %v9119_v17 = vadd.f32 %v5424_v13, %v12904_v22  ;;  %v4940_v18 = vpop.f32.mrb[34].mxu0  ;;  %v5426_v19 = vpop.f32.mrb[34].mxu1  ;;  %6695 = vmatprep.mubr.bf16.mxu0 %v5790_v4  ;;  %7181 = vmatprep.mubr.bf16.mxu1 %v5790_v4  ;;  %v10552_v12 = vld [vmem:[%s13707_s16 + $0x284] ss:$16 sps:$4 sm:$0xff]  }
 0x666   :  { %v9036_v20 = vadd.f32 %v4940_v18, %v12895_v38  ;;  %v9120_v21 = vadd.f32 %v5426_v19, %v12898_v39  ;;  %v4942_v23 = vpop.f32.mrb[35].mxu0  ;;  %v5428_v27 = vpop.f32.mrb[35].mxu1  ;;  %6696 = vmatmul.mubr.bf16.vlgmr.msra.gmra.mrb[112].mxu0 %v5789_v2  ;;  %7182 = vmatmul.mubr.bf16.vlgmr.msra.gmra.mrb[112].mxu1 %v5789_v2  ;;  %v5629_v34 = vmax.f32 %v9034_v10, 0.0  ;;  %v5631_v35 = vmax.f32 %v9118_v11, 0.0  ;;  %v10544_v10 = vld [vmem:[%s13707_s16 + $0x260] ss:$16 sps:$4 sm:$0xff]  }
 0x667   :  { %v9037_v36 = vadd.f32 %v4942_v23, %v12901_v40  ;;  %v9121_v30 = vadd.f32 %v5428_v27, %v12904_v22  ;;  %6907 = vmatpush1.bf16.msra.mxu0 %v10526_v8  ;;  %7393 = vmatpush1.bf16.msra.mxu1 %v10529_v9  ;;  %v5630_v57 = vmax.f32 %v9035_v16, 0.0  ;;  %v5632_v43 = vmax.f32 %v9119_v17, 0.0  ;;  %v10547_v11 = vld [vmem:[%s13707_s16 + $0x268] ss:$16 sps:$4 sm:$0xff]   ;;  %v10555_v17 = vld [vmem:[%s13707_s16 + $0x28c] ss:$16 sps:$4 sm:$0xff]  }
 0x668   :  { %v5633_v61 = vmax.f32 %v9036_v20, 0.0  ;;  %v5635_v41 = vmax.f32 %v9120_v21, 0.0  ;;  %6908 = vmatprep.subr.bf16.mxu0 %v10534_v14  ;;  %7394 = vmatprep.subr.bf16.mxu1 %v10537_v15 }
 0x669   :  { %v5634_v63 = vmax.f32 %v9037_v36, 0.0  ;;  %v5636_v59 = vmax.f32 %v9121_v30, 0.0 }
 0x66a   :  { %v5793_v44 = vpack.c.bf16 %v5633_v61, %v5629_v34  ;;  %v12950_v45 = vpack.c.bf16 %v5635_v41, %v5631_v35  ;;  %v10553_v34 = vld [vmem:[%s13707_s16 + $0x288] ss:$16 sps:$4 sm:$0xff]  }
 0x66b   :  { %v5794_v46 = vpack.c.bf16 %v5634_v63, %v5630_v57  ;;  %v12952_v47 = vpack.c.bf16 %v5636_v59, %v5632_v43  ;;  %v4946_v48 = vpop.f32.mrb[36].mxu0  ;;  %v5432_v49 = vpop.f32.mrb[36].mxu1  ;;  %6909 = vmatpush1.bf16.msra.mxu0 %v10532_v31  ;;  %7395 = vmatpush1.bf16.msra.mxu1 %v10535_v32  ;;  %v10558_v57 = vld [vmem:[%s13707_s16 + $0x2a4] ss:$16 sps:$4 sm:$0xff]   ;;  %v10561_v43 = vld [vmem:[%s13707_s16 + $0x2ac] ss:$16 sps:$4 sm:$0xff]  }
 0x66c   :  { %v9038_v52 = vadd.f32 %v4946_v48, %v12895_v38  ;;  %v9122_v53 = vadd.f32 %v5432_v49, %v12898_v39  ;;  %v4948_v54 = vpop.f32.mrb[37].mxu0  ;;  %v5434_v55 = vpop.f32.mrb[37].mxu1  ;;  %6910 = vmatprep.subr.bf16.mxu0 %v10540_v33  ;;  %7396 = vmatprep.subr.bf16.mxu1 %v10543_v42  ;;  %v10550_v33 = vld [vmem:[%s13707_s16 + $0x280] ss:$16 sps:$4 sm:$0xff]  }
 0x66d   :  { %v9039_v60 = vadd.f32 %v4948_v54, %v12901_v40  ;;  %v9123_v62 = vadd.f32 %v5434_v55, %v12904_v22  ;;  %v4950_v0 = vpop.f32.mrb[38].mxu0  ;;  %v5436_v1 = vpop.f32.mrb[38].mxu1  ;;  %6705 = vmatprep.mubr.bf16.mxu0 %v5794_v46  ;;  %7191 = vmatprep.mubr.bf16.mxu1 %v5794_v46  ;;  %v10556_v54 = vld [vmem:[%s13707_s16 + $0x2a0] ss:$16 sps:$4 sm:$0xff]   ;;  %v10559_v55 = vld [vmem:[%s13707_s16 + $0x2a8] ss:$16 sps:$4 sm:$0xff]  }
 0x66e   :  { %v9040_v2 = vadd.f32 %v4950_v0, %v12895_v38  ;;  %v9124_v4 = vadd.f32 %v5436_v1, %v12898_v39  ;;  %v4952_v6 = vpop.f32.mrb[39].mxu0  ;;  %v5438_v7 = vpop.f32.mrb[39].mxu1  ;;  %6706 = vmatmul.mubr.bf16.gmra.mrb[116].mxu0 %v5793_v44  ;;  %7192 = vmatmul.mubr.bf16.gmra.mrb[116].mxu1 %v5793_v44  ;;  %v5637_v13 = vmax.f32 %v9038_v52, 0.0  ;;  %v5639_v14 = vmax.f32 %v9122_v53, 0.0  ;;  %v10567_v1 = vld [vmem:[%s13707_s16 + $0x2cc] ss:$16 sps:$4 sm:$0xff]  }
 0x66f   :  { %v9041_v8 = vadd.f32 %v4952_v6, %v12901_v40  ;;  %v9125_v9 = vadd.f32 %v5438_v7, %v12904_v22  ;;  %6911 = vmatpush1.bf16.msra.mxu0 %v10538_v50  ;;  %7397 = vmatpush1.bf16.msra.mxu1 %v10541_v51  ;;  %v5638_v18 = vmax.f32 %v9039_v60, 0.0  ;;  %v5640_v19 = vmax.f32 %v9123_v62, 0.0 }
 0x670   :  { %v5641_v15 = vmax.f32 %v9040_v2, 0.0  ;;  %v5643_v16 = vmax.f32 %v9124_v4, 0.0  ;;  %6912 = vmatprep.subr.bf16.mxu0 %v10546_v56  ;;  %7398 = vmatprep.subr.bf16.mxu1 %v10549_v58  ;;  %v10564_v56 = vld [vmem:[%s13707_s16 + $0x2c4] ss:$16 sps:$4 sm:$0xff]  }
 0x671   :  { %v5642_v20 = vmax.f32 %v9041_v8, 0.0  ;;  %v5644_v21 = vmax.f32 %v9125_v9, 0.0 }
 0x672   :  { %v5797_v23 = vpack.c.bf16 %v5641_v15, %v5637_v13  ;;  %v12986_v27 = vpack.c.bf16 %v5643_v16, %v5639_v14  ;;  %v10562_v14 = vld [vmem:[%s13707_s16 + $0x2c0] ss:$16 sps:$4 sm:$0xff]   ;;  %v10565_v15 = vld [vmem:[%s13707_s16 + $0x2c8] ss:$16 sps:$4 sm:$0xff]  }
 0x673   :  { %v5798_v36 = vpack.c.bf16 %v5642_v20, %v5638_v18  ;;  %v12988_v30 = vpack.c.bf16 %v5644_v21, %v5640_v19  ;;  %v4956_v31 = vpop.f32.mrb[40].mxu0  ;;  %v5442_v32 = vpop.f32.mrb[40].mxu1  ;;  %6913 = vmatpush1.bf16.msra.mxu0 %v10544_v10  ;;  %7399 = vmatpush1.bf16.msra.mxu1 %v10547_v11  ;;  %v10570_v20 = vld [vmem:[%s13707_s16 + $0x2e4] ss:$16 sps:$4 sm:$0xff]   ;;  %v10573_v21 = vld [vmem:[%s13707_s16 + $0x2ec] ss:$16 sps:$4 sm:$0xff]  }
 0x674   :  { %v9042_v35 = vadd.f32 %v4956_v31, %v12895_v38  ;;  %v9126_v61 = vadd.f32 %v5442_v32, %v12898_v39  ;;  %v4958_v41 = vpop.f32.mrb[41].mxu0  ;;  %v5444_v42 = vpop.f32.mrb[41].mxu1  ;;  %6914 = vmatprep.subr.bf16.mxu0 %v10552_v12  ;;  %7400 = vmatprep.subr.bf16.mxu1 %v10555_v17 }
 0x675   :  { %v9043_v63 = vadd.f32 %v4958_v41, %v12901_v40  ;;  %v9127_v59 = vadd.f32 %v5444_v42, %v12904_v22  ;;  %v4960_v44 = vpop.f32.mrb[42].mxu0  ;;  %v5446_v46 = vpop.f32.mrb[42].mxu1  ;;  %6715 = vmatprep.mubr.bf16.mxu0 %v5798_v36  ;;  %7201 = vmatprep.mubr.bf16.mxu1 %v5798_v36 }
 0x676   :  { %v9044_v48 = vadd.f32 %v4960_v44, %v12895_v38  ;;  %v9128_v49 = vadd.f32 %v5446_v46, %v12898_v39  ;;  %v4962_v50 = vpop.f32.mrb[43].mxu0  ;;  %v5448_v51 = vpop.f32.mrb[43].mxu1  ;;  %6716 = vmatmul.mubr.bf16.gmra.mrb[120].mxu0 %v5797_v23  ;;  %7202 = vmatmul.mubr.bf16.gmra.mrb[120].mxu1 %v5797_v23  ;;  %v5645_v58 = vmax.f32 %v9042_v35, 0.0  ;;  %v5647_v60 = vmax.f32 %v9126_v61, 0.0 }
 0x677   :  { %v9045_v52 = vadd.f32 %v4962_v50, %v12901_v40  ;;  %v9129_v53 = vadd.f32 %v5448_v51, %v12904_v22  ;;  %6915 = vmatpush1.bf16.msra.mxu0 %v10550_v33  ;;  %7401 = vmatpush1.bf16.msra.mxu1 %v10553_v34  ;;  %v5646_v2 = vmax.f32 %v9043_v63, 0.0  ;;  %v5648_v4 = vmax.f32 %v9127_v59, 0.0  ;;  %v10576_v63 = vld [vmem:[%s13707_s16 + $0x304] ss:$16 sps:$4 sm:$0xff]  }
 0x678   :  { %v5649_v62 = vmax.f32 %v9044_v48, 0.0  ;;  %v5651_v0 = vmax.f32 %v9128_v49, 0.0  ;;  %6916 = vmatprep.subr.bf16.mxu0 %v10558_v57  ;;  %7402 = vmatprep.subr.bf16.mxu1 %v10561_v43  ;;  %v10568_v57 = vld [vmem:[%s13707_s16 + $0x2e0] ss:$16 sps:$4 sm:$0xff]   ;;  %v10571_v43 = vld [vmem:[%s13707_s16 + $0x2e8] ss:$16 sps:$4 sm:$0xff]  }
 0x679   :  { %v5650_v6 = vmax.f32 %v9045_v52, 0.0  ;;  %v5652_v7 = vmax.f32 %v9129_v53, 0.0  ;;  %v10579_v49 = vld [vmem:[%s13707_s16 + $0x30c] ss:$16 sps:$4 sm:$0xff]  }
 0x67a   :  { %v5801_v8 = vpack.c.bf16 %v5649_v62, %v5645_v58  ;;  %v13022_v9 = vpack.c.bf16 %v5651_v0, %v5647_v60  ;;  %v10574_v0 = vld [vmem:[%s13707_s16 + $0x300] ss:$16 sps:$4 sm:$0xff]  }
 0x67b   :  { %v5802_v10 = vpack.c.bf16 %v5650_v6, %v5646_v2  ;;  %v13024_v11 = vpack.c.bf16 %v5652_v7, %v5648_v4  ;;  %v4966_v12 = vpop.f32.mrb[44].mxu0  ;;  %v5452_v13 = vpop.f32.mrb[44].mxu1  ;;  %6917 = vmatpush1.bf16.msra.mxu0 %v10556_v54  ;;  %7403 = vmatpush1.bf16.msra.mxu1 %v10559_v55 }
 0x67c   :  { %v9046_v16 = vadd.f32 %v4966_v12, %v12895_v38  ;;  %v9130_v17 = vadd.f32 %v5452_v13, %v12898_v39  ;;  %v4968_v18 = vpop.f32.mrb[45].mxu0  ;;  %v5454_v19 = vpop.f32.mrb[45].mxu1  ;;  %6918 = vmatprep.subr.bf16.mxu0 %v10564_v56  ;;  %7404 = vmatprep.subr.bf16.mxu1 %v10567_v1  ;;  %v10577_v1 = vld [vmem:[%s13707_s16 + $0x308] ss:$16 sps:$4 sm:$0xff]  }
 0x67d   :  { %v9047_v23 = vadd.f32 %v4968_v18, %v12901_v40  ;;  %v9131_v36 = vadd.f32 %v5454_v19, %v12904_v22  ;;  %v4970_v31 = vpop.f32.mrb[46].mxu0  ;;  %v5456_v32 = vpop.f32.mrb[46].mxu1  ;;  %6725 = vmatprep.mubr.bf16.mxu0 %v5802_v10  ;;  %7211 = vmatprep.mubr.bf16.mxu1 %v5802_v10  ;;  %v10585_v10 = vld [vmem:[%s13707_s16 + $0x32c] ss:$16 sps:$4 sm:$0xff]  }
 0x67e   :  { %v9048_v33 = vadd.f32 %v4970_v31, %v12895_v38  ;;  %v9132_v34 = vadd.f32 %v5456_v32, %v12898_v39  ;;  %v4972_v35 = vpop.f32.mrb[47].mxu0  ;;  %v5458_v61 = vpop.f32.mrb[47].mxu1  ;;  %6726 = vmatmul.mubr.bf16.gmra.mrb[124].mxu0 %v5801_v8  ;;  %7212 = vmatmul.mubr.bf16.gmra.mrb[124].mxu1 %v5801_v8  ;;  %v5653_v59 = vmax.f32 %v9046_v16, 0.0  ;;  %v5655_v44 = vmax.f32 %v9130_v17, 0.0  ;;  %v10582_v8 = vld [vmem:[%s13707_s16 + $0x324] ss:$16 sps:$4 sm:$0xff]  }
 0x67f   :  { %v9049_v41 = vadd.f32 %v4972_v35, %v12901_v40  ;;  %v9133_v42 = vadd.f32 %v5458_v61, %v12904_v22  ;;  %6919 = vmatpush1.bf16.msra.mxu0 %v10562_v14  ;;  %7405 = vmatpush1.bf16.msra.mxu1 %v10565_v15  ;;  %v5654_v50 = vmax.f32 %v9047_v23, 0.0  ;;  %v5656_v51 = vmax.f32 %v9131_v36, 0.0  ;;  %v10580_v23 = vld [vmem:[%s13707_s16 + $0x320] ss:$16 sps:$4 sm:$0xff]   ;;  %v10583_v36 = vld [vmem:[%s13707_s16 + $0x328] ss:$16 sps:$4 sm:$0xff]  }
 0x680   :  { %v5657_v46 = vmax.f32 %v9048_v33, 0.0  ;;  %v5659_v48 = vmax.f32 %v9132_v34, 0.0  ;;  %6920 = vmatprep.subr.bf16.mxu0 %v10570_v20  ;;  %7406 = vmatprep.subr.bf16.mxu1 %v10573_v21  ;;  %v10588_v31 = vld [vmem:[%s13707_s16 + $0x344] ss:$16 sps:$4 sm:$0xff]   ;;  %v10591_v61 = vld [vmem:[%s13707_s16 + $0x34c] ss:$16 sps:$4 sm:$0xff]  }
 0x681   :  { %v5658_v52 = vmax.f32 %v9049_v41, 0.0  ;;  %v5660_v53 = vmax.f32 %v9133_v42, 0.0 }
 0x682   :  { %v5805_v54 = vpack.c.bf16 %v5657_v46, %v5653_v59  ;;  %v13058_v55 = vpack.c.bf16 %v5659_v48, %v5655_v44 }
 0x683   :  { %v5806_v56 = vpack.c.bf16 %v5658_v52, %v5654_v50  ;;  %v13060_v58 = vpack.c.bf16 %v5660_v53, %v5656_v51  ;;  %v4976_v60 = vpop.f32.mrb[48].mxu0  ;;  %v5462_v62 = vpop.f32.mrb[48].mxu1  ;;  %6921 = vmatpush1.bf16.msra.mxu0 %v10568_v57  ;;  %7407 = vmatpush1.bf16.msra.mxu1 %v10571_v43  ;;  %v10586_v50 = vld [vmem:[%s13707_s16 + $0x340] ss:$16 sps:$4 sm:$0xff]   ;;  %v10589_v51 = vld [vmem:[%s13707_s16 + $0x348] ss:$16 sps:$4 sm:$0xff]  }
 0x684   :  { %v9050_v2 = vadd.f32 %v4976_v60, %v12895_v38  ;;  %v9134_v4 = vadd.f32 %v5462_v62, %v12898_v39  ;;  %v4978_v6 = vpop.f32.mrb[49].mxu0  ;;  %v5464_v7 = vpop.f32.mrb[49].mxu1  ;;  %6922 = vmatprep.subr.bf16.mxu0 %v10576_v63  ;;  %7408 = vmatprep.subr.bf16.mxu1 %v10579_v49  ;;  %v10594_v60 = vld [vmem:[%s13707_s16 + $0x364] ss:$16 sps:$4 sm:$0xff]   ;;  %v10597_v62 = vld [vmem:[%s13707_s16 + $0x36c] ss:$16 sps:$4 sm:$0xff]  }
 0x685   :  { %v9051_v12 = vadd.f32 %v4978_v6, %v12901_v40  ;;  %v9135_v13 = vadd.f32 %v5464_v7, %v12904_v22  ;;  %v4980_v14 = vpop.f32.mrb[50].mxu0  ;;  %v5466_v15 = vpop.f32.mrb[50].mxu1  ;;  %6735 = vmatprep.mubr.bf16.mxu0 %v5806_v56  ;;  %7221 = vmatprep.mubr.bf16.mxu1 %v5806_v56 }
 0x686   :  { %v9052_v16 = vadd.f32 %v4980_v14, %v12895_v38  ;;  %v9136_v17 = vadd.f32 %v5466_v15, %v12898_v39  ;;  %v4982_v18 = vpop.f32.mrb[51].mxu0  ;;  %v5468_v19 = vpop.f32.mrb[51].mxu1  ;;  %6736 = vmatmul.mubr.bf16.gmra.mrb[128].mxu0 %v5805_v54  ;;  %7222 = vmatmul.mubr.bf16.gmra.mrb[128].mxu1 %v5805_v54  ;;  %v5661_v32 = vmax.f32 %v9050_v2, 0.0  ;;  %v5663_v33 = vmax.f32 %v9134_v4, 0.0  ;;  %v10592_v14 = vld [vmem:[%s13707_s16 + $0x360] ss:$16 sps:$4 sm:$0xff]  }
 0x687   :  { %v9053_v20 = vadd.f32 %v4982_v18, %v12901_v40  ;;  %v9137_v21 = vadd.f32 %v5468_v19, %v12904_v22  ;;  %6923 = vmatpush1.bf16.msra.mxu0 %v10574_v0  ;;  %7409 = vmatpush1.bf16.msra.mxu1 %v10577_v1  ;;  %v5662_v41 = vmax.f32 %v9051_v12, 0.0  ;;  %v5664_v42 = vmax.f32 %v9135_v13, 0.0  ;;  %v10595_v15 = vld [vmem:[%s13707_s16 + $0x368] ss:$16 sps:$4 sm:$0xff]  }
 0x688   :  { %v5665_v34 = vmax.f32 %v9052_v16, 0.0  ;;  %v5667_v35 = vmax.f32 %v9136_v17, 0.0  ;;  %6924 = vmatprep.subr.bf16.mxu0 %v10582_v8  ;;  %7410 = vmatprep.subr.bf16.mxu1 %v10585_v10  ;;  %v10600_v16 = vld [vmem:[%s13707_s16 + $0x384] ss:$16 sps:$4 sm:$0xff]  }
 0x689   :  { %v5666_v57 = vmax.f32 %v9053_v20, 0.0  ;;  %v5668_v43 = vmax.f32 %v9137_v21, 0.0  ;;  %v10603_v21 = vld [vmem:[%s13707_s16 + $0x38c] ss:$16 sps:$4 sm:$0xff]  }
 0x68a   :  { %v5809_v63 = vpack.c.bf16 %v5665_v34, %v5661_v32  ;;  %v13094_v59 = vpack.c.bf16 %v5667_v35, %v5663_v33 }
 0x68b   :  { %v5810_v44 = vpack.c.bf16 %v5666_v57, %v5662_v41  ;;  %v13096_v46 = vpack.c.bf16 %v5668_v43, %v5664_v42  ;;  %v4986_v48 = vpop.f32.mrb[52].mxu0  ;;  %v5472_v49 = vpop.f32.mrb[52].mxu1  ;;  %6925 = vmatpush1.bf16.msra.mxu0 %v10580_v23  ;;  %7411 = vmatpush1.bf16.msra.mxu1 %v10583_v36  ;;  %v10598_v57 = vld [vmem:[%s13707_s16 + $0x380] ss:$16 sps:$4 sm:$0xff]   ;;  %v10601_v43 = vld [vmem:[%s13707_s16 + $0x388] ss:$16 sps:$4 sm:$0xff]  }
 0x68c   :  { %v9054_v52 = vadd.f32 %v4986_v48, %v12895_v38  ;;  %v9138_v53 = vadd.f32 %v5472_v49, %v12898_v39  ;;  %v4988_v54 = vpop.f32.mrb[53].mxu0  ;;  %v5474_v56 = vpop.f32.mrb[53].mxu1  ;;  %6926 = vmatprep.subr.bf16.mxu0 %v10588_v31  ;;  %7412 = vmatprep.subr.bf16.mxu1 %v10591_v61 }
 0x68d   :  { %v9055_v0 = vadd.f32 %v4988_v54, %v12901_v40  ;;  %v9139_v1 = vadd.f32 %v5474_v56, %v12904_v22  ;;  %v4990_v2 = vpop.f32.mrb[54].mxu0  ;;  %v5476_v4 = vpop.f32.mrb[54].mxu1  ;;  %6745 = vmatprep.mubr.bf16.mxu0 %v5810_v44  ;;  %7231 = vmatprep.mubr.bf16.mxu1 %v5810_v44 }
 0x68e   :  { %v9056_v6 = vadd.f32 %v4990_v2, %v12895_v38  ;;  %v9140_v7 = vadd.f32 %v5476_v4, %v12898_v39  ;;  %v4992_v8 = vpop.f32.mrb[55].mxu0  ;;  %v5478_v10 = vpop.f32.mrb[55].mxu1  ;;  %6746 = vmatmul.mubr.bf16.gmra.mrb[132].mxu0 %v5809_v63  ;;  %7232 = vmatmul.mubr.bf16.gmra.mrb[132].mxu1 %v5809_v63  ;;  %v5669_v17 = vmax.f32 %v9054_v52, 0.0  ;;  %v5671_v18 = vmax.f32 %v9138_v53, 0.0 }
 0x68f   :  { %v9057_v12 = vadd.f32 %v4992_v8, %v12901_v40  ;;  %v9141_v13 = vadd.f32 %v5478_v10, %v12904_v22  ;;  %6927 = vmatpush1.bf16.msra.mxu0 %v10586_v50  ;;  %7413 = vmatpush1.bf16.msra.mxu1 %v10589_v51  ;;  %v5670_v23 = vmax.f32 %v9055_v0, 0.0  ;;  %v5672_v36 = vmax.f32 %v9139_v1, 0.0  ;;  %v10606_v50 = vld [vmem:[%s13707_s16 + $0x3a4] ss:$16 sps:$4 sm:$0xff]   ;;  %v10609_v51 = vld [vmem:[%s13707_s16 + $0x3ac] ss:$16 sps:$4 sm:$0xff]  }
 0x690   :  { %v5673_v19 = vmax.f32 %v9056_v6, 0.0  ;;  %v5675_v20 = vmax.f32 %v9140_v7, 0.0  ;;  %6928 = vmatprep.subr.bf16.mxu0 %v10594_v60  ;;  %7414 = vmatprep.subr.bf16.mxu1 %v10597_v62  ;;  %v10604_v6 = vld [vmem:[%s13707_s16 + $0x3a0] ss:$16 sps:$4 sm:$0xff]   ;;  %v10607_v7 = vld [vmem:[%s13707_s16 + $0x3a8] ss:$16 sps:$4 sm:$0xff]  }
 0x691   :  { %v5674_v31 = vmax.f32 %v9057_v12, 0.0  ;;  %v5676_v32 = vmax.f32 %v9141_v13, 0.0  ;;  %v10612_v8 = vld [vmem:[%s13707_s16 + $0x3c4] ss:$16 sps:$4 sm:$0xff]  }
 0x692   :  { %v5813_v33 = vpack.c.bf16 %v5673_v19, %v5669_v17  ;;  %v13130_v34 = vpack.c.bf16 %v5675_v20, %v5671_v18 }
 0x693   :  { %v5814_v35 = vpack.c.bf16 %v5674_v31, %v5670_v23  ;;  %v13132_v61 = vpack.c.bf16 %v5676_v32, %v5672_v36  ;;  %v4996_v41 = vpop.f32.mrb[56].mxu0  ;;  %v5482_v42 = vpop.f32.mrb[56].mxu1  ;;  %6929 = vmatpush1.bf16.msra.mxu0 %v10592_v14  ;;  %7415 = vmatpush1.bf16.msra.mxu1 %v10595_v15  ;;  %v10615_v15 = vld [vmem:[%s13707_s16 + $0x3cc] ss:$16 sps:$4 sm:$0xff]  }
 0x694   :  { %v9058_v63 = vadd.f32 %v4996_v41, %v12895_v38  ;;  %v9142_v44 = vadd.f32 %v5482_v42, %v12898_v39  ;;  %v4998_v48 = vpop.f32.mrb[57].mxu0  ;;  %v5484_v49 = vpop.f32.mrb[57].mxu1  ;;  %6930 = vmatprep.subr.bf16.mxu0 %v10600_v16  ;;  %7416 = vmatprep.subr.bf16.mxu1 %v10603_v21 }
 0x695   :  { %v9059_v52 = vadd.f32 %v4998_v48, %v12901_v40  ;;  %v9143_v53 = vadd.f32 %v5484_v49, %v12904_v22  ;;  %v5000_v54 = vpop.f32.mrb[58].mxu0  ;;  %v5486_v56 = vpop.f32.mrb[58].mxu1  ;;  %6755 = vmatprep.mubr.bf16.mxu0 %v5814_v35  ;;  %7241 = vmatprep.mubr.bf16.mxu1 %v5814_v35  ;;  %v10613_v35 = vld [vmem:[%s13707_s16 + $0x3c8] ss:$16 sps:$4 sm:$0xff]  }
 0x696   :  { %v9060_v60 = vadd.f32 %v5000_v54, %v12895_v38  ;;  %v9144_v62 = vadd.f32 %v5486_v56, %v12898_v39  ;;  %v5002_v0 = vpop.f32.mrb[59].mxu0  ;;  %v5488_v1 = vpop.f32.mrb[59].mxu1  ;;  %6756 = vmatmul.mubr.bf16.gmra.mrb[136].mxu0 %v5813_v33  ;;  %7242 = vmatmul.mubr.bf16.gmra.mrb[136].mxu1 %v5813_v33  ;;  %v5677_v10 = vmax.f32 %v9058_v63, 0.0  ;;  %v5679_v12 = vmax.f32 %v9142_v44, 0.0  ;;  %v10610_v33 = vld [vmem:[%s13707_s16 + $0x3c0] ss:$16 sps:$4 sm:$0xff]  }
 0x697   :  { %v9061_v2 = vadd.f32 %v5002_v0, %v12901_v40  ;;  %v9145_v4 = vadd.f32 %v5488_v1, %v12904_v22  ;;  %6931 = vmatpush1.bf16.msra.mxu0 %v10598_v57  ;;  %7417 = vmatpush1.bf16.msra.mxu1 %v10601_v43  ;;  %v5678_v16 = vmax.f32 %v9059_v52, 0.0  ;;  %v5680_v17 = vmax.f32 %v9143_v53, 0.0  ;;  %v10618_v63 = vld [vmem:[%s13707_s16 + $0x3e4] ss:$16 sps:$4 sm:$0xff]   ;;  %v10621_v44 = vld [vmem:[%s13707_s16 + $0x3ec] ss:$16 sps:$4 sm:$0xff]  }
 0x698   :  { %v5681_v13 = vmax.f32 %v9060_v60, 0.0  ;;  %v5683_v14 = vmax.f32 %v9144_v62, 0.0  ;;  %6932 = vmatprep.subr.bf16.mxu0 %v10606_v50  ;;  %7418 = vmatprep.subr.bf16.mxu1 %v10609_v51  ;;  %v10616_v0 = vld [vmem:[%s13707_s16 + $0x3e0] ss:$16 sps:$4 sm:$0xff]   ;;  %v10619_v1 = vld [vmem:[%s13707_s16 + $0x3e8] ss:$16 sps:$4 sm:$0xff]  }
 0x699   :  { %v5682_v18 = vmax.f32 %v9061_v2, 0.0  ;;  %v5684_v19 = vmax.f32 %v9145_v4, 0.0 }
 0x69a   :  { %v5817_v20 = vpack.c.bf16 %v5681_v13, %v5677_v10  ;;  %v13166_v21 = vpack.c.bf16 %v5683_v14, %v5679_v12 }
 0x69b   :  { %v5818_v23 = vpack.c.bf16 %v5682_v18, %v5678_v16  ;;  %v13168_v36 = vpack.c.bf16 %v5684_v19, %v5680_v17  ;;  %v5006_v31 = vpop.f32.mrb[60].mxu0  ;;  %v5492_v32 = vpop.f32.mrb[60].mxu1  ;;  %6933 = vmatpush1.bf16.msra.mxu0 %v10604_v6  ;;  %7419 = vmatpush1.bf16.msra.mxu1 %v10607_v7 }
 0x69c   :  { %v9062_v41 = vadd.f32 %v5006_v31, %v12895_v38  ;;  %v9146_v42 = vadd.f32 %v5492_v32, %v12898_v39  ;;  %v5008_v57 = vpop.f32.mrb[61].mxu0  ;;  %v5494_v43 = vpop.f32.mrb[61].mxu1  ;;  %6934 = vmatprep.subr.bf16.mxu0 %v10612_v8  ;;  %7420 = vmatprep.subr.bf16.mxu1 %v10615_v15 }
 0x69d   :  { %v9063_v48 = vadd.f32 %v5008_v57, %v12901_v40  ;;  %v9147_v49 = vadd.f32 %v5494_v43, %v12904_v22  ;;  %v5010_v50 = vpop.f32.mrb[62].mxu0  ;;  %v5496_v51 = vpop.f32.mrb[62].mxu1  ;;  %6765 = vmatprep.mubr.bf16.mxu0 %v5818_v23  ;;  %7251 = vmatprep.mubr.bf16.mxu1 %v5818_v23 }
 0x69e   :  { %v9064_v52 = vadd.f32 %v5010_v50, %v12895_v38  ;;  %v9148_v53 = vadd.f32 %v5496_v51, %v12898_v39  ;;  %v5012_v54 = vpop.f32.mrb[63].mxu0  ;;  %v5498_v56 = vpop.f32.mrb[63].mxu1  ;;  %6766 = vmatmul.mubr.bf16.gmra.mrb[140].mxu0 %v5817_v20  ;;  %7252 = vmatmul.mubr.bf16.gmra.mrb[140].mxu1 %v5817_v20  ;;  %v5685_v2 = vmax.f32 %v9062_v41, 0.0  ;;  %v5687_v4 = vmax.f32 %v9146_v42, 0.0 }
 0x69f   :  { %v9065_v60 = vadd.f32 %v5012_v54, %v12901_v40  ;;  %v9149_v62 = vadd.f32 %v5498_v56, %v12904_v22  ;;  %6935 = vmatpush1.bf16.msra.mxu0 %v10610_v33  ;;  %7421 = vmatpush1.bf16.msra.mxu1 %v10613_v35  ;;  %v5686_v8 = vmax.f32 %v9063_v48, 0.0  ;;  %v5688_v10 = vmax.f32 %v9147_v49, 0.0 }
 0x6a0   :  { %v5689_v6 = vmax.f32 %v9064_v52, 0.0  ;;  %v5691_v7 = vmax.f32 %v9148_v53, 0.0  ;;  %6936 = vmatprep.subr.bf16.mxu0 %v10618_v63  ;;  %7422 = vmatprep.subr.bf16.mxu1 %v10621_v44 }
 0x6a1   :  { %v5690_v12 = vmax.f32 %v9065_v60, 0.0  ;;  %v5692_v13 = vmax.f32 %v9149_v62, 0.0 }
 0x6a2   :  { %v5821_v14 = vpack.c.bf16 %v5689_v6, %v5685_v2  ;;  %v13196_v15 = vpack.c.bf16 %v5691_v7, %v5687_v4 }
 0x6a3   :  { %v5822_v16 = vpack.c.bf16 %v5690_v12, %v5686_v8  ;;  %v13198_v17 = vpack.c.bf16 %v5692_v13, %v5688_v10  ;;  %v5016_v18 = vpop.f32.mrb[64].mxu0  ;;  %v5502_v19 = vpop.f32.mrb[64].mxu1  ;;  %6937 = vmatpush1.bf16.msra.mxu0 %v10616_v0  ;;  %7423 = vmatpush1.bf16.msra.mxu1 %v10619_v1 }
 0x6a4   :  { %v9066_v20 = vadd.f32 %v5016_v18, %v12895_v38  ;;  %v9150_v23 = vadd.f32 %v5502_v19, %v12898_v39  ;;  %v5018_v31 = vpop.f32.mrb[65].mxu0  ;;  %v5504_v32 = vpop.f32.mrb[65].mxu1 }
 0x6a5   :  { %v9067_v33 = vadd.f32 %v5018_v31, %v12901_v40  ;;  %v9151_v35 = vadd.f32 %v5504_v32, %v12904_v22  ;;  %v5020_v41 = vpop.f32.mrb[66].mxu0  ;;  %v5506_v42 = vpop.f32.mrb[66].mxu1  ;;  %6775 = vmatprep.mubr.bf16.mxu0 %v5822_v16  ;;  %7261 = vmatprep.mubr.bf16.mxu1 %v5822_v16 }
 0x6a6   :  { %v9068_v57 = vadd.f32 %v5020_v41, %v12895_v38  ;;  %v9152_v43 = vadd.f32 %v5506_v42, %v12898_v39  ;;  %v5022_v63 = vpop.f32.mrb[67].mxu0  ;;  %v5508_v44 = vpop.f32.mrb[67].mxu1  ;;  %6776 = vmatmul.mubr.bf16.gmra.mrb[144].mxu0 %v5821_v14  ;;  %7262 = vmatmul.mubr.bf16.gmra.mrb[144].mxu1 %v5821_v14  ;;  %v5693_v50 = vmax.f32 %v9066_v20, 0.0  ;;  %v5695_v51 = vmax.f32 %v9150_v23, 0.0 }
 0x6a7   :  { %v9069_v48 = vadd.f32 %v5022_v63, %v12901_v40  ;;  %v9153_v49 = vadd.f32 %v5508_v44, %v12904_v22  ;;  %v5694_v54 = vmax.f32 %v9067_v33, 0.0  ;;  %v5696_v56 = vmax.f32 %v9151_v35, 0.0 }
 0x6a8   :  { %v5697_v52 = vmax.f32 %v9068_v57, 0.0  ;;  %v5699_v53 = vmax.f32 %v9152_v43, 0.0 }
 0x6a9   :  { %v5698_v60 = vmax.f32 %v9069_v48, 0.0  ;;  %v5700_v62 = vmax.f32 %v9153_v49, 0.0 }
 0x6aa   :  { %v5825_v0 = vpack.c.bf16 %v5697_v52, %v5693_v50  ;;  %v13208_v1 = vpack.c.bf16 %v5699_v53, %v5695_v51 }
 0x6ab   :  { %v5826_v2 = vpack.c.bf16 %v5698_v60, %v5694_v54  ;;  %v13210_v4 = vpack.c.bf16 %v5700_v62, %v5696_v56  ;;  %v5026_v6 = vpop.f32.mrb[68].mxu0  ;;  %v5512_v7 = vpop.f32.mrb[68].mxu1 }
 0x6ac   :  { %v9070_v8 = vadd.f32 %v5026_v6, %v12895_v38  ;;  %v9154_v10 = vadd.f32 %v5512_v7, %v12898_v39  ;;  %v5028_v12 = vpop.f32.mrb[69].mxu0  ;;  %v5514_v13 = vpop.f32.mrb[69].mxu1 }
 0x6ad   :  { %v9071_v14 = vadd.f32 %v5028_v12, %v12901_v40  ;;  %v9155_v16 = vadd.f32 %v5514_v13, %v12904_v22  ;;  %v5030_v18 = vpop.f32.mrb[70].mxu0  ;;  %v5516_v19 = vpop.f32.mrb[70].mxu1  ;;  %6785 = vmatprep.mubr.bf16.mxu0 %v5826_v2  ;;  %7271 = vmatprep.mubr.bf16.mxu1 %v5826_v2 }
 0x6ae   :  { %v9072_v20 = vadd.f32 %v5030_v18, %v12895_v38  ;;  %v9156_v23 = vadd.f32 %v5516_v19, %v12898_v39  ;;  %v5032_v31 = vpop.f32.mrb[71].mxu0  ;;  %v5518_v32 = vpop.f32.mrb[71].mxu1  ;;  %6786 = vmatmul.mubr.bf16.gmra.mrb[148].mxu0 %v5825_v0  ;;  %7272 = vmatmul.mubr.bf16.gmra.mrb[148].mxu1 %v5825_v0  ;;  %v5701_v41 = vmax.f32 %v9070_v8, 0.0  ;;  %v5703_v42 = vmax.f32 %v9154_v10, 0.0 }
 0x6af   :  { %v9073_v33 = vadd.f32 %v5032_v31, %v12901_v40  ;;  %v9157_v35 = vadd.f32 %v5518_v32, %v12904_v22  ;;  %v5702_v63 = vmax.f32 %v9071_v14, 0.0  ;;  %v5704_v44 = vmax.f32 %v9155_v16, 0.0 }
 0x6b0   :  { %v5705_v57 = vmax.f32 %v9072_v20, 0.0  ;;  %v5707_v43 = vmax.f32 %v9156_v23, 0.0 }
 0x6b1   :  { %v5706_v48 = vmax.f32 %v9073_v33, 0.0  ;;  %v5708_v49 = vmax.f32 %v9157_v35, 0.0 }
 0x6b2   :  { %v5829_v50 = vpack.c.bf16 %v5705_v57, %v5701_v41  ;;  %v13220_v51 = vpack.c.bf16 %v5707_v43, %v5703_v42 }
 0x6b3   :  { %v5830_v52 = vpack.c.bf16 %v5706_v48, %v5702_v63  ;;  %v13222_v53 = vpack.c.bf16 %v5708_v49, %v5704_v44  ;;  %v5036_v54 = vpop.f32.mrb[72].mxu0  ;;  %v5522_v56 = vpop.f32.mrb[72].mxu1 }
 0x6b4   :  { %v9074_v60 = vadd.f32 %v5036_v54, %v12895_v38  ;;  %v9158_v62 = vadd.f32 %v5522_v56, %v12898_v39  ;;  %v5038_v0 = vpop.f32.mrb[73].mxu0  ;;  %v5524_v2 = vpop.f32.mrb[73].mxu1 }
 0x6b5   :  { %v9075_v6 = vadd.f32 %v5038_v0, %v12901_v40  ;;  %v9159_v7 = vadd.f32 %v5524_v2, %v12904_v22  ;;  %v5040_v8 = vpop.f32.mrb[74].mxu0  ;;  %v5526_v10 = vpop.f32.mrb[74].mxu1  ;;  %6795 = vmatprep.mubr.bf16.mxu0 %v5830_v52  ;;  %7281 = vmatprep.mubr.bf16.mxu1 %v5830_v52 }
 0x6b6   :  { %v9076_v12 = vadd.f32 %v5040_v8, %v12895_v38  ;;  %v9160_v13 = vadd.f32 %v5526_v10, %v12898_v39  ;;  %v5042_v14 = vpop.f32.mrb[75].mxu0  ;;  %v5528_v16 = vpop.f32.mrb[75].mxu1  ;;  %6796 = vmatmul.mubr.bf16.gmra.mrb[152].mxu0 %v5829_v50  ;;  %7282 = vmatmul.mubr.bf16.gmra.mrb[152].mxu1 %v5829_v50  ;;  %v5709_v20 = vmax.f32 %v9074_v60, 0.0  ;;  %v5711_v23 = vmax.f32 %v9158_v62, 0.0 }
 0x6b7   :  { %v9077_v18 = vadd.f32 %v5042_v14, %v12901_v40  ;;  %v9161_v19 = vadd.f32 %v5528_v16, %v12904_v22  ;;  %v5710_v33 = vmax.f32 %v9075_v6, 0.0  ;;  %v5712_v35 = vmax.f32 %v9159_v7, 0.0 }
 0x6b8   :  { %v5713_v31 = vmax.f32 %v9076_v12, 0.0  ;;  %v5715_v32 = vmax.f32 %v9160_v13, 0.0 }
 0x6b9   :  { %v5714_v41 = vmax.f32 %v9077_v18, 0.0  ;;  %v5716_v42 = vmax.f32 %v9161_v19, 0.0 }
 0x6ba   :  { %v5833_v57 = vpack.c.bf16 %v5713_v31, %v5709_v20  ;;  %v13232_v43 = vpack.c.bf16 %v5715_v32, %v5711_v23 }
 0x6bb   :  { %v5834_v63 = vpack.c.bf16 %v5714_v41, %v5710_v33  ;;  %v13234_v44 = vpack.c.bf16 %v5716_v42, %v5712_v35  ;;  %v5046_v48 = vpop.f32.mrb[76].mxu0  ;;  %v5532_v49 = vpop.f32.mrb[76].mxu1 }
 0x6bc   :  { %v9078_v50 = vadd.f32 %v5046_v48, %v12895_v38  ;;  %v9162_v52 = vadd.f32 %v5532_v49, %v12898_v39  ;;  %v5048_v54 = vpop.f32.mrb[77].mxu0  ;;  %v5534_v56 = vpop.f32.mrb[77].mxu1 }
 0x6bd   :  { %v9079_v60 = vadd.f32 %v5048_v54, %v12901_v40  ;;  %v9163_v62 = vadd.f32 %v5534_v56, %v12904_v22  ;;  %v5050_v0 = vpop.f32.mrb[78].mxu0  ;;  %v5536_v2 = vpop.f32.mrb[78].mxu1  ;;  %6805 = vmatprep.mubr.bf16.mxu0 %v5834_v63  ;;  %7291 = vmatprep.mubr.bf16.mxu1 %v5834_v63 }
 0x6be   :  { %v9080_v6 = vadd.f32 %v5050_v0, %v12895_v38  ;;  %v9164_v7 = vadd.f32 %v5536_v2, %v12898_v39  ;;  %v5052_v8 = vpop.f32.mrb[79].mxu0  ;;  %v5538_v10 = vpop.f32.mrb[79].mxu1  ;;  %6806 = vmatmul.mubr.bf16.gmra.mrb[156].mxu0 %v5833_v57  ;;  %7292 = vmatmul.mubr.bf16.gmra.mrb[156].mxu1 %v5833_v57  ;;  %v5717_v14 = vmax.f32 %v9078_v50, 0.0  ;;  %v5719_v16 = vmax.f32 %v9162_v52, 0.0 }
 0x6bf   :  { %v9081_v12 = vadd.f32 %v5052_v8, %v12901_v40  ;;  %v9165_v13 = vadd.f32 %v5538_v10, %v12904_v22  ;;  %v5718_v20 = vmax.f32 %v9079_v60, 0.0  ;;  %v5720_v23 = vmax.f32 %v9163_v62, 0.0 }
 0x6c0   :  { %v5721_v18 = vmax.f32 %v9080_v6, 0.0  ;;  %v5723_v19 = vmax.f32 %v9164_v7, 0.0 }
 0x6c1   :  { %v5722_v31 = vmax.f32 %v9081_v12, 0.0  ;;  %v5724_v32 = vmax.f32 %v9165_v13, 0.0 }
 0x6c2   :  { %v5837_v33 = vpack.c.bf16 %v5721_v18, %v5717_v14  ;;  %v13244_v35 = vpack.c.bf16 %v5723_v19, %v5719_v16 }
 0x6c3   :  { %v5838_v41 = vpack.c.bf16 %v5722_v31, %v5718_v20  ;;  %v13246_v42 = vpack.c.bf16 %v5724_v32, %v5720_v23  ;;  %v5056_v63 = vpop.f32.mrb[80].mxu0  ;;  %v5542_v57 = vpop.f32.mrb[80].mxu1 }
 0x6c4   :  { %v9082_v48 = vadd.f32 %v5056_v63, %v12895_v38  ;;  %v9166_v49 = vadd.f32 %v5542_v57, %v12898_v39  ;;  %v5058_v50 = vpop.f32.mrb[81].mxu0  ;;  %v5544_v52 = vpop.f32.mrb[81].mxu1 }
 0x6c5   :  { %v9083_v54 = vadd.f32 %v5058_v50, %v12901_v40  ;;  %v9167_v56 = vadd.f32 %v5544_v52, %v12904_v22  ;;  %v5060_v60 = vpop.f32.mrb[82].mxu0  ;;  %v5546_v62 = vpop.f32.mrb[82].mxu1  ;;  %6815 = vmatprep.mubr.bf16.mxu0 %v5838_v41  ;;  %7301 = vmatprep.mubr.bf16.mxu1 %v5838_v41 }
 0x6c6   :  { %v9084_v0 = vadd.f32 %v5060_v60, %v12895_v38  ;;  %v9168_v2 = vadd.f32 %v5546_v62, %v12898_v39  ;;  %v5062_v6 = vpop.f32.mrb[83].mxu0  ;;  %v5548_v7 = vpop.f32.mrb[83].mxu1  ;;  %6816 = vmatmul.mubr.bf16.gmra.mrb[160].mxu0 %v5837_v33  ;;  %7302 = vmatmul.mubr.bf16.gmra.mrb[160].mxu1 %v5837_v33  ;;  %v5725_v12 = vmax.f32 %v9082_v48, 0.0  ;;  %v5727_v13 = vmax.f32 %v9166_v49, 0.0 }
 0x6c7   :  { %v9085_v8 = vadd.f32 %v5062_v6, %v12901_v40  ;;  %v9169_v10 = vadd.f32 %v5548_v7, %v12904_v22  ;;  %v5726_v18 = vmax.f32 %v9083_v54, 0.0  ;;  %v5728_v19 = vmax.f32 %v9167_v56, 0.0 }
 0x6c8   :  { %v5729_v14 = vmax.f32 %v9084_v0, 0.0  ;;  %v5731_v16 = vmax.f32 %v9168_v2, 0.0 }
 0x6c9   :  { %v5730_v20 = vmax.f32 %v9085_v8, 0.0  ;;  %v5732_v23 = vmax.f32 %v9169_v10, 0.0 }
 0x6ca   :  { %v5841_v31 = vpack.c.bf16 %v5729_v14, %v5725_v12  ;;  %v13256_v32 = vpack.c.bf16 %v5731_v16, %v5727_v13 }
 0x6cb   :  { %v5842_v41 = vpack.c.bf16 %v5730_v20, %v5726_v18  ;;  %v13258_v63 = vpack.c.bf16 %v5732_v23, %v5728_v19  ;;  %v5066_v57 = vpop.f32.mrb[84].mxu0  ;;  %v5552_v33 = vpop.f32.mrb[84].mxu1 }
 0x6cc   :  { %v9086_v50 = vadd.f32 %v5066_v57, %v12895_v38  ;;  %v9170_v52 = vadd.f32 %v5552_v33, %v12898_v39  ;;  %v5068_v48 = vpop.f32.mrb[85].mxu0  ;;  %v5554_v49 = vpop.f32.mrb[85].mxu1 }
 0x6cd   :  { %v9087_v60 = vadd.f32 %v5068_v48, %v12901_v40  ;;  %v9171_v54 = vadd.f32 %v5554_v49, %v12904_v22  ;;  %v5070_v56 = vpop.f32.mrb[86].mxu0  ;;  %v5556_v62 = vpop.f32.mrb[86].mxu1  ;;  %6825 = vmatprep.mubr.bf16.mxu0 %v5842_v41  ;;  %7311 = vmatprep.mubr.bf16.mxu1 %v5842_v41 }
 0x6ce   :  { %v9088_v0 = vadd.f32 %v5070_v56, %v12895_v38  ;;  %v9172_v2 = vadd.f32 %v5556_v62, %v12898_v39  ;;  %v5072_v6 = vpop.f32.mrb[87].mxu0  ;;  %v5558_v7 = vpop.f32.mrb[87].mxu1  ;;  %6826 = vmatmul.mubr.bf16.gmra.mrb[164].mxu0 %v5841_v31  ;;  %7312 = vmatmul.mubr.bf16.gmra.mrb[164].mxu1 %v5841_v31  ;;  %v5733_v12 = vmax.f32 %v9086_v50, 0.0  ;;  %v5735_v13 = vmax.f32 %v9170_v52, 0.0 }
 0x6cf   :  { %v9089_v8 = vadd.f32 %v5072_v6, %v12901_v40  ;;  %v9173_v10 = vadd.f32 %v5558_v7, %v12904_v22  ;;  %v5734_v18 = vmax.f32 %v9087_v60, 0.0  ;;  %v5736_v19 = vmax.f32 %v9171_v54, 0.0 }
 0x6d0   :  { %v5737_v14 = vmax.f32 %v9088_v0, 0.0  ;;  %v5739_v16 = vmax.f32 %v9172_v2, 0.0 }
 0x6d1   :  { %v5738_v20 = vmax.f32 %v9089_v8, 0.0  ;;  %v5740_v23 = vmax.f32 %v9173_v10, 0.0 }
 0x6d2   :  { %v5845_v41 = vpack.c.bf16 %v5737_v14, %v5733_v12  ;;  %v13268_v57 = vpack.c.bf16 %v5739_v16, %v5735_v13 }
 0x6d3   :  { %v5846_v33 = vpack.c.bf16 %v5738_v20, %v5734_v18  ;;  %v13270_v48 = vpack.c.bf16 %v5740_v23, %v5736_v19  ;;  %v5076_v49 = vpop.f32.mrb[88].mxu0  ;;  %v5562_v31 = vpop.f32.mrb[88].mxu1 }
 0x6d4   :  { %v9090_v56 = vadd.f32 %v5076_v49, %v12895_v38  ;;  %v9174_v62 = vadd.f32 %v5562_v31, %v12898_v39  ;;  %v5078_v50 = vpop.f32.mrb[89].mxu0  ;;  %v5564_v52 = vpop.f32.mrb[89].mxu1 }
 0x6d5   :  { %v9091_v0 = vadd.f32 %v5078_v50, %v12901_v40  ;;  %v9175_v60 = vadd.f32 %v5564_v52, %v12904_v22  ;;  %v5080_v54 = vpop.f32.mrb[90].mxu0  ;;  %v5566_v2 = vpop.f32.mrb[90].mxu1  ;;  %6835 = vmatprep.mubr.bf16.mxu0 %v5846_v33  ;;  %7321 = vmatprep.mubr.bf16.mxu1 %v5846_v33 }
 0x6d6   :  { %v9092_v6 = vadd.f32 %v5080_v54, %v12895_v38  ;;  %v9176_v7 = vadd.f32 %v5566_v2, %v12898_v39  ;;  %v5082_v8 = vpop.f32.mrb[91].mxu0  ;;  %v5568_v10 = vpop.f32.mrb[91].mxu1  ;;  %6836 = vmatmul.mubr.bf16.gmra.mrb[168].mxu0 %v5845_v41  ;;  %7322 = vmatmul.mubr.bf16.gmra.mrb[168].mxu1 %v5845_v41  ;;  %v5741_v14 = vmax.f32 %v9090_v56, 0.0  ;;  %v5743_v16 = vmax.f32 %v9174_v62, 0.0 }
 0x6d7   :  { %v9093_v12 = vadd.f32 %v5082_v8, %v12901_v40  ;;  %v9177_v13 = vadd.f32 %v5568_v10, %v12904_v22  ;;  %v5742_v20 = vmax.f32 %v9091_v0, 0.0  ;;  %v5744_v23 = vmax.f32 %v9175_v60, 0.0 }
 0x6d8   :  { %v5745_v18 = vmax.f32 %v9092_v6, 0.0  ;;  %v5747_v19 = vmax.f32 %v9176_v7, 0.0 }
 0x6d9   :  { %v5746_v49 = vmax.f32 %v9093_v12, 0.0  ;;  %v5748_v33 = vmax.f32 %v9177_v13, 0.0 }
 0x6da   :  { %v5849_v31 = vpack.c.bf16 %v5745_v18, %v5741_v14  ;;  %v13280_v50 = vpack.c.bf16 %v5747_v19, %v5743_v16 }
 0x6db   :  { %v5850_v52 = vpack.c.bf16 %v5746_v49, %v5742_v20  ;;  %v13282_v54 = vpack.c.bf16 %v5748_v33, %v5744_v23  ;;  %v5086_v2 = vpop.f32.mrb[92].mxu0  ;;  %v5572_v41 = vpop.f32.mrb[92].mxu1 }
 0x6dc   :  { %v9094_v8 = vadd.f32 %v5086_v2, %v12895_v38  ;;  %v9178_v10 = vadd.f32 %v5572_v41, %v12898_v39  ;;  %v5088_v56 = vpop.f32.mrb[93].mxu0  ;;  %v5574_v62 = vpop.f32.mrb[93].mxu1 }
 0x6dd   :  { %v9095_v6 = vadd.f32 %v5088_v56, %v12901_v40  ;;  %v9179_v0 = vadd.f32 %v5574_v62, %v12904_v22  ;;  %v5090_v60 = vpop.f32.mrb[94].mxu0  ;;  %v5576_v7 = vpop.f32.mrb[94].mxu1  ;;  %6845 = vmatprep.mubr.bf16.mxu0 %v5850_v52  ;;  %7331 = vmatprep.mubr.bf16.mxu1 %v5850_v52 }
 0x6de   :  { %v9096_v12 = vadd.f32 %v5090_v60, %v12895_v38  ;;  %v9180_v13 = vadd.f32 %v5576_v7, %v12898_v39  ;;  %v5092_v14 = vpop.f32.mrb[95].mxu0  ;;  %v5578_v16 = vpop.f32.mrb[95].mxu1  ;;  %6846 = vmatmul.mubr.bf16.gmra.mrb[172].mxu0 %v5849_v31  ;;  %7332 = vmatmul.mubr.bf16.gmra.mrb[172].mxu1 %v5849_v31  ;;  %v5749_v20 = vmax.f32 %v9094_v8, 0.0  ;;  %v5751_v23 = vmax.f32 %v9178_v10, 0.0 }
 0x6df   :  { %v9097_v18 = vadd.f32 %v5092_v14, %v12901_v40  ;;  %v9181_v19 = vadd.f32 %v5578_v16, %v12904_v22  ;;  %v5750_v2 = vmax.f32 %v9095_v6, 0.0  ;;  %v5752_v41 = vmax.f32 %v9179_v0, 0.0 }
 0x6e0   :  { %v5753_v49 = vmax.f32 %v9096_v12, 0.0  ;;  %v5755_v33 = vmax.f32 %v9180_v13, 0.0 }
 0x6e1   :  { %v5754_v56 = vmax.f32 %v9097_v18, 0.0  ;;  %v5756_v52 = vmax.f32 %v9181_v19, 0.0 }
 0x6e2   :  { %v5853_v62 = vpack.c.bf16 %v5753_v49, %v5749_v20  ;;  %v13292_v60 = vpack.c.bf16 %v5755_v33, %v5751_v23 }
 0x6e3   :  { %v5854_v7 = vpack.c.bf16 %v5754_v56, %v5750_v2  ;;  %v13294_v24 = vpack.c.bf16 %v5756_v52, %v5752_v41  ;;  %v5096_v37 = vpop.f32.mrb[96].mxu0  ;;  %v5582_v31 = vpop.f32.mrb[96].mxu1 }
 0x6e4   :  { %v9098_v14 = vadd.f32 %v5096_v37, %v12895_v38  ;;  %v9182_v16 = vadd.f32 %v5582_v31, %v12898_v39  ;;  %v5098_v8 = vpop.f32.mrb[97].mxu0  ;;  %v5584_v10 = vpop.f32.mrb[97].mxu1 }
 0x6e5   :  { %v9099_v12 = vadd.f32 %v5098_v8, %v12901_v40  ;;  %v9183_v6 = vadd.f32 %v5584_v10, %v12904_v22  ;;  %v5100_v0 = vpop.f32.mrb[98].mxu0  ;;  %v5586_v13 = vpop.f32.mrb[98].mxu1  ;;  %6855 = vmatprep.mubr.bf16.mxu0 %v5854_v7  ;;  %7341 = vmatprep.mubr.bf16.mxu1 %v5854_v7 }
 0x6e6   :  { %v9100_v18 = vadd.f32 %v5100_v0, %v12895_v38  ;;  %v9184_v19 = vadd.f32 %v5586_v13, %v12898_v39  ;;  %v5102_v20 = vpop.f32.mrb[99].mxu0  ;;  %v5588_v23 = vpop.f32.mrb[99].mxu1  ;;  %6856 = vmatmul.mubr.bf16.gmra.mrb[176].mxu0 %v5853_v62  ;;  %7342 = vmatmul.mubr.bf16.gmra.mrb[176].mxu1 %v5853_v62  ;;  %v5757_v33 = vmax.f32 %v9098_v14, 0.0  ;;  %v5759_v2 = vmax.f32 %v9182_v16, 0.0 }
 0x6e7   :  { %v9101_v37 = vadd.f32 %v5102_v20, %v12901_v40  ;;  %v9185_v49 = vadd.f32 %v5588_v23, %v12904_v22  ;;  %v5758_v52 = vmax.f32 %v9099_v12, 0.0  ;;  %v5760_v31 = vmax.f32 %v9183_v6, 0.0 }
 0x6e8   :  { %v5761_v41 = vmax.f32 %v9100_v18, 0.0  ;;  %v5763_v56 = vmax.f32 %v9184_v19, 0.0 }
 0x6e9   :  { %v5762_v8 = vmax.f32 %v9101_v37, 0.0  ;;  %v5764_v7 = vmax.f32 %v9185_v49, 0.0 }
 0x6ea   :  { %v5857_v10 = vpack.c.bf16 %v5761_v41, %v5757_v33  ;;  %v13304_v0 = vpack.c.bf16 %v5763_v56, %v5759_v2 }
 0x6eb   :  { %v5858_v13 = vpack.c.bf16 %v5762_v8, %v5758_v52  ;;  %v13306_v29 = vpack.c.bf16 %v5764_v7, %v5760_v31  ;;  %v5106_v28 = vpop.f32.mrb[100].mxu0  ;;  %v5592_v62 = vpop.f32.mrb[100].mxu1 }
 0x6ec   :  { %v9102_v20 = vadd.f32 %v5106_v28, %v12895_v38  ;;  %v9186_v23 = vadd.f32 %v5592_v62, %v12898_v39  ;;  %v5108_v14 = vpop.f32.mrb[101].mxu0  ;;  %v5594_v16 = vpop.f32.mrb[101].mxu1 }
 0x6ed   :  { %v9103_v18 = vadd.f32 %v5108_v14, %v12901_v40  ;;  %v9187_v12 = vadd.f32 %v5594_v16, %v12904_v22  ;;  %v5110_v6 = vpop.f32.mrb[102].mxu0  ;;  %v5596_v19 = vpop.f32.mrb[102].mxu1  ;;  %6865 = vmatprep.mubr.bf16.mxu0 %v5858_v13  ;;  %7351 = vmatprep.mubr.bf16.mxu1 %v5858_v13 }
 0x6ee   :  { %v9104_v37 = vadd.f32 %v5110_v6, %v12895_v38  ;;  %v9188_v49 = vadd.f32 %v5596_v19, %v12898_v39  ;;  %v5112_v33 = vpop.f32.mrb[103].mxu0  ;;  %v5598_v2 = vpop.f32.mrb[103].mxu1  ;;  %6866 = vmatmul.mubr.bf16.gmra.mrb[180].mxu0 %v5857_v10  ;;  %7352 = vmatmul.mubr.bf16.gmra.mrb[180].mxu1 %v5857_v10  ;;  %v5765_v56 = vmax.f32 %v9102_v20, 0.0  ;;  %v5767_v52 = vmax.f32 %v9186_v23, 0.0 }
 0x6ef   :  { %v9105_v28 = vadd.f32 %v5112_v33, %v12901_v40  ;;  %v9189_v41 = vadd.f32 %v5598_v2, %v12904_v22  ;;  %v5766_v7 = vmax.f32 %v9103_v18, 0.0  ;;  %v5768_v62 = vmax.f32 %v9187_v12, 0.0 }
 0x6f0   :  { %v5769_v31 = vmax.f32 %v9104_v37, 0.0  ;;  %v5771_v8 = vmax.f32 %v9188_v49, 0.0 }
 0x6f1   :  { %v5770_v14 = vmax.f32 %v9105_v28, 0.0  ;;  %v5772_v13 = vmax.f32 %v9189_v41, 0.0 }
 0x6f2   :  { %v5861_v16 = vpack.c.bf16 %v5769_v31, %v5765_v56  ;;  %v13316_v6 = vpack.c.bf16 %v5771_v8, %v5767_v52 }
 0x6f3   :  { %v5862_v19 = vpack.c.bf16 %v5770_v14, %v5766_v7  ;;  %v13318_v26 = vpack.c.bf16 %v5772_v13, %v5768_v62  ;;  %v5116_v25 = vpop.f32.mrb[104].mxu0  ;;  %v5602_v10 = vpop.f32.mrb[104].mxu1 }
 0x6f4   :  { %13741 = vst [vmem:[#allocation8_spill] sm:$0xff] %v13316_v6  ;;  %v9106_v33 = vadd.f32 %v5116_v25, %v12895_v38  ;;  %v9190_v2 = vadd.f32 %v5602_v10, %v12898_v39  ;;  %v5118_v20 = vpop.f32.mrb[105].mxu0  ;;  %v5604_v23 = vpop.f32.mrb[105].mxu1 }
 0x6f5   :  { %13742 = vst [vmem:[#allocation9_spill] sm:$0xff] %v13318_v26  ;;  %v9107_v37 = vadd.f32 %v5118_v20, %v12901_v40  ;;  %v9191_v18 = vadd.f32 %v5604_v23, %v12904_v22  ;;  %v5120_v12 = vpop.f32.mrb[106].mxu0  ;;  %v5606_v49 = vpop.f32.mrb[106].mxu1  ;;  %6875 = vmatprep.mubr.bf16.mxu0 %v5862_v19  ;;  %7361 = vmatprep.mubr.bf16.mxu1 %v5862_v19 }
 0x6f6   :  { %v9108_v28 = vadd.f32 %v5120_v12, %v12895_v38  ;;  %v9192_v41 = vadd.f32 %v5606_v49, %v12898_v39  ;;  %v5122_v56 = vpop.f32.mrb[107].mxu0  ;;  %v5608_v52 = vpop.f32.mrb[107].mxu1  ;;  %6876 = vmatmul.mubr.bf16.gmra.mrb[184].mxu0 %v5861_v16  ;;  %7362 = vmatmul.mubr.bf16.gmra.mrb[184].mxu1 %v5861_v16  ;;  %v5773_v8 = vmax.f32 %v9106_v33, 0.0  ;;  %v5775_v7 = vmax.f32 %v9190_v2, 0.0 }
 0x6f7   :  { %v9109_v25 = vadd.f32 %v5122_v56, %v12901_v40  ;;  %v9193_v31 = vadd.f32 %v5608_v52, %v12904_v22  ;;  %v5774_v13 = vmax.f32 %v9107_v37, 0.0  ;;  %v5776_v10 = vmax.f32 %v9191_v18, 0.0 }
 0x6f8   :  { %v5777_v62 = vmax.f32 %v9108_v28, 0.0  ;;  %v5779_v14 = vmax.f32 %v9192_v41, 0.0 }
 0x6f9   :  { %v5778_v20 = vmax.f32 %v9109_v25, 0.0  ;;  %v5780_v19 = vmax.f32 %v9193_v31, 0.0 }
 0x6fa   :  { %v5865_v23 = vpack.c.bf16 %v5777_v62, %v5773_v8  ;;  %v13328_v12 = vpack.c.bf16 %v5779_v14, %v5775_v7 }
 0x6fb   :  { %v5866_v49 = vpack.c.bf16 %v5778_v20, %v5774_v13  ;;  %v13330_v6 = vpack.c.bf16 %v5780_v19, %v5776_v10  ;;  %v5126_v26 = vpop.f32.mrb[108].mxu0  ;;  %v5612_v16 = vpop.f32.mrb[108].mxu1 }
 0x6fc   :  { %v9110_v56 = vadd.f32 %v5126_v26, %v12895_v38  ;;  %v9194_v52 = vadd.f32 %v5612_v16, %v12898_v39  ;;  %v5128_v33 = vpop.f32.mrb[109].mxu0  ;;  %v5614_v2 = vpop.f32.mrb[109].mxu1 }
 0x6fd   :  { %v9111_v28 = vadd.f32 %v5128_v33, %v12901_v40  ;;  %v9195_v37 = vadd.f32 %v5614_v2, %v12904_v22  ;;  %v5130_v18 = vpop.f32.mrb[110].mxu0  ;;  %v5616_v41 = vpop.f32.mrb[110].mxu1  ;;  %6885 = vmatprep.mubr.bf16.mxu0 %v5866_v49  ;;  %7371 = vmatprep.mubr.bf16.mxu1 %v5866_v49 }
 0x6fe   :  { %v9112_v25 = vadd.f32 %v5130_v18, %v12895_v38  ;;  %v9196_v31 = vadd.f32 %v5616_v41, %v12898_v39  ;;  %v5132_v8 = vpop.f32.mrb[111].mxu0  ;;  %v5618_v7 = vpop.f32.mrb[111].mxu1  ;;  %6886 = vmatmul.mubr.bf16.gmra.mrb[188].mxu0 %v5865_v23  ;;  %7372 = vmatmul.mubr.bf16.gmra.mrb[188].mxu1 %v5865_v23  ;;  %v5781_v14 = vmax.f32 %v9110_v56, 0.0  ;;  %v5783_v13 = vmax.f32 %v9194_v52, 0.0 }
 0x6ff   :  { %v9113_v26 = vadd.f32 %v5132_v8, %v12901_v40  ;;  %v9197_v62 = vadd.f32 %v5618_v7, %v12904_v22  ;;  %v5782_v19 = vmax.f32 %v9111_v28, 0.0  ;;  %v5784_v16 = vmax.f32 %v9195_v37, 0.0  ;;  %v13743_v40 = vld [vmem:[#allocation9_spill] sm:$0xff]  ;;  %v13744_v22 = vld [vmem:[#allocation8_spill] sm:$0xff] }
 0x700   :  { %v5785_v10 = vmax.f32 %v9112_v25, 0.0  ;;  %v5787_v20 = vmax.f32 %v9196_v31, 0.0 }
 0x701   :  { %v5786_v33 = vmax.f32 %v9113_v26, 0.0  ;;  %v5788_v49 = vmax.f32 %v9197_v62, 0.0 }
 0x702   :  { %v5869_v2 = vpack.c.bf16 %v5785_v10, %v5781_v14  ;;  %v13340_v38 = vpack.c.bf16 %v5787_v20, %v5783_v13 }
 0x703   :  { %v5870_v39 = vpack.c.bf16 %v5786_v33, %v5782_v19  ;;  %v13342_v18 = vpack.c.bf16 %v5788_v49, %v5784_v16 }
 0x705   :  { %6895 = vmatprep.mubr.bf16.mxu0 %v5870_v39  ;;  %7381 = vmatprep.mubr.bf16.mxu1 %v5870_v39 }
 0x706   :  { %6896 = vmatmul.mubr.bf16.gmra.mrb[192].mxu0 %v5869_v2  ;;  %7382 = vmatmul.mubr.bf16.gmra.mrb[192].mxu1 %v5869_v2 }
 0x707   :  { %6938 = vmatprep.mubr.bf16.mxu0 %v12916_v5  ;;  %7424 = vmatprep.mubr.bf16.mxu1 %v12916_v5  ;;  %v13746_v5 = vld [vmem:[#allocation4_spill] sm:$0xff] }
 0x70e   :  { %6939 = vmatmul.mubr.bf16.vlgmr.msra.gmra.mrb[112].mxu0 %v12914_v3  ;;  %7425 = vmatmul.mubr.bf16.vlgmr.msra.gmra.mrb[112].mxu1 %v12914_v3 }
 0x70f   :  { %6948 = vmatprep.mubr.bf16.mxu0 %v12952_v47  ;;  %7434 = vmatprep.mubr.bf16.mxu1 %v12952_v47  ;;  %v13747_v47 = vld [vmem:[#allocation5_spill] sm:$0xff] }
 0x716   :  { %6949 = vmatmul.mubr.bf16.gmra.mrb[116].mxu0 %v12950_v45  ;;  %7435 = vmatmul.mubr.bf16.gmra.mrb[116].mxu1 %v12950_v45 }
 0x717   :  { %6958 = vmatprep.mubr.bf16.mxu0 %v12988_v30  ;;  %7444 = vmatprep.mubr.bf16.mxu1 %v12988_v30  ;;  %v13748_v30 = vld [vmem:[#allocation6_spill] sm:$0xff] }
 0x71e   :  { %6959 = vmatmul.mubr.bf16.gmra.mrb[120].mxu0 %v12986_v27  ;;  %7445 = vmatmul.mubr.bf16.gmra.mrb[120].mxu1 %v12986_v27 }
 0x71f   :  { %6968 = vmatprep.mubr.bf16.mxu0 %v13024_v11  ;;  %7454 = vmatprep.mubr.bf16.mxu1 %v13024_v11 }
 0x726   :  { %6969 = vmatmul.mubr.bf16.gmra.mrb[124].mxu0 %v13022_v9  ;;  %7455 = vmatmul.mubr.bf16.gmra.mrb[124].mxu1 %v13022_v9 }
 0x727   :  { %6978 = vmatprep.mubr.bf16.mxu0 %v13060_v58  ;;  %7464 = vmatprep.mubr.bf16.mxu1 %v13060_v58 }
 0x72e   :  { %6979 = vmatmul.mubr.bf16.gmra.mrb[128].mxu0 %v13058_v55  ;;  %7465 = vmatmul.mubr.bf16.gmra.mrb[128].mxu1 %v13058_v55 }
 0x72f   :  { %6988 = vmatprep.mubr.bf16.mxu0 %v13096_v46  ;;  %7474 = vmatprep.mubr.bf16.mxu1 %v13096_v46 }
 0x736   :  { %6989 = vmatmul.mubr.bf16.gmra.mrb[132].mxu0 %v13094_v59  ;;  %7475 = vmatmul.mubr.bf16.gmra.mrb[132].mxu1 %v13094_v59 }
 0x737   :  { %6998 = vmatprep.mubr.bf16.mxu0 %v13132_v61  ;;  %7484 = vmatprep.mubr.bf16.mxu1 %v13132_v61 }
 0x73e   :  { %6999 = vmatmul.mubr.bf16.gmra.mrb[136].mxu0 %v13130_v34  ;;  %7485 = vmatmul.mubr.bf16.gmra.mrb[136].mxu1 %v13130_v34 }
 0x73f   :  { %7008 = vmatprep.mubr.bf16.mxu0 %v13168_v36  ;;  %7494 = vmatprep.mubr.bf16.mxu1 %v13168_v36 }
 0x746   :  { %7009 = vmatmul.mubr.bf16.gmra.mrb[140].mxu0 %v13166_v21  ;;  %7495 = vmatmul.mubr.bf16.gmra.mrb[140].mxu1 %v13166_v21 }
 0x747   :  { %7018 = vmatprep.mubr.bf16.mxu0 %v13198_v17  ;;  %7504 = vmatprep.mubr.bf16.mxu1 %v13198_v17 }
 0x74e   :  { %7019 = vmatmul.mubr.bf16.gmra.mrb[144].mxu0 %v13196_v15  ;;  %7505 = vmatmul.mubr.bf16.gmra.mrb[144].mxu1 %v13196_v15  ;;  %v13449_v15 = vld [vmem:[%s13709_s20] sm:$0xff] }
 0x74f   :  { %7028 = vmatprep.mubr.bf16.mxu0 %v13210_v4  ;;  %7514 = vmatprep.mubr.bf16.mxu1 %v13210_v4 }
 0x756   :  { %7029 = vmatmul.mubr.bf16.gmra.mrb[148].mxu0 %v13208_v1  ;;  %7515 = vmatmul.mubr.bf16.gmra.mrb[148].mxu1 %v13208_v1 }
 0x757   :  { %7038 = vmatprep.mubr.bf16.mxu0 %v13222_v53  ;;  %7524 = vmatprep.mubr.bf16.mxu1 %v13222_v53 }
 0x75e   :  { %7039 = vmatmul.mubr.bf16.gmra.mrb[152].mxu0 %v13220_v51  ;;  %7525 = vmatmul.mubr.bf16.gmra.mrb[152].mxu1 %v13220_v51  ;;  %v13455_v51 = vld [vmem:[%s13709_s20 + $0x8] sm:$0xff] }
 0x75f   :  { %7048 = vmatprep.mubr.bf16.mxu0 %v13234_v44  ;;  %7534 = vmatprep.mubr.bf16.mxu1 %v13234_v44  ;;  %v13462_v44 = vld [vmem:[%s13709_s20 + $0x10] sm:$0xff] }
 0x766   :  { %7049 = vmatmul.mubr.bf16.gmra.mrb[156].mxu0 %v13232_v43  ;;  %7535 = vmatmul.mubr.bf16.gmra.mrb[156].mxu1 %v13232_v43 }
 0x767   :  { %7058 = vmatprep.mubr.bf16.mxu0 %v13246_v42  ;;  %7544 = vmatprep.mubr.bf16.mxu1 %v13246_v42 }
 0x76e   :  { %7059 = vmatmul.mubr.bf16.gmra.mrb[160].mxu0 %v13244_v35  ;;  %7545 = vmatmul.mubr.bf16.gmra.mrb[160].mxu1 %v13244_v35 }
 0x76f   :  { %7068 = vmatprep.mubr.bf16.mxu0 %v13258_v63  ;;  %7554 = vmatprep.mubr.bf16.mxu1 %v13258_v63 }
 0x776   :  { %7069 = vmatmul.mubr.bf16.gmra.mrb[164].mxu0 %v13256_v32  ;;  %7555 = vmatmul.mubr.bf16.gmra.mrb[164].mxu1 %v13256_v32  ;;  %v13468_v32 = vld [vmem:[%s13709_s20 + $0x18] sm:$0xff]  ;;  %s10682_s20 = smov 16  }
 0x777   :  { %7078 = vmatprep.mubr.bf16.mxu0 %v13270_v48  ;;  %7564 = vmatprep.mubr.bf16.mxu1 %v13270_v48 }
 0x77e   :  { %7079 = vmatmul.mubr.bf16.gmra.mrb[168].mxu0 %v13268_v57  ;;  %7565 = vmatmul.mubr.bf16.gmra.mrb[168].mxu1 %v13268_v57 }
 0x77f   :  { %7088 = vmatprep.mubr.bf16.mxu0 %v13282_v54  ;;  %7574 = vmatprep.mubr.bf16.mxu1 %v13282_v54 }
 0x786   :  { %7089 = vmatmul.mubr.bf16.gmra.mrb[172].mxu0 %v13280_v50  ;;  %7575 = vmatmul.mubr.bf16.gmra.mrb[172].mxu1 %v13280_v50 }
 0x787   :  { %7098 = vmatprep.mubr.bf16.mxu0 %v13294_v24  ;;  %7584 = vmatprep.mubr.bf16.mxu1 %v13294_v24  ;;  %v6001_v24 = vld [vmem:[%s13711_s17] sm:$0xf] }
 0x788   :  { %v13435_v45 = vrot.slane %v6001_v24, %v13746_v5  ;;  %v13438_v27 = vrot.slane %v6001_v24, %v13747_v47  ;;  %v13441_v9 = vrot.slane %v6001_v24, %v13748_v30 }
 0x78e   :  { %7099 = vmatmul.mubr.bf16.gmra.mrb[176].mxu0 %v13292_v60  ;;  %7585 = vmatmul.mubr.bf16.gmra.mrb[176].mxu1 %v13292_v60 }
 0x78f   :  { %7108 = vmatprep.mubr.bf16.mxu0 %v13306_v29  ;;  %7594 = vmatprep.mubr.bf16.mxu1 %v13306_v29  ;;  %v13745_v29 = vld [vmem:[#allocation3_spill] sm:$0xff] }
 0x790   :  { %v13432_v3 = vrot.slane %v6001_v24, %v13745_v29 }
 0x796   :  { %7109 = vmatmul.mubr.bf16.gmra.mrb[180].mxu0 %v13304_v0  ;;  %7595 = vmatmul.mubr.bf16.gmra.mrb[180].mxu1 %v13304_v0 }
 0x797   :  { %7118 = vmatprep.mubr.bf16.mxu0 %v13743_v40  ;;  %7604 = vmatprep.mubr.bf16.mxu1 %v13743_v40 }
 0x79e   :  { %7119 = vmatmul.mubr.bf16.gmra.mrb[184].mxu0 %v13744_v22  ;;  %7605 = vmatmul.mubr.bf16.gmra.mrb[184].mxu1 %v13744_v22 }
 0x79f   :  { %7128 = vmatprep.mubr.bf16.mxu0 %v13330_v6  ;;  %7614 = vmatprep.mubr.bf16.mxu1 %v13330_v6 }
 0x7a6   :  { %7129 = vmatmul.mubr.bf16.gmra.mrb[188].mxu0 %v13328_v12  ;;  %7615 = vmatmul.mubr.bf16.gmra.mrb[188].mxu1 %v13328_v12 }
 0x7a7   :  { %7138 = vmatprep.mubr.bf16.mxu0 %v13342_v18  ;;  %7624 = vmatprep.mubr.bf16.mxu1 %v13342_v18 }
 0x7ae   :  { %7139 = vmatmul.mubr.bf16.gmra.mrb[192].mxu0 %v13340_v38  ;;  %7625 = vmatmul.mubr.bf16.gmra.mrb[192].mxu1 %v13340_v38 }
 0x7e1   :  { %v6940_v11 = vpop.f32.mrb[112].mxu0  ;;  %v7426_v55 = vpop.f32.mrb[112].mxu1 }
 0x7e2   :  { %v9198_v58 = vadd.f32 %v6940_v11, %v13432_v3  ;;  %v6942_v59 = vpop.f32.mrb[113].mxu0  ;;  %v7428_v46 = vpop.f32.mrb[113].mxu1  ;;  %v9240_v34 = vadd.f32 %v7426_v55, %v13435_v45 }
 0x7e3   :  { %v9199_v61 = vadd.f32 %v6942_v59, %v13438_v27  ;;  %v6944_v21 = vpop.f32.mrb[114].mxu0  ;;  %v7430_v36 = vpop.f32.mrb[114].mxu1  ;;  %v9241_v43 = vadd.f32 %v7428_v46, %v13441_v9 }
 0x7e4   :  { %v7635_v17 = vmul.f32 %v13449_v15, %v9198_v58  ;;  %v6946_v1 = vpop.f32.mrb[115].mxu0  ;;  %v7432_v4 = vpop.f32.mrb[115].mxu1  ;;  %v7637_v35 = vmul.f32 %v13462_v44, %v9240_v34 }
 0x7e5   :  { %v7636_v53 = vmul.f32 %v13455_v51, %v9199_v61  ;;  %v7638_v63 = vmul.f32 %v13468_v32, %v9241_v43 }
 0x7e7   :  { %v7643_v42 = vadd.f32 %v7636_v53, %v7635_v17 }
 0x7e9   :  { %v6950_v57 = vpop.f32.mrb[116].mxu0  ;;  %v7436_v48 = vpop.f32.mrb[116].mxu1  ;;  %v7644_v50 = vadd.f32 %v7643_v42, %v7637_v35 }
 0x7ea   :  { %v9200_v54 = vadd.f32 %v6950_v57, %v13432_v3  ;;  %v6952_v60 = vpop.f32.mrb[117].mxu0  ;;  %v7438_v0 = vpop.f32.mrb[117].mxu1  ;;  %v9242_v6 = vadd.f32 %v7436_v48, %v13435_v45 }
 0x7eb   :  { %v9201_v23 = vadd.f32 %v6952_v60, %v13438_v27  ;;  %v6954_v12 = vpop.f32.mrb[118].mxu0  ;;  %v7440_v56 = vpop.f32.mrb[118].mxu1  ;;  %v13474_v52 = vadd.f32 %v7644_v50, %v7638_v63  ;;  %v9243_v31 = vadd.f32 %v7438_v0, %v13441_v9 }
 0x7ec   :  { %v7653_v28 = vmul.f32 %v13449_v15, %v9200_v54  ;;  %v6956_v37 = vpop.f32.mrb[119].mxu0  ;;  %v7442_v41 = vpop.f32.mrb[119].mxu1  ;;  %v7655_v8 = vmul.f32 %v13462_v44, %v9242_v6 }
 0x7ed   :  { %v7654_v25 = vmul.f32 %v13455_v51, %v9201_v23  ;;  %v7656_v26 = vmul.f32 %v13468_v32, %v9243_v31 }
 0x7ef   :  { %v7661_v7 = vadd.f32 %v7654_v25, %v7653_v28 }
 0x7f1   :  { %v6960_v62 = vpop.f32.mrb[120].mxu0  ;;  %v7446_v14 = vpop.f32.mrb[120].mxu1  ;;  %v7662_v13 = vadd.f32 %v7661_v7, %v7655_v8 }
 0x7f2   :  { %v9202_v10 = vadd.f32 %v6960_v62, %v13432_v3  ;;  %v6962_v20 = vpop.f32.mrb[121].mxu0  ;;  %v7448_v19 = vpop.f32.mrb[121].mxu1  ;;  %v9244_v16 = vadd.f32 %v7446_v14, %v13435_v45 }
 0x7f3   :  { %v9203_v33 = vadd.f32 %v6962_v20, %v13438_v27  ;;  %v6964_v49 = vpop.f32.mrb[122].mxu0  ;;  %v7450_v2 = vpop.f32.mrb[122].mxu1  ;;  %v13484_v38 = vadd.f32 %v7662_v13, %v7656_v26  ;;  %v9245_v24 = vadd.f32 %v7448_v19, %v13441_v9 }
 0x7f4   :  { %v7671_v39 = vmul.f32 %v13449_v15, %v9202_v10  ;;  %v6966_v18 = vpop.f32.mrb[123].mxu0  ;;  %v7452_v40 = vpop.f32.mrb[123].mxu1  ;;  %v7673_v29 = vmul.f32 %v13462_v44, %v9244_v16 }
 0x7f5   :  { %v7672_v22 = vmul.f32 %v13455_v51, %v9203_v33  ;;  %v7674_v47 = vmul.f32 %v13468_v32, %v9245_v24 }
 0x7f7   :  { %v7679_v5 = vadd.f32 %v7672_v22, %v7671_v39 }
 0x7f9   :  { %v6970_v30 = vpop.f32.mrb[124].mxu0  ;;  %v7456_v11 = vpop.f32.mrb[124].mxu1  ;;  %v7680_v55 = vadd.f32 %v7679_v5, %v7673_v29 }
 0x7fa   :  { %v9204_v58 = vadd.f32 %v6970_v30, %v13432_v3  ;;  %v6972_v59 = vpop.f32.mrb[125].mxu0  ;;  %v7458_v46 = vpop.f32.mrb[125].mxu1  ;;  %v9246_v34 = vadd.f32 %v7456_v11, %v13435_v45 }
 0x7fb   :  { %v9205_v61 = vadd.f32 %v6972_v59, %v13438_v27  ;;  %v6974_v21 = vpop.f32.mrb[126].mxu0  ;;  %v7460_v36 = vpop.f32.mrb[126].mxu1  ;;  %v13494_v17 = vadd.f32 %v7680_v55, %v7674_v47  ;;  %v9247_v35 = vadd.f32 %v7458_v46, %v13441_v9 }
 0x7fc   :  { %v7689_v1 = vmul.f32 %v13449_v15, %v9204_v58  ;;  %v6976_v4 = vpop.f32.mrb[127].mxu0  ;;  %v7462_v53 = vpop.f32.mrb[127].mxu1  ;;  %v7691_v42 = vmul.f32 %v13462_v44, %v9246_v34 }
 0x7fd   :  { %v7690_v43 = vmul.f32 %v13455_v51, %v9205_v61  ;;  %v7692_v57 = vmul.f32 %v13468_v32, %v9247_v35 }
 0x7ff   :  { %v7697_v63 = vadd.f32 %v7690_v43, %v7689_v1 }
 0x801   :  { %v6980_v48 = vpop.f32.mrb[128].mxu0  ;;  %v7466_v50 = vpop.f32.mrb[128].mxu1  ;;  %v7698_v54 = vadd.f32 %v7697_v63, %v7691_v42 }
 0x802   :  { %v9206_v60 = vadd.f32 %v6980_v48, %v13432_v3  ;;  %v6982_v0 = vpop.f32.mrb[129].mxu0  ;;  %v7468_v6 = vpop.f32.mrb[129].mxu1  ;;  %v9248_v23 = vadd.f32 %v7466_v50, %v13435_v45 }
 0x803   :  { %v9207_v12 = vadd.f32 %v6982_v0, %v13438_v27  ;;  %v6984_v56 = vpop.f32.mrb[130].mxu0  ;;  %v7470_v28 = vpop.f32.mrb[130].mxu1  ;;  %v13504_v37 = vadd.f32 %v7698_v54, %v7692_v57  ;;  %v9249_v7 = vadd.f32 %v7468_v6, %v13441_v9 }
 0x804   :  { %v7707_v41 = vmul.f32 %v13449_v15, %v9206_v60  ;;  %v6986_v25 = vpop.f32.mrb[131].mxu0  ;;  %v7472_v31 = vpop.f32.mrb[131].mxu1  ;;  %v7709_v26 = vmul.f32 %v13462_v44, %v9248_v23 }
 0x805   :  { %v7708_v8 = vmul.f32 %v13455_v51, %v9207_v12  ;;  %v7710_v14 = vmul.f32 %v13468_v32, %v9249_v7 }
 0x807   :  { %v7715_v62 = vadd.f32 %v7708_v8, %v7707_v41 }
 0x809   :  { %v6990_v13 = vpop.f32.mrb[132].mxu0  ;;  %v7476_v10 = vpop.f32.mrb[132].mxu1  ;;  %v7716_v20 = vadd.f32 %v7715_v62, %v7709_v26 }
 0x80a   :  { %v9208_v19 = vadd.f32 %v6990_v13, %v13432_v3  ;;  %v6992_v16 = vpop.f32.mrb[133].mxu0  ;;  %v7478_v33 = vpop.f32.mrb[133].mxu1  ;;  %v9250_v49 = vadd.f32 %v7476_v10, %v13435_v45 }
 0x80b   :  { %v9209_v2 = vadd.f32 %v6992_v16, %v13438_v27  ;;  %v6994_v39 = vpop.f32.mrb[134].mxu0  ;;  %v7480_v18 = vpop.f32.mrb[134].mxu1  ;;  %v13514_v40 = vadd.f32 %v7716_v20, %v7710_v14  ;;  %v9251_v47 = vadd.f32 %v7478_v33, %v13441_v9 }
 0x80c   :  { %v7725_v22 = vmul.f32 %v13449_v15, %v9208_v19  ;;  %v6996_v24 = vpop.f32.mrb[135].mxu0  ;;  %v7482_v29 = vpop.f32.mrb[135].mxu1  ;;  %v7727_v30 = vmul.f32 %v13462_v44, %v9250_v49 }
 0x80d   :  { %v7726_v5 = vmul.f32 %v13455_v51, %v9209_v2  ;;  %v7728_v55 = vmul.f32 %v13468_v32, %v9251_v47 }
 0x80f   :  { %v7733_v11 = vadd.f32 %v7726_v5, %v7725_v22 }
 0x811   :  { %v7000_v58 = vpop.f32.mrb[136].mxu0  ;;  %v7486_v59 = vpop.f32.mrb[136].mxu1  ;;  %v7734_v46 = vadd.f32 %v7733_v11, %v7727_v30 }
 0x812   :  { %v9210_v34 = vadd.f32 %v7000_v58, %v13432_v3  ;;  %v7002_v61 = vpop.f32.mrb[137].mxu0  ;;  %v7488_v21 = vpop.f32.mrb[137].mxu1  ;;  %v9252_v36 = vadd.f32 %v7486_v59, %v13435_v45 }
 0x813   :  { %v9211_v1 = vadd.f32 %v7002_v61, %v13438_v27  ;;  %v7004_v4 = vpop.f32.mrb[138].mxu0  ;;  %v7490_v53 = vpop.f32.mrb[138].mxu1  ;;  %v13524_v43 = vadd.f32 %v7734_v46, %v7728_v55  ;;  %v9253_v48 = vadd.f32 %v7488_v21, %v13441_v9 }
 0x814   :  { %v7743_v35 = vmul.f32 %v13449_v15, %v9210_v34  ;;  %v7006_v42 = vpop.f32.mrb[139].mxu0  ;;  %v7492_v63 = vpop.f32.mrb[139].mxu1  ;;  %v7745_v50 = vmul.f32 %v13462_v44, %v9252_v36 }
 0x815   :  { %v7744_v57 = vmul.f32 %v13455_v51, %v9211_v1  ;;  %v7746_v60 = vmul.f32 %v13468_v32, %v9253_v48 }
 0x817   :  { %v7751_v54 = vadd.f32 %v7744_v57, %v7743_v35 }
 0x819   :  { %v7010_v0 = vpop.f32.mrb[140].mxu0  ;;  %v7496_v6 = vpop.f32.mrb[140].mxu1  ;;  %v7752_v23 = vadd.f32 %v7751_v54, %v7745_v50 }
 0x81a   :  { %v9212_v12 = vadd.f32 %v7010_v0, %v13432_v3  ;;  %v7012_v56 = vpop.f32.mrb[141].mxu0  ;;  %v7498_v28 = vpop.f32.mrb[141].mxu1  ;;  %v9254_v41 = vadd.f32 %v7496_v6, %v13435_v45 }
 0x81b   :  { %v9213_v25 = vadd.f32 %v7012_v56, %v13438_v27  ;;  %v7014_v31 = vpop.f32.mrb[142].mxu0  ;;  %v7500_v8 = vpop.f32.mrb[142].mxu1  ;;  %v13534_v7 = vadd.f32 %v7752_v23, %v7746_v60  ;;  %v9255_v10 = vadd.f32 %v7498_v28, %v13441_v9 }
 0x81c   :  { %v7761_v26 = vmul.f32 %v13449_v15, %v9212_v12  ;;  %v7016_v62 = vpop.f32.mrb[143].mxu0  ;;  %v7502_v14 = vpop.f32.mrb[143].mxu1  ;;  %v7763_v20 = vmul.f32 %v13462_v44, %v9254_v41 }
 0x81d   :  { %v7762_v13 = vmul.f32 %v13455_v51, %v9213_v25  ;;  %v7764_v16 = vmul.f32 %v13468_v32, %v9255_v10 }
 0x81f   :  { %v7769_v19 = vadd.f32 %v7762_v13, %v7761_v26 }
 0x821   :  { %v7020_v33 = vpop.f32.mrb[144].mxu0  ;;  %v7506_v49 = vpop.f32.mrb[144].mxu1  ;;  %v7770_v2 = vadd.f32 %v7769_v19, %v7763_v20 }
 0x822   :  { %v9214_v39 = vadd.f32 %v7020_v33, %v13432_v3  ;;  %v7022_v18 = vpop.f32.mrb[145].mxu0  ;;  %v7508_v22 = vpop.f32.mrb[145].mxu1  ;;  %v9256_v24 = vadd.f32 %v7506_v49, %v13435_v45 }
 0x823   :  { %v9215_v29 = vadd.f32 %v7022_v18, %v13438_v27  ;;  %v7024_v5 = vpop.f32.mrb[146].mxu0  ;;  %v7510_v47 = vpop.f32.mrb[146].mxu1  ;;  %v13544_v30 = vadd.f32 %v7770_v2, %v7764_v16  ;;  %v9257_v46 = vadd.f32 %v7508_v22, %v13441_v9 }
 0x824   :  { %v7779_v11 = vmul.f32 %v13449_v15, %v9214_v39  ;;  %v7026_v55 = vpop.f32.mrb[147].mxu0  ;;  %v7512_v58 = vpop.f32.mrb[147].mxu1  ;;  %v7781_v34 = vmul.f32 %v13462_v44, %v9256_v24 }
 0x825   :  { %v7780_v59 = vmul.f32 %v13455_v51, %v9215_v29  ;;  %v7782_v21 = vmul.f32 %v13468_v32, %v9257_v46 }
 0x827   :  { %v7787_v61 = vadd.f32 %v7780_v59, %v7779_v11 }
 0x829   :  { %v7030_v36 = vpop.f32.mrb[148].mxu0  ;;  %v7516_v1 = vpop.f32.mrb[148].mxu1  ;;  %v7788_v4 = vadd.f32 %v7787_v61, %v7781_v34 }
 0x82a   :  { %v9216_v53 = vadd.f32 %v7030_v36, %v13432_v3  ;;  %v7032_v35 = vpop.f32.mrb[149].mxu0  ;;  %v7518_v42 = vpop.f32.mrb[149].mxu1  ;;  %v9258_v63 = vadd.f32 %v7516_v1, %v13435_v45 }
 0x82b   :  { %v9217_v57 = vadd.f32 %v7032_v35, %v13438_v27  ;;  %v7034_v48 = vpop.f32.mrb[150].mxu0  ;;  %v7520_v50 = vpop.f32.mrb[150].mxu1  ;;  %v13554_v54 = vadd.f32 %v7788_v4, %v7782_v21  ;;  %v9259_v12 = vadd.f32 %v7518_v42, %v13441_v9 }
 0x82c   :  { %v7797_v60 = vmul.f32 %v13449_v15, %v9216_v53  ;;  %v7036_v0 = vpop.f32.mrb[151].mxu0  ;;  %v7522_v6 = vpop.f32.mrb[151].mxu1  ;;  %v7799_v56 = vmul.f32 %v13462_v44, %v9258_v63 }
 0x82d   :  { %v7798_v23 = vmul.f32 %v13455_v51, %v9217_v57  ;;  %v7800_v41 = vmul.f32 %v13468_v32, %v9259_v12 }
 0x82f   :  { %v7805_v28 = vadd.f32 %v7798_v23, %v7797_v60 }
 0x831   :  { %v7040_v25 = vpop.f32.mrb[152].mxu0  ;;  %v7526_v31 = vpop.f32.mrb[152].mxu1  ;;  %v7806_v8 = vadd.f32 %v7805_v28, %v7799_v56 }
 0x832   :  { %v9218_v26 = vadd.f32 %v7040_v25, %v13432_v3  ;;  %v7042_v62 = vpop.f32.mrb[153].mxu0  ;;  %v7528_v14 = vpop.f32.mrb[153].mxu1  ;;  %v9260_v13 = vadd.f32 %v7526_v31, %v13435_v45 }
 0x833   :  { %v9219_v10 = vadd.f32 %v7042_v62, %v13438_v27  ;;  %v7044_v20 = vpop.f32.mrb[154].mxu0  ;;  %v7530_v19 = vpop.f32.mrb[154].mxu1  ;;  %v13564_v16 = vadd.f32 %v7806_v8, %v7800_v41  ;;  %v9261_v18 = vadd.f32 %v7528_v14, %v13441_v9 }
 0x834   :  { %v7815_v33 = vmul.f32 %v13449_v15, %v9218_v26  ;;  %v7046_v49 = vpop.f32.mrb[155].mxu0  ;;  %v7532_v2 = vpop.f32.mrb[155].mxu1  ;;  %v7817_v22 = vmul.f32 %v13462_v44, %v9260_v13 }
 0x835   :  { %v7816_v39 = vmul.f32 %v13455_v51, %v9219_v10  ;;  %v7818_v29 = vmul.f32 %v13468_v32, %v9261_v18 }
 0x837   :  { %v7823_v24 = vadd.f32 %v7816_v39, %v7815_v33 }
 0x839   :  { %v7050_v5 = vpop.f32.mrb[156].mxu0  ;;  %v7536_v47 = vpop.f32.mrb[156].mxu1  ;;  %v7824_v11 = vadd.f32 %v7823_v24, %v7817_v22 }
 0x83a   :  { %v9220_v55 = vadd.f32 %v7050_v5, %v13432_v3  ;;  %v7052_v58 = vpop.f32.mrb[157].mxu0  ;;  %v7538_v59 = vpop.f32.mrb[157].mxu1  ;;  %v9262_v46 = vadd.f32 %v7536_v47, %v13435_v45 }
 0x83b   :  { %v9221_v34 = vadd.f32 %v7052_v58, %v13438_v27  ;;  %v7054_v61 = vpop.f32.mrb[158].mxu0  ;;  %v7540_v21 = vpop.f32.mrb[158].mxu1  ;;  %v13574_v36 = vadd.f32 %v7824_v11, %v7818_v29  ;;  %v9263_v42 = vadd.f32 %v7538_v59, %v13441_v9 }
 0x83c   :  { %v7833_v1 = vmul.f32 %v13449_v15, %v9220_v55  ;;  %v7056_v4 = vpop.f32.mrb[159].mxu0  ;;  %v7542_v53 = vpop.f32.mrb[159].mxu1  ;;  %v7835_v63 = vmul.f32 %v13462_v44, %v9262_v46 }
 0x83d   :  { %v7834_v35 = vmul.f32 %v13455_v51, %v9221_v34  ;;  %v7836_v48 = vmul.f32 %v13468_v32, %v9263_v42 }
 0x83f   :  { %v7841_v57 = vadd.f32 %v7834_v35, %v7833_v1 }
 0x841   :  { %v7060_v50 = vpop.f32.mrb[160].mxu0  ;;  %v7546_v60 = vpop.f32.mrb[160].mxu1  ;;  %v7842_v0 = vadd.f32 %v7841_v57, %v7835_v63 }
 0x842   :  { %v9222_v6 = vadd.f32 %v7060_v50, %v13432_v3  ;;  %v7062_v23 = vpop.f32.mrb[161].mxu0  ;;  %v7548_v12 = vpop.f32.mrb[161].mxu1  ;;  %v9264_v56 = vadd.f32 %v7546_v60, %v13435_v45 }
 0x843   :  { %v9223_v28 = vadd.f32 %v7062_v23, %v13438_v27  ;;  %v7064_v41 = vpop.f32.mrb[162].mxu0  ;;  %v7550_v25 = vpop.f32.mrb[162].mxu1  ;;  %v13584_v31 = vadd.f32 %v7842_v0, %v7836_v48  ;;  %v9265_v13 = vadd.f32 %v7548_v12, %v13441_v9 }
 0x844   :  { %v7851_v8 = vmul.f32 %v13449_v15, %v9222_v6  ;;  %v7066_v26 = vpop.f32.mrb[163].mxu0  ;;  %v7552_v62 = vpop.f32.mrb[163].mxu1  ;;  %v7853_v10 = vmul.f32 %v13462_v44, %v9264_v56 }
 0x845   :  { %v7852_v14 = vmul.f32 %v13455_v51, %v9223_v28  ;;  %v7854_v19 = vmul.f32 %v13468_v32, %v9265_v13 }
 0x847   :  { %v7859_v20 = vadd.f32 %v7852_v14, %v7851_v8 }
 0x849   :  { %v7070_v33 = vpop.f32.mrb[164].mxu0  ;;  %v7556_v49 = vpop.f32.mrb[164].mxu1  ;;  %v7860_v2 = vadd.f32 %v7859_v20, %v7853_v10 }
 0x84a   :  { %v9224_v39 = vadd.f32 %v7070_v33, %v13432_v3  ;;  %v7072_v18 = vpop.f32.mrb[165].mxu0  ;;  %v7558_v22 = vpop.f32.mrb[165].mxu1  ;;  %v9266_v24 = vadd.f32 %v7556_v49, %v13435_v45 }
 0x84b   :  { %v9225_v29 = vadd.f32 %v7072_v18, %v13438_v27  ;;  %v7074_v5 = vpop.f32.mrb[166].mxu0  ;;  %v7560_v47 = vpop.f32.mrb[166].mxu1  ;;  %v13594_v11 = vadd.f32 %v7860_v2, %v7854_v19  ;;  %v9267_v34 = vadd.f32 %v7558_v22, %v13441_v9 }
 0x84c   :  { %v7869_v55 = vmul.f32 %v13449_v15, %v9224_v39  ;;  %v7076_v58 = vpop.f32.mrb[167].mxu0  ;;  %v7562_v59 = vpop.f32.mrb[167].mxu1  ;;  %v7871_v61 = vmul.f32 %v13462_v44, %v9266_v24 }
 0x84d   :  { %v7870_v46 = vmul.f32 %v13455_v51, %v9225_v29  ;;  %v7872_v1 = vmul.f32 %v13468_v32, %v9267_v34 }
 0x84f   :  { %v7877_v21 = vadd.f32 %v7870_v46, %v7869_v55 }
 0x851   :  { %v7080_v4 = vpop.f32.mrb[168].mxu0  ;;  %v7566_v53 = vpop.f32.mrb[168].mxu1  ;;  %v7878_v35 = vadd.f32 %v7877_v21, %v7871_v61 }
 0x852   :  { %v9226_v42 = vadd.f32 %v7080_v4, %v13432_v3  ;;  %v7082_v63 = vpop.f32.mrb[169].mxu0  ;;  %v7568_v57 = vpop.f32.mrb[169].mxu1  ;;  %v9268_v48 = vadd.f32 %v7566_v53, %v13435_v45 }
 0x853   :  { %v9227_v50 = vadd.f32 %v7082_v63, %v13438_v27  ;;  %v7084_v60 = vpop.f32.mrb[170].mxu0  ;;  %v7570_v0 = vpop.f32.mrb[170].mxu1  ;;  %v13604_v6 = vadd.f32 %v7878_v35, %v7872_v1  ;;  %v9269_v41 = vadd.f32 %v7568_v57, %v13441_v9 }
 0x854   :  { %v7887_v23 = vmul.f32 %v13449_v15, %v9226_v42  ;;  %v7086_v12 = vpop.f32.mrb[171].mxu0  ;;  %v7572_v56 = vpop.f32.mrb[171].mxu1  ;;  %v7889_v25 = vmul.f32 %v13462_v44, %v9268_v48 }
 0x855   :  { %v7888_v28 = vmul.f32 %v13455_v51, %v9227_v50  ;;  %v7890_v26 = vmul.f32 %v13468_v32, %v9269_v41 }
 0x857   :  { %v7895_v8 = vadd.f32 %v7888_v28, %v7887_v23 }
 0x859   :  { %v7090_v62 = vpop.f32.mrb[172].mxu0  ;;  %v7576_v14 = vpop.f32.mrb[172].mxu1  ;;  %v7896_v13 = vadd.f32 %v7895_v8, %v7889_v25 }
 0x85a   :  { %v9228_v10 = vadd.f32 %v7090_v62, %v13432_v3  ;;  %v9270_v20 = vadd.f32 %v7576_v14, %v13435_v45  ;;  %v7092_v19 = vpop.f32.mrb[173].mxu0  ;;  %v7578_v33 = vpop.f32.mrb[173].mxu1 }
 0x85b   :  { %v9229_v49 = vadd.f32 %v7092_v19, %v13438_v27  ;;  %v9271_v2 = vadd.f32 %v7578_v33, %v13441_v9  ;;  %v7094_v39 = vpop.f32.mrb[174].mxu0  ;;  %v7580_v18 = vpop.f32.mrb[174].mxu1  ;;  %v13615_v22 = vadd.f32 %v7896_v13, %v7890_v26 }
 0x85c   :  { %v7905_v24 = vmul.f32 %v13449_v15, %v9228_v10  ;;  %v7096_v29 = vpop.f32.mrb[175].mxu0  ;;  %v7582_v5 = vpop.f32.mrb[175].mxu1  ;;  %v7907_v55 = vmul.f32 %v13462_v44, %v9270_v20 }
 0x85d   :  { %v7906_v47 = vmul.f32 %v13455_v51, %v9229_v49  ;;  %v7908_v59 = vmul.f32 %v13468_v32, %v9271_v2 }
 0x85f   :  { %v7913_v58 = vadd.f32 %v7906_v47, %v7905_v24 }
 0x861   :  { %v7100_v46 = vpop.f32.mrb[176].mxu0  ;;  %v7586_v34 = vpop.f32.mrb[176].mxu1  ;;  %v7914_v61 = vadd.f32 %v7913_v58, %v7907_v55 }
 0x862   :  { %v9230_v21 = vadd.f32 %v7100_v46, %v13432_v3  ;;  %v7102_v1 = vpop.f32.mrb[177].mxu0  ;;  %v7588_v4 = vpop.f32.mrb[177].mxu1  ;;  %v9272_v53 = vadd.f32 %v7586_v34, %v13435_v45 }
 0x863   :  { %v9231_v35 = vadd.f32 %v7102_v1, %v13438_v27  ;;  %v7104_v42 = vpop.f32.mrb[178].mxu0  ;;  %v7590_v63 = vpop.f32.mrb[178].mxu1  ;;  %v13624_v57 = vadd.f32 %v7914_v61, %v7908_v59  ;;  %v9273_v23 = vadd.f32 %v7588_v4, %v13441_v9 }
 0x864   :  { %v7923_v48 = vmul.f32 %v13449_v15, %v9230_v21  ;;  %v7106_v50 = vpop.f32.mrb[179].mxu0  ;;  %v7592_v60 = vpop.f32.mrb[179].mxu1  ;;  %v7925_v12 = vmul.f32 %v13462_v44, %v9272_v53 }
 0x865   :  { %v7924_v0 = vmul.f32 %v13455_v51, %v9231_v35  ;;  %v7926_v25 = vmul.f32 %v13468_v32, %v9273_v23 }
 0x867   :  { %v7931_v56 = vadd.f32 %v7924_v0, %v7923_v48 }
 0x869   :  { %v7110_v28 = vpop.f32.mrb[180].mxu0  ;;  %v7596_v41 = vpop.f32.mrb[180].mxu1  ;;  %v7932_v8 = vadd.f32 %v7931_v56, %v7925_v12 }
 0x86a   :  { %v9232_v26 = vadd.f32 %v7110_v28, %v13432_v3  ;;  %v7112_v62 = vpop.f32.mrb[181].mxu0  ;;  %v7598_v14 = vpop.f32.mrb[181].mxu1  ;;  %v9274_v13 = vadd.f32 %v7596_v41, %v13435_v45 }
 0x86b   :  { %v9233_v10 = vadd.f32 %v7112_v62, %v13438_v27  ;;  %v7114_v20 = vpop.f32.mrb[182].mxu0  ;;  %v7600_v19 = vpop.f32.mrb[182].mxu1  ;;  %v7933_v33 = vadd.f32 %v7932_v8, %v7926_v25  ;;  %v9275_v24 = vadd.f32 %v7598_v14, %v13441_v9 }
 0x86c   :  { %v7941_v49 = vmul.f32 %v13449_v15, %v9232_v26  ;;  %v7116_v2 = vpop.f32.mrb[183].mxu0  ;;  %v7602_v39 = vpop.f32.mrb[183].mxu1  ;;  %v7943_v29 = vmul.f32 %v13462_v44, %v9274_v13 }
 0x86d   :  { %v7942_v18 = vmul.f32 %v13455_v51, %v9233_v10  ;;  %7934 = vadd.xlane.f32.xlu0 %v7933_v33  ;;  %v7944_v47 = vmul.f32 %v13468_v32, %v9275_v24 }
 0x86f   :  { %v7949_v5 = vadd.f32 %v7942_v18, %v7941_v49 }
 0x871   :  { %v7120_v55 = vpop.f32.mrb[184].mxu0  ;;  %v7606_v58 = vpop.f32.mrb[184].mxu1  ;;  %v7950_v59 = vadd.f32 %v7949_v5, %v7943_v29 }
 0x872   :  { %v9234_v46 = vadd.f32 %v7120_v55, %v13432_v3  ;;  %v7122_v34 = vpop.f32.mrb[185].mxu0  ;;  %v7608_v61 = vpop.f32.mrb[185].mxu1  ;;  %v9276_v21 = vadd.f32 %v7606_v58, %v13435_v45 }
 0x873   :  { %v9235_v1 = vadd.f32 %v7122_v34, %v13438_v27  ;;  %v7124_v4 = vpop.f32.mrb[186].mxu0  ;;  %v7610_v53 = vpop.f32.mrb[186].mxu1  ;;  %v7951_v35 = vadd.f32 %v7950_v59, %v7944_v47  ;;  %v9277_v60 = vadd.f32 %v7608_v61, %v13441_v9 }
 0x874   :  { %v7959_v42 = vmul.f32 %v13449_v15, %v9234_v46  ;;  %v7126_v63 = vpop.f32.mrb[187].mxu0  ;;  %v7612_v48 = vpop.f32.mrb[187].mxu1  ;;  %v7961_v0 = vmul.f32 %v13462_v44, %v9276_v21 }
 0x875   :  { %v7960_v50 = vmul.f32 %v13455_v51, %v9235_v1  ;;  %7952 = vadd.xlane.f32.xlu0 %v7951_v35  ;;  %v7962_v28 = vmul.f32 %v13468_v32, %v9277_v60 }
 0x877   :  { %v7967_v23 = vadd.f32 %v7960_v50, %v7959_v42 }
 0x879   :  { %v7130_v12 = vpop.f32.mrb[188].mxu0  ;;  %v7616_v56 = vpop.f32.mrb[188].mxu1  ;;  %v7968_v41 = vadd.f32 %v7967_v23, %v7961_v0 }
 0x87a   :  { %v9236_v25 = vadd.f32 %v7130_v12, %v13432_v3  ;;  %v7132_v8 = vpop.f32.mrb[189].mxu0  ;;  %v7618_v26 = vpop.f32.mrb[189].mxu1  ;;  %v9278_v62 = vadd.f32 %v7616_v56, %v13435_v45 }
 0x87b   :  { %v9237_v14 = vadd.f32 %v7132_v8, %v13438_v27  ;;  %v7134_v13 = vpop.f32.mrb[190].mxu0  ;;  %v7620_v10 = vpop.f32.mrb[190].mxu1  ;;  %v7969_v20 = vadd.f32 %v7968_v41, %v7962_v28  ;;  %v9279_v39 = vadd.f32 %v7618_v26, %v13441_v9 }
 0x87c   :  { %v7977_v19 = vmul.f32 %v13449_v15, %v9236_v25  ;;  %v7136_v33 = vpop.f32.mrb[191].mxu0  ;;  %v7622_v49 = vpop.f32.mrb[191].mxu1  ;;  %v7979_v18 = vmul.f32 %v13462_v44, %v9278_v62 }
 0x87d   :  { %v7978_v2 = vmul.f32 %v13455_v51, %v9237_v14  ;;  %7970 = vadd.xlane.f32.xlu1 %v7969_v20  ;;  %v7980_v29 = vmul.f32 %v13468_v32, %v9279_v39 }
 0x87f   :  { %v7985_v24 = vadd.f32 %v7978_v2, %v7977_v19 }
 0x881   :  { %v7140_v5 = vpop.f32.mrb[192].mxu0  ;;  %v7626_v47 = vpop.f32.mrb[192].mxu1  ;;  %v7986_v55 = vadd.f32 %v7985_v24, %v7979_v18 }
 0x882   :  { %v9238_v58 = vadd.f32 %v7140_v5, %v13432_v3  ;;  %v7142_v59 = vpop.f32.mrb[193].mxu0  ;;  %v7628_v46 = vpop.f32.mrb[193].mxu1  ;;  %v9280_v34 = vadd.f32 %v7626_v47, %v13435_v45 }
 0x883   :  { %v9239_v61 = vadd.f32 %v7142_v59, %v13438_v27  ;;  %v7144_v21 = vpop.f32.mrb[194].mxu0  ;;  %v7630_v1 = vpop.f32.mrb[194].mxu1  ;;  %v7987_v4 = vadd.f32 %v7986_v55, %v7980_v29  ;;  %v9281_v48 = vadd.f32 %v7628_v46, %v13441_v9 }
 0x884   :  { %v7995_v53 = vmul.f32 %v13449_v15, %v9238_v58  ;;  %v7146_v35 = vpop.f32.mrb[195].mxu0  ;;  %v7632_v42 = vpop.f32.mrb[195].mxu1  ;;  %v7997_v3 = vmul.f32 %v13462_v44, %v9280_v34  ;;  %v13749_v34 = vld [vmem:[#allocation7_spill] sm:$0xff]  ;;  %v13750_v1 = vld [vmem:[#allocation2_spill] sm:$0xff] }
 0x885   :  { %v7996_v63 = vmul.f32 %v13455_v51, %v9239_v61  ;;  %7988 = vadd.xlane.f32.xlu1 %v7987_v4  ;;  %v7998_v60 = vmul.f32 %v13468_v32, %v9281_v48 }
 0x887   :  { %v8003_v50 = vadd.f32 %v7996_v63, %v7995_v53 }
 0x889   :  { %7646 = vadd.xlane.f32.xlu1 %v13474_v52  ;;  %v8004_v45 = vadd.f32 %v8003_v50, %v7997_v3 }
 0x88b   :  { %v8005_v27 = vadd.f32 %v8004_v45, %v7998_v60 }
 0x88d   :  { %8006 = vadd.xlane.f32.xlu0 %v8005_v27  ;;  %7682 = vadd.xlane.f32.xlu1 %v13494_v17 }
 0x891   :  { %7664 = vadd.xlane.f32.xlu0 %v13484_v38  ;;  %7718 = vadd.xlane.f32.xlu1 %v13514_v40 }
 0x895   :  { %7700 = vadd.xlane.f32.xlu0 %v13504_v37  ;;  %7754 = vadd.xlane.f32.xlu1 %v13534_v7 }
 0x899   :  { %7736 = vadd.xlane.f32.xlu0 %v13524_v43  ;;  %7790 = vadd.xlane.f32.xlu1 %v13554_v54 }
 0x89d   :  { %7772 = vadd.xlane.f32.xlu0 %v13544_v30  ;;  %7826 = vadd.xlane.f32.xlu1 %v13574_v36 }
 0x8a1   :  { %7808 = vadd.xlane.f32.xlu0 %v13564_v16  ;;  %7862 = vadd.xlane.f32.xlu1 %v13594_v11 }
 0x8a5   :  { %7844 = vadd.xlane.f32.xlu0 %v13584_v31  ;;  %7898 = vadd.xlane.f32.xlu1 %v13615_v22 }
 0x8a9   :  { %7880 = vadd.xlane.f32.xlu0 %v13604_v6 }
 0x8ad   :  { %7916 = vadd.xlane.f32.xlu0 %v13624_v57 }
 0x8fa   :  { %v7935_v15 = vpop.xlane.xlu0 %7934 }
 0x902   :  { %v7953_v44 = vpop.xlane.xlu0 %7952 }
 0x903   :  { %v8058_v52 = vsel %vm8013_vm1, %v7935_v15, %v7953_v44 }
 0x90a   :  { %v7971_v9 = vpop.xlane.xlu1 %7970 }
 0x90b   :  { %v8060_v38 = vsel %vm8016_vm2, %v8058_v52, %v7971_v9 }
 0x912   :  { %v7989_v51 = vpop.xlane.xlu1 %7988 }
 0x913   :  { %v8062_v17 = vsel %vm8019_vm3, %v8060_v38, %v7989_v51 }
 0x916   :  { %v7647_v32 = vpop.xlane.xlu1 %7646 }
 0x91a   :  { %v8007_v37 = vpop.xlane.xlu0 %8006  ;;  %v7683_v43 = vpop.xlane.xlu1 %7682 }
 0x91b   :  { %v8064_v40 = vsel %vm8022_vm4, %v8062_v17, %v8007_v37 }
 0x91c   :  { %8068 = vrot.lane.b32.xlu1 %v8064_v40, %s10682_s20 }
 0x91e   :  { %v7665_v7 = vpop.xlane.xlu0 %7664  ;;  %v7719_v36 = vpop.xlane.xlu1 %7718 }
 0x91f   :  { %v8014_v30 = vsel %vm8013_vm1, %v7647_v32, %v7665_v7 }
 0x920   :  { %v8017_v16 = vsel %vm8016_vm2, %v8014_v30, %v7683_v43  ;;  %vm8079_vm2 = vcmask 171008  }
 0x922   :  { %v7701_v54 = vpop.xlane.xlu0 %7700  ;;  %v7755_v22 = vpop.xlane.xlu1 %7754 }
 0x923   :  { %v8020_v31 = vsel %vm8019_vm3, %v8017_v16, %v7701_v54  ;;  %vm8113_vm3 = vcmp.lt.s32.totalorder %v13750_v1, 2 }
 0x924   :  { %v8023_v11 = vsel %vm8022_vm4, %v8020_v31, %v7719_v36 }
 0x926   :  { %v7737_v6 = vpop.xlane.xlu0 %7736  ;;  %v7791_v0 = vpop.xlane.xlu1 %7790 }
 0x927   :  { %v8026_v12 = vsel %vm8025_vm5, %v8023_v11, %v7737_v6 }
 0x928   :  { %v8029_v56 = vsel %vm8028_vm6, %v8026_v12, %v7755_v22 }
 0x92a   :  { %v7773_v57 = vpop.xlane.xlu0 %7772  ;;  %v7827_v41 = vpop.xlane.xlu1 %7826 }
 0x92b   :  { %v8032_v28 = vsel %vm8031_vm7, %v8029_v56, %v7773_v57 }
 0x92c   :  { %v8035_v8 = vsel %vm8034_vm8, %v8032_v28, %v7791_v0 }
 0x92e   :  { %v7809_v23 = vpop.xlane.xlu0 %7808  ;;  %v7863_v62 = vpop.xlane.xlu1 %7862 }
 0x92f   :  { %v8038_v26 = vsel %vm8037_vm9, %v8035_v8, %v7809_v23 }
 0x930   :  { %v8041_v14 = vsel %vm8040_vm10, %v8038_v26, %v7827_v41 }
 0x932   :  { %v7845_v25 = vpop.xlane.xlu0 %7844  ;;  %v7899_v19 = vpop.xlane.xlu1 %7898 }
 0x933   :  { %v8044_v10 = vsel %vm8043_vm11, %v8041_v14, %v7845_v25 }
 0x934   :  { %v8047_v20 = vsel %vm8046_vm12, %v8044_v10, %v7863_v62 }
 0x936   :  { %v7881_v13 = vpop.xlane.xlu0 %7880 }
 0x937   :  { %v8050_v33 = vsel %vm8049_vm13, %v8047_v20, %v7881_v13 }
 0x938   :  { %v8053_v2 = vsel %vm8052_vm14, %v8050_v33, %v7899_v19 }
 0x93a   :  { %v7917_v49 = vpop.xlane.xlu0 %7916 }
 0x93b   :  { %v8056_v39 = vsel %vm8055_vm15, %v8053_v2, %v7917_v49 }
 0x98e   :  { %v8069_v18 = vpop.permute.xlu1 %8068 }
 0x98f   :  { %v8075_v24 = vsel %vm8074_vm0, %v8056_v39, %v8069_v18 }
 0x990   :  { %v8077_v29 = vmul.f32 14.285714, %v8075_v24 }
 0x992   :  { %v8080_v5 = vsel %vm8079_vm2, %v8077_v29, -inf }
 0x993   :  { %8081 = vmax.xlane.f32.xlu0 %v8080_v5 }
 0xa20   :  { %v8082_v47 = vpop.xlane.xlu0 %8081 }
 0xa21   :  { %v8086_v55 = vsub.f32 %v8077_v29, %v8082_v47 }
 0xa23   :  { %v8088_v58 = vmul.f32 1.442695, %v8086_v55 }
 0xa25   :  { %10666 = vpow2.f32 %v8088_v58 }
 0xa2f   :  { %v10667_v59 = vpop.eup %10666 }
 0xa30   :  { %v8092_v46 = vsel %vm8079_vm2, %v10667_v59, 0.0 }
 0xa31   :  { %8093 = vadd.xlane.f32.xlu0 %v8092_v46 }
 0xa35   :  { %1685 = vadd.xlane.f32.xlu0 %v13749_v34 }
 0xabe   :  { %v8094_v61 = vpop.xlane.xlu0 %8093 }
 0xabf   :  { %10668 = vlog2.f32 %v8094_v61 }
 0xac2   :  { %v1686_v21 = vpop.xlane.xlu0 %1685 }
 0xac3   :  { %v1693_v4 = vmul.f32 0.0016666667, %v1686_v21 }
 0xac5   :  { %v8115_v53 = vsel %vm8113_vm3, %v1693_v4, 0.0 }
 0xac6   :  { %v8117_v35 = vsel %vm8013_vm1, %v8115_v53, 0.0 }
 0xac7   :  { %8120 = vadd.xlane.f32.xlu0 %v8117_v35 }
 0xac9   :  { %v10669_v42 = vpop.eup %10668 }
 0xaca   :  { %v8099_v63 = vmul.f32 0.6931472, %v10669_v42 }
 0xacc   :  { %v8102_v48 = vadd.f32 %v8099_v63, %v8082_v47 }
 0xace   :  { %v8104_v3 = vsub.f32 %v8102_v48, %v8077_v29 }
 0xad0   :  { %v8129_v50 = vsel %vm8113_vm3, %v8104_v3, 0.0 }
 0xad1   :  { %v8131_v60 = vsel %vm8013_vm1, %v8129_v50, 0.0 }
 0xad2   :  { %8134 = vadd.xlane.f32.xlu1 %v8131_v60 }
 0xb54   :  { %v8121_v45 = vpop.xlane.xlu0 %8120 }
 0xb55   :  { %v8122_v27 = vrot.slane %v8121_v45, 4 }
 0xb57   :  { %v8123_v9 = vadd.f32 %v8122_v27, %v8121_v45 }
 0xb59   :  { %v8124_v15 = vrot.slane %v8123_v9, 2 }
 0xb5b   :  { %v8125_v51 = vadd.f32 %v8124_v15, %v8123_v9 }
 0xb5d   :  { %v8126_v44 = vrot.slane %v8125_v51, 1 }
 0xb5f   :  { %v8135_v32 = vpop.xlane.xlu1 %8134  ;;  %v8127_v52 = vadd.f32 %v8126_v44, %v8125_v51 }
 0xb60   :  { %v8136_v38 = vrot.slane %v8135_v32, 4 }
 0xb61   :  { %9634 = vpush %v8127_v52 }
 0xb62   :  { %v8137_v17 = vadd.f32 %v8136_v38, %v8135_v32 }
 0xb64   :  { %v8138_v37 = vrot.slane %v8137_v17, 2 }
 0xb66   :  { %v8139_v40 = vadd.f32 %v8138_v37, %v8137_v17 }
 0xb68   :  { %v8140_v43 = vrot.slane %v8139_v40, 1 }
 0xb6a   :  { %v8141_v7 = vadd.f32 %v8140_v43, %v8139_v40 }
 0xb6c   :  { %9636 = vpush %v8141_v7 }
 0xb92   :  { %s9635_s8 = spop %9634 }
 0xb93   :  { %v8143_v30 = vstv %s9635_s8 }
 0xb94   :  { %8145 = vst [vmem:[%s13712_s18] sm:$0xff] %v8143_v30 }
 0xb9d   :  { %s9637_s23 = spop %9636 }
 0xb9e   :  { %v8146_v54 = vstv %s9637_s23 }
 0xb9f   :  { %8148 = vst [vmem:[%s13713_s19] sm:$0xff] %v8146_v54 }

</bundles_post_ra>
